<compile_context>
chip_gen: v7x
topology: tpu7x:2x2x1
jax: 0.10.0
libtpu: 0.0.40
codegen_flags: <defaults>
</compile_context>

<pallas_src>
from functools import partial

import numpy as np

import jax
import jax.numpy as jnp
from jax.experimental import pallas as pl
from jax.experimental.pallas import tpu as pltpu


BATCH_TILE = 256     # per-grid-step batch tile (review: 128 on v5e, 256 on v6e/v7x)
_TIME_UNROLL = 8     # partial unroll of the sequential time loop


def _round_up(n, m):
    return (n + m - 1) // m * m


def _vmem_limit_bytes(*buffers):
    """Scoped-VMEM request sized from the buffers resident per grid step."""
    total = sum(int(np.prod(shape)) * jnp.dtype(dtype).itemsize
                for shape, dtype in buffers)
    # 2x for double-buffered pipelining + headroom; clamp to v7x physical (64 MiB).
    return int(min(max(2 * total + (4 << 20), 16 << 20), 64 << 20))


# ----------------------------- in-kernel helpers ------------------------------
def _input_projection(x_ref, wih_ref, b_ref, gx_ref):
    """gates_x[t] = x[t] @ W_ih^T + bias for ALL t, as one big bf16 MXU matmul."""
    S, TB, Din = x_ref.shape
    gx = (
        jnp.dot(x_ref[...].reshape(S * TB, Din), wih_ref[...],
                preferred_element_type=jnp.float32)      # f32 accumulation
        + b_ref[...]
    )
    gx_ref[...] = gx.reshape(S, TB, -1).astype(gx_ref.dtype)   # store bf16


def _recurrence(gx_ref, whh_ref, out_seq_ref=None):
    """Sequential LSTM recurrence; h/c carried as fori_loop values (f32)."""
    S, TB, Hp4 = gx_ref.shape
    Hp = Hp4 // 4  # each gate occupies a 128-lane-aligned block of Hp columns

    def step(t, carry):
        h, c = carry
        # Recurrent matmul: bf16 operands, f32 accumulation on the MXU.
        g = gx_ref[t].astype(jnp.float32) + jnp.dot(
            h.astype(jnp.bfloat16), whh_ref[...],
            preferred_element_type=jnp.float32)
        # Lane-aligned gate slices (PyTorch order i, f, g, o); f32 VPU/EUP math.
        i_g = jax.nn.sigmoid(g[:, 0 * Hp:1 * Hp])
        f_g = jax.nn.sigmoid(g[:, 1 * Hp:2 * Hp])
        g_g = jnp.tanh(g[:, 2 * Hp:3 * Hp])
        o_g = jax.nn.sigmoid(g[:, 3 * Hp:4 * Hp])
        c = f_g * c + i_g * g_g
        h = o_g * jnp.tanh(c)
        if out_seq_ref is not None:
            out_seq_ref[t] = h.astype(out_seq_ref.dtype)
        return (h, c)

    z = jnp.zeros((TB, Hp), jnp.float32)
    h_last, _ = jax.lax.fori_loop(0, S, step, (z, z),
                                  unroll=min(_TIME_UNROLL, S))
    return h_last


# --------------------------------- kernels ------------------------------------
def _lstm_seq_kernel(x_ref, wih_ref, whh_ref, b_ref, out_ref, gx_ref):
    """One LSTM layer; emits the full hidden sequence (feeds the next layer)."""
    _input_projection(x_ref, wih_ref, b_ref, gx_ref)
    _recurrence(gx_ref, whh_ref, out_seq_ref=out_ref)


def _lstm_last_fc_kernel(x_ref, wih_ref, whh_ref, b_ref, wfc_ref, bfc_ref,
                         out_ref, gx_ref):
    """Last LSTM layer fused with the final Linear: out = h_T @ W_fc^T + b_fc."""
    _input_projection(x_ref, wih_ref, b_ref, gx_ref)
    h_last = _recurrence(gx_ref, whh_ref)
    out_ref[...] = (
        jnp.dot(h_last.astype(jnp.bfloat16), wfc_ref[...],
                preferred_element_type=jnp.float32)
        + bfc_ref[...]
    )


# ----------------------------- pallas_call wrappers ----------------------------
def lstm_layer_seq(x, wih, whh, b):
    """x: (S, Bp, Din) bf16; wih: (Din, 4Hp) bf16; whh: (Hp, 4Hp) bf16;
    b: (1, 4Hp) f32  ->  (S, Bp, Hp) bf16."""
    S, Bp, Din = x.shape
    Hp4 = wih.shape[1]
    Hp = Hp4 // 4
    TB = min(Bp, BATCH_TILE)
    assert Bp % TB == 0
    vmem = _vmem_limit_bytes(
        ((S, TB, Din), jnp.bfloat16),     # x tile
        ((Din, Hp4), jnp.bfloat16),       # wih
        ((Hp, Hp4), jnp.bfloat16),        # whh
        ((1, Hp4), jnp.float32),          # bias
        ((S, TB, Hp), jnp.bfloat16),      # out tile
        ((S, TB, Hp4), jnp.bfloat16),     # gx scratch
        ((S * TB, Hp4), jnp.float32),     # f32 intermediate of the projection
    )
    return pl.pallas_call(
        _lstm_seq_kernel,
        out_shape=jax.ShapeDtypeStruct((S, Bp, Hp), jnp.bfloat16),
        grid_spec=pltpu.PrefetchScalarGridSpec(
            num_scalar_prefetch=0,
            grid=(Bp // TB,),
            in_specs=[
                pl.BlockSpec((S, TB, Din), lambda i: (0, i, 0)),
                pl.BlockSpec((Din, Hp4), lambda i: (0, 0)),
                pl.BlockSpec((Hp, Hp4), lambda i: (0, 0)),
                pl.BlockSpec((1, Hp4), lambda i: (0, 0)),
            ],
            out_specs=pl.BlockSpec((S, TB, Hp), lambda i: (0, i, 0)),
            scratch_shapes=[pltpu.VMEM((S, TB, Hp4), jnp.bfloat16)],
        ),
        compiler_params=pltpu.CompilerParams(
            dimension_semantics=("parallel",),
            vmem_limit_bytes=vmem,
        ),
    )(x, wih, whh, b)


def lstm_last_layer_fc(x, wih, whh, b, wfc, bfc):
    """Last layer + fused FC. wfc: (Hp, Dout_p) bf16; bfc: (1, Dout_p) f32
    ->  (Bp, Dout_p) f32."""
    S, Bp, Din = x.shape
    Hp4 = wih.shape[1]
    Hp = Hp4 // 4
    Dout_p = wfc.shape[1]
    TB = min(Bp, BATCH_TILE)
    assert Bp % TB == 0
    vmem = _vmem_limit_bytes(
        ((S, TB, Din), jnp.bfloat16),
        ((Din, Hp4), jnp.bfloat16),
        ((Hp, Hp4), jnp.bfloat16),
        ((1, Hp4), jnp.float32),
        ((Hp, Dout_p), jnp.bfloat16),
        ((1, Dout_p), jnp.float32),
        ((TB, Dout_p), jnp.float32),
        ((S, TB, Hp4), jnp.bfloat16),
        ((S * TB, Hp4), jnp.float32),
    )
    return pl.pallas_call(
        _lstm_last_fc_kernel,
        out_shape=jax.ShapeDtypeStruct((Bp, Dout_p), jnp.float32),
        grid_spec=pltpu.PrefetchScalarGridSpec(
            num_scalar_prefetch=0,
            grid=(Bp // TB,),
            in_specs=[
                pl.BlockSpec((S, TB, Din), lambda i: (0, i, 0)),
                pl.BlockSpec((Din, Hp4), lambda i: (0, 0)),
                pl.BlockSpec((Hp, Hp4), lambda i: (0, 0)),
                pl.BlockSpec((1, Hp4), lambda i: (0, 0)),
                pl.BlockSpec((Hp, Dout_p), lambda i: (0, 0)),
                pl.BlockSpec((1, Dout_p), lambda i: (0, 0)),
            ],
            out_specs=pl.BlockSpec((TB, Dout_p), lambda i: (i, 0)),
            scratch_shapes=[pltpu.VMEM((S, TB, Hp4), jnp.bfloat16)],
        ),
        compiler_params=pltpu.CompilerParams(
            dimension_semantics=("parallel",),
            vmem_limit_bytes=vmem,
        ),
    )(x, wih, whh, b, wfc, bfc)


# ------------------------------- parameters ------------------------------------
def init_lstm_params(key, in_dim, hidden_dim, num_layers, out_dim):
    """Raw PyTorch-layout params, uniform(-1/sqrt(H), 1/sqrt(H)) like nn.LSTM/Linear."""
    bound = 1.0 / np.sqrt(hidden_dim)
    raw = {"layers": []}
    for layer in range(num_layers):
        d_in = in_dim if layer == 0 else hidden_dim
        key, k1, k2, k3, k4 = jax.random.split(key, 5)
        raw["layers"].append(dict(
            w_ih=jax.random.uniform(k1, (4 * hidden_dim, d_in), jnp.float32, -bound, bound),
            w_hh=jax.random.uniform(k2, (4 * hidden_dim, hidden_dim), jnp.float32, -bound, bound),
            b_ih=jax.random.uniform(k3, (4 * hidden_dim,), jnp.float32, -bound, bound),
            b_hh=jax.random.uniform(k4, (4 * hidden_dim,), jnp.float32, -bound, bound),
        ))
    key, k5, k6 = jax.random.split(key, 3)
    raw["fc_w"] = jax.random.uniform(k5, (out_dim, hidden_dim), jnp.float32, -bound, bound)
    raw["fc_b"] = jax.random.uniform(k6, (out_dim,), jnp.float32, -bound, bound)
    return raw


def _pad_gate_cols(w_t, H, Hp):
    """(K, 4H) -> (K, 4*Hp): zero-pad each PyTorch gate block (i,f,g,o) to Hp lanes."""
    blocks = [jnp.pad(w_t[:, g * H:(g + 1) * H], ((0, 0), (0, Hp - H))) for g in range(4)]
    return jnp.concatenate(blocks, axis=1)


def pack_params(raw, hidden_dim):
    """Transpose + lane-align + bf16-cast weights once (zero padding keeps math exact)."""
    H = hidden_dim
    Hp = _round_up(H, 128)
    packed = {"layers": []}
    for i, lp in enumerate(raw["layers"]):
        wih_t = _pad_gate_cols(lp["w_ih"].T, H, Hp)                 # (d_in, 4Hp)
        if i > 0:  # layers > 0 consume the padded (Bp, Hp) hidden state
            wih_t = jnp.pad(wih_t, ((0, Hp - H), (0, 0)))           # (Hp, 4Hp)
        whh_t = jnp.pad(_pad_gate_cols(lp["w_hh"].T, H, Hp), ((0, Hp - H), (0, 0)))
        bias = _pad_gate_cols((lp["b_ih"] + lp["b_hh"]).reshape(1, 4 * H), H, Hp)
        packed["layers"].append(dict(
            wih=wih_t.astype(jnp.bfloat16),
            whh=whh_t.astype(jnp.bfloat16),
            b=bias.astype(jnp.float32),
        ))
    Dout = raw["fc_w"].shape[0]
    Dout_p = _round_up(Dout, 128)                                   # lane-dense FC store
    packed["wfc"] = jnp.pad(raw["fc_w"].T,
                            ((0, Hp - H), (0, Dout_p - Dout))).astype(jnp.bfloat16)
    packed["bfc"] = jnp.pad(raw["fc_b"].reshape(1, -1),
                            ((0, 0), (0, Dout_p - Dout))).astype(jnp.float32)
    return packed


# --------------------------------- forward -------------------------------------
@partial(jax.jit, static_argnames=("out_dim",))
def lstm_forward(packed, x_bsd, out_dim):
    """x_bsd: (batch, seq_len, in_dim) -> (batch, out_dim). Matches the PyTorch module."""
    # One-time relayout to time-major bf16; all inter-layer activations stay
    # time-major bf16.
    x = jnp.transpose(x_bsd, (1, 0, 2)).astype(jnp.bfloat16)  # (S, B, Din)
    S, B, _ = x.shape
    Bp = _round_up(B, 16)                 # bf16 sublane pack = 16 rows per vreg
    if Bp > BATCH_TILE:
        Bp = _round_up(Bp, BATCH_TILE)    # clean batch-tile grid
    if Bp != B:
        x = jnp.pad(x, ((0, 0), (0, Bp - B), (0, 0)))
    h = x
    for lp in packed["layers"][:-1]:
        h = lstm_layer_seq(h, lp["wih"], lp["whh"], lp["b"])
    last = packed["layers"][-1]
    out = lstm_last_layer_fc(h, last["wih"], last["whh"], last["b"],
                             packed["wfc"], packed["bfc"])
    return out[:B, :out_dim]


# --------------------------- pure-JAX reference checks ---------------------------
def lstm_forward_ref(raw, x_bsd, hidden_dim, emulate_bf16=False):
    """Reference. With emulate_bf16=True it mirrors the kernel's bf16 cast points
    (bf16 weights / activations / gx store, f32 accumulation and gate math)."""
    H = hidden_dim
    rnd = ((lambda a: a.astype(jnp.bfloat16).astype(jnp.float32))
           if emulate_bf16 else (lambda a: a))
    x = rnd(jnp.transpose(x_bsd, (1, 0, 2)).astype(jnp.float32))
    B = x.shape[1]
    h_seq = x
    h_last = None
    for lp in raw["layers"]:
        wih_t = rnd(lp["w_ih"].T)
        whh_t = rnd(lp["w_hh"].T)
        b = (lp["b_ih"] + lp["b_hh"]).reshape(1, -1)
        gx_all = rnd(jnp.einsum("sbd,dh->sbh", h_seq, wih_t) + b)

        def step(carry, gx_t, whh_t=whh_t):
            h, c = carry
            g = gx_t + rnd(h) @ whh_t
            i_g = jax.nn.sigmoid(g[:, 0 * H:1 * H])
            f_g = jax.nn.sigmoid(g[:, 1 * H:2 * H])
            g_g = jnp.tanh(g[:, 2 * H:3 * H])
            o_g = jax.nn.sigmoid(g[:, 3 * H:4 * H])
            c = f_g * c + i_g * g_g
            h = o_g * jnp.tanh(c)
            return (h, c), h

        z = jnp.zeros((B, H), jnp.float32)
        (h_last, _), h_seq = jax.lax.scan(step, (z, z), gx_all)
        h_seq = rnd(h_seq)   # inter-layer activations stored bf16 by the kernel
    return rnd(h_last) @ rnd(raw["fc_w"].T) + raw["fc_b"].reshape(1, -1)


if __name__ == "__main__":
    batch, seq_len = 2, 8
    in_dim, hidden_dim, num_layers, out_dim = 16, 32, 2, 4

    key = jax.random.PRNGKey(0)
    key, pkey, xkey = jax.random.split(key, 3)
    raw = init_lstm_params(pkey, in_dim, hidden_dim, num_layers, out_dim)
    packed = pack_params(raw, hidden_dim)
    x = jax.random.normal(xkey, (batch, seq_len, in_dim), jnp.float32)

    out = lstm_forward(packed, x, out_dim)
    jax.block_until_ready(out)
    assert out.shape == (batch, out_dim)

    # Tight check against a reference that emulates the kernel's bf16 cast points.
    ref_bf16 = lstm_forward_ref(raw, x, hidden_dim, emulate_bf16=True)
    np.testing.assert_allclose(np.asarray(out), np.asarray(ref_bf16),
                               rtol=5e-3, atol=5e-3)
    # Loose check against the exact f32 math (bounds the bf16 quantization drift).
    ref_f32 = lstm_forward_ref(raw, x, hidden_dim, emulate_bf16=False)
    np.testing.assert_allclose(np.asarray(out), np.asarray(ref_f32),
                               rtol=5e-2, atol=5e-2)
    print("KERNEL_OK")
</pallas_src>

<mosaic_0001>
module attributes {stable_mosaic.version = 11 : i64} {
  func.func @_lstm_seq_kernel(%arg0: i32, %arg1: memref<8x16x16xbf16, #tpu.memory_space<vmem>>, %arg2: memref<16x512xbf16, #tpu.memory_space<vmem>>, %arg3: memref<128x512xbf16, #tpu.memory_space<vmem>>, %arg4: memref<1x512xf32, #tpu.memory_space<vmem>>, %arg5: memref<8x16x128xbf16, #tpu.memory_space<vmem>>, %arg6: memref<8x16x512xbf16, #tpu.memory_space<vmem>>) attributes {dimension_semantics = [#tpu.dimension_semantics<parallel>], iteration_bounds = array<i64: 1>, scalar_prefetch = 0 : i64, scratch_operands = 1 : i64, tpu.core_type = #tpu.core_type<tc>, window_params = [{transform_indices = @transform_0, window_bounds = array<i64: 8, 16, 16>}, {pipeline_mode = #tpu.pipeline_mode<synchronous>, transform_indices = @transform_1, window_bounds = array<i64: 16, 512>}, {pipeline_mode = #tpu.pipeline_mode<synchronous>, transform_indices = @transform_2, window_bounds = array<i64: 128, 512>}, {pipeline_mode = #tpu.pipeline_mode<synchronous>, transform_indices = @transform_3, window_bounds = array<i64: 1, 512>}, {transform_indices = @transform_4, window_bounds = array<i64: 8, 16, 128>}]} {
    %c0 = arith.constant 0 : index
    %c0_0 = arith.constant 0 : index
    %c0_1 = arith.constant 0 : index
    %0 = vector.load %arg1[%c0, %c0_0, %c0_1] : memref<8x16x16xbf16, #tpu.memory_space<vmem>>, vector<8x16x16xbf16>
    %1 = vector.shape_cast %0 : vector<8x16x16xbf16> to vector<128x16xbf16>
    %c0_2 = arith.constant 0 : index
    %c0_3 = arith.constant 0 : index
    %2 = vector.load %arg2[%c0_2, %c0_3] : memref<16x512xbf16, #tpu.memory_space<vmem>>, vector<16x512xbf16>
    %cst = arith.constant dense<0.000000e+00> : vector<128x512xf32>
    %3 = tpu.matmul %1, %2, %cst {dimension_numbers = #tpu.dot_dimension_numbers<[1], [0], [0], [1], [0, 0, 1, 1], [], []>} : vector<128x16xbf16>, vector<16x512xbf16>, vector<128x512xf32> -> vector<128x512xf32>
    %c0_4 = arith.constant 0 : index
    %c0_5 = arith.constant 0 : index
    %4 = vector.load %arg4[%c0_4, %c0_5] : memref<1x512xf32, #tpu.memory_space<vmem>>, vector<1x512xf32>
    %5 = vector.broadcast %4 : vector<1x512xf32> to vector<128x512xf32>
    %6 = arith.addf %3, %5 : vector<128x512xf32>
    %7 = vector.shape_cast %6 : vector<128x512xf32> to vector<8x16x512xf32>
    %8 = arith.truncf %7 : vector<8x16x512xf32> to vector<8x16x512xbf16>
    %c0_6 = arith.constant 0 : index
    %c0_7 = arith.constant 0 : index
    %c0_8 = arith.constant 0 : index
    %9 = vector.load %arg6[%c0_6, %c0_7, %c0_8] : memref<8x16x512xbf16, #tpu.memory_space<vmem>>, vector<8x16x512xbf16>
    tpu.vector_store %arg6[%c0_6, %c0_7, %c0_8], %8 {strides = array<i32>} : memref<8x16x512xbf16, #tpu.memory_space<vmem>>, vector<8x16x512xbf16>,
    %cst_9 = arith.constant 0.000000e+00 : f32
    %10 = vector.broadcast %cst_9 : f32 to vector<16x128xf32>
    %c0_i32 = arith.constant 0 : i32
    %11 = arith.index_cast %c0_i32 : i32 to index
    %c0_10 = arith.constant 0 : index
    %c0_11 = arith.constant 0 : index
    %12 = vector.load %arg6[%11, %c0_10, %c0_11] : memref<8x16x512xbf16, #tpu.memory_space<vmem>>, vector<1x16x512xbf16>
    %13 = vector.shape_cast %12 : vector<1x16x512xbf16> to vector<16x512xbf16>
    %14 = arith.extf %13 : vector<16x512xbf16> to vector<16x512xf32>
    %15 = arith.truncf %10 : vector<16x128xf32> to vector<16x128xbf16>
    %c0_12 = arith.constant 0 : index
    %c0_13 = arith.constant 0 : index
    %16 = vector.load %arg3[%c0_12, %c0_13] : memref<128x512xbf16, #tpu.memory_space<vmem>>, vector<128x512xbf16>
    %cst_14 = arith.constant dense<0.000000e+00> : vector<16x512xf32>
    %17 = tpu.matmul %15, %16, %cst_14 {dimension_numbers = #tpu.dot_dimension_numbers<[1], [0], [0], [1], [0, 0, 1, 1], [], []>} : vector<16x128xbf16>, vector<128x512xbf16>, vector<16x512xf32> -> vector<16x512xf32>
    %18 = arith.addf %14, %17 : vector<16x512xf32>
    %19 = vector.extract_strided_slice %18 {offsets = [0, 0], sizes = [16, 128], strides = [1, 1]} : vector<16x512xf32> to vector<16x128xf32>
    %20 = arith.negf %19 : vector<16x128xf32>
    %21 = math.exp %20 : vector<16x128xf32>
    %cst_15 = arith.constant 1.000000e+00 : f32
    %22 = vector.broadcast %cst_15 : f32 to vector<16x128xf32>
    %23 = arith.addf %22, %21 : vector<16x128xf32>
    %24 = arith.divf %22, %23 : vector<16x128xf32>
    %25 = vector.extract_strided_slice %18 {offsets = [0, 128], sizes = [16, 128], strides = [1, 1]} : vector<16x512xf32> to vector<16x128xf32>
    %26 = arith.negf %25 : vector<16x128xf32>
    %27 = math.exp %26 : vector<16x128xf32>
    %cst_16 = arith.constant 1.000000e+00 : f32
    %28 = vector.broadcast %cst_16 : f32 to vector<16x128xf32>
    %29 = arith.addf %28, %27 : vector<16x128xf32>
    %30 = arith.divf %28, %29 : vector<16x128xf32>
    %31 = vector.extract_strided_slice %18 {offsets = [0, 256], sizes = [16, 128], strides = [1, 1]} : vector<16x512xf32> to vector<16x128xf32>
    %32 = math.tanh %31 : vector<16x128xf32>
    %33 = vector.extract_strided_slice %18 {offsets = [0, 384], sizes = [16, 128], strides = [1, 1]} : vector<16x512xf32> to vector<16x128xf32>
    %34 = arith.negf %33 : vector<16x128xf32>
    %35 = math.exp %34 : vector<16x128xf32>
    %cst_17 = arith.constant 1.000000e+00 : f32
    %36 = vector.broadcast %cst_17 : f32 to vector<16x128xf32>
    %37 = arith.addf %36, %35 : vector<16x128xf32>
    %38 = arith.divf %36, %37 : vector<16x128xf32>
    %39 = arith.mulf %30, %10 : vector<16x128xf32>
    %40 = arith.mulf %24, %32 : vector<16x128xf32>
    %41 = arith.addf %39, %40 : vector<16x128xf32>
    %42 = math.tanh %41 : vector<16x128xf32>
    %43 = arith.mulf %38, %42 : vector<16x128xf32>
    %44 = arith.truncf %43 : vector<16x128xf32> to vector<16x128xbf16>
    %45 = arith.index_cast %c0_i32 : i32 to index
    %c0_18 = arith.constant 0 : index
    %c0_19 = arith.constant 0 : index
    %46 = vector.load %arg5[%45, %c0_18, %c0_19] : memref<8x16x128xbf16, #tpu.memory_space<vmem>>, vector<1x16x128xbf16>
    %47 = vector.shape_cast %46 : vector<1x16x128xbf16> to vector<16x128xbf16>
    %48 = vector.shape_cast %44 : vector<16x128xbf16> to vector<1x16x128xbf16>
    tpu.vector_store %arg5[%45, %c0_18, %c0_19], %48 {strides = array<i32>} : memref<8x16x128xbf16, #tpu.memory_space<vmem>>, vector<1x16x128xbf16>,
    %c1_i32 = arith.constant 1 : i32
    %49 = arith.index_cast %c1_i32 : i32 to index
    %c0_20 = arith.constant 0 : index
    %c0_21 = arith.constant 0 : index
    %50 = vector.load %arg6[%49, %c0_20, %c0_21] : memref<8x16x512xbf16, #tpu.memory_space<vmem>>, vector<1x16x512xbf16>
    %51 = vector.shape_cast %50 : vector<1x16x512xbf16> to vector<16x512xbf16>
    %52 = arith.extf %51 : vector<16x512xbf16> to vector<16x512xf32>
    %53 = arith.truncf %43 : vector<16x128xf32> to vector<16x128xbf16>
    %c0_22 = arith.constant 0 : index
    %c0_23 = arith.constant 0 : index
    %54 = vector.load %arg3[%c0_22, %c0_23] : memref<128x512xbf16, #tpu.memory_space<vmem>>, vector<128x512xbf16>
    %cst_24 = arith.constant dense<0.000000e+00> : vector<16x512xf32>
    %55 = tpu.matmul %53, %54, %cst_24 {dimension_numbers = #tpu.dot_dimension_numbers<[1], [0], [0], [1], [0, 0, 1, 1], [], []>} : vector<16x128xbf16>, vector<128x512xbf16>, vector<16x512xf32> -> vector<16x512xf32>
    %56 = arith.addf %52, %55 : vector<16x512xf32>
    %57 = vector.extract_strided_slice %56 {offsets = [0, 0], sizes = [16, 128], strides = [1, 1]} : vector<16x512xf32> to vector<16x128xf32>
    %58 = arith.negf %57 : vector<16x128xf32>
    %59 = math.exp %58 : vector<16x128xf32>
    %cst_25 = arith.constant 1.000000e+00 : f32
    %60 = vector.broadcast %cst_25 : f32 to vector<16x128xf32>
    %61 = arith.addf %60, %59 : vector<16x128xf32>
    %62 = arith.divf %60, %61 : vector<16x128xf32>
    %63 = vector.extract_strided_slice %56 {offsets = [0, 128], sizes = [16, 128], strides = [1, 1]} : vector<16x512xf32> to vector<16x128xf32>
    %64 = arith.negf %63 : vector<16x128xf32>
    %65 = math.exp %64 : vector<16x128xf32>
    %cst_26 = arith.constant 1.000000e+00 : f32
    %66 = vector.broadcast %cst_26 : f32 to vector<16x128xf32>
    %67 = arith.addf %66, %65 : vector<16x128xf32>
    %68 = arith.divf %66, %67 : vector<16x128xf32>
    %69 = vector.extract_strided_slice %56 {offsets = [0, 256], sizes = [16, 128], strides = [1, 1]} : vector<16x512xf32> to vector<16x128xf32>
    %70 = math.tanh %69 : vector<16x128xf32>
    %71 = vector.extract_strided_slice %56 {offsets = [0, 384], sizes = [16, 128], strides = [1, 1]} : vector<16x512xf32> to vector<16x128xf32>
    %72 = arith.negf %71 : vector<16x128xf32>
    %73 = math.exp %72 : vector<16x128xf32>
    %cst_27 = arith.constant 1.000000e+00 : f32
    %74 = vector.broadcast %cst_27 : f32 to vector<16x128xf32>
    %75 = arith.addf %74, %73 : vector<16x128xf32>
    %76 = arith.divf %74, %75 : vector<16x128xf32>
    %77 = arith.mulf %68, %41 : vector<16x128xf32>
    %78 = arith.mulf %62, %70 : vector<16x128xf32>
    %79 = arith.addf %77, %78 : vector<16x128xf32>
    %80 = math.tanh %79 : vector<16x128xf32>
    %81 = arith.mulf %76, %80 : vector<16x128xf32>
    %82 = arith.truncf %81 : vector<16x128xf32> to vector<16x128xbf16>
    %83 = arith.index_cast %c1_i32 : i32 to index
    %c0_28 = arith.constant 0 : index
    %c0_29 = arith.constant 0 : index
    %84 = vector.load %arg5[%83, %c0_28, %c0_29] : memref<8x16x128xbf16, #tpu.memory_space<vmem>>, vector<1x16x128xbf16>
    %85 = vector.shape_cast %84 : vector<1x16x128xbf16> to vector<16x128xbf16>
    %86 = vector.shape_cast %82 : vector<16x128xbf16> to vector<1x16x128xbf16>
    tpu.vector_store %arg5[%83, %c0_28, %c0_29], %86 {strides = array<i32>} : memref<8x16x128xbf16, #tpu.memory_space<vmem>>, vector<1x16x128xbf16>,
    %c2_i32 = arith.constant 2 : i32
    %87 = arith.index_cast %c2_i32 : i32 to index
    %c0_30 = arith.constant 0 : index
    %c0_31 = arith.constant 0 : index
    %88 = vector.load %arg6[%87, %c0_30, %c0_31] : memref<8x16x512xbf16, #tpu.memory_space<vmem>>, vector<1x16x512xbf16>
    %89 = vector.shape_cast %88 : vector<1x16x512xbf16> to vector<16x512xbf16>
    %90 = arith.extf %89 : vector<16x512xbf16> to vector<16x512xf32>
    %91 = arith.truncf %81 : vector<16x128xf32> to vector<16x128xbf16>
    %c0_32 = arith.constant 0 : index
    %c0_33 = arith.constant 0 : index
    %92 = vector.load %arg3[%c0_32, %c0_33] : memref<128x512xbf16, #tpu.memory_space<vmem>>, vector<128x512xbf16>
    %cst_34 = arith.constant dense<0.000000e+00> : vector<16x512xf32>
    %93 = tpu.matmul %91, %92, %cst_34 {dimension_numbers = #tpu.dot_dimension_numbers<[1], [0], [0], [1], [0, 0, 1, 1], [], []>} : vector<16x128xbf16>, vector<128x512xbf16>, vector<16x512xf32> -> vector<16x512xf32>
    %94 = arith.addf %90, %93 : vector<16x512xf32>
    %95 = vector.extract_strided_slice %94 {offsets = [0, 0], sizes = [16, 128], strides = [1, 1]} : vector<16x512xf32> to vector<16x128xf32>
    %96 = arith.negf %95 : vector<16x128xf32>
    %97 = math.exp %96 : vector<16x128xf32>
    %cst_35 = arith.constant 1.000000e+00 : f32
    %98 = vector.broadcast %cst_35 : f32 to vector<16x128xf32>
    %99 = arith.addf %98, %97 : vector<16x128xf32>
    %100 = arith.divf %98, %99 : vector<16x128xf32>
    %101 = vector.extract_strided_slice %94 {offsets = [0, 128], sizes = [16, 128], strides = [1, 1]} : vector<16x512xf32> to vector<16x128xf32>
    %102 = arith.negf %101 : vector<16x128xf32>
    %103 = math.exp %102 : vector<16x128xf32>
    %cst_36 = arith.constant 1.000000e+00 : f32
    %104 = vector.broadcast %cst_36 : f32 to vector<16x128xf32>
    %105 = arith.addf %104, %103 : vector<16x128xf32>
    %106 = arith.divf %104, %105 : vector<16x128xf32>
    %107 = vector.extract_strided_slice %94 {offsets = [0, 256], sizes = [16, 128], strides = [1, 1]} : vector<16x512xf32> to vector<16x128xf32>
    %108 = math.tanh %107 : vector<16x128xf32>
    %109 = vector.extract_strided_slice %94 {offsets = [0, 384], sizes = [16, 128], strides = [1, 1]} : vector<16x512xf32> to vector<16x128xf32>
    %110 = arith.negf %109 : vector<16x128xf32>
    %111 = math.exp %110 : vector<16x128xf32>
    %cst_37 = arith.constant 1.000000e+00 : f32
    %112 = vector.broadcast %cst_37 : f32 to vector<16x128xf32>
    %113 = arith.addf %112, %111 : vector<16x128xf32>
    %114 = arith.divf %112, %113 : vector<16x128xf32>
    %115 = arith.mulf %106, %79 : vector<16x128xf32>
    %116 = arith.mulf %100, %108 : vector<16x128xf32>
    %117 = arith.addf %115, %116 : vector<16x128xf32>
    %118 = math.tanh %117 : vector<16x128xf32>
    %119 = arith.mulf %114, %118 : vector<16x128xf32>
    %120 = arith.truncf %119 : vector<16x128xf32> to vector<16x128xbf16>
    %121 = arith.index_cast %c2_i32 : i32 to index
    %c0_38 = arith.constant 0 : index
    %c0_39 = arith.constant 0 : index
    %122 = vector.load %arg5[%121, %c0_38, %c0_39] : memref<8x16x128xbf16, #tpu.memory_space<vmem>>, vector<1x16x128xbf16>
    %123 = vector.shape_cast %122 : vector<1x16x128xbf16> to vector<16x128xbf16>
    %124 = vector.shape_cast %120 : vector<16x128xbf16> to vector<1x16x128xbf16>
    tpu.vector_store %arg5[%121, %c0_38, %c0_39], %124 {strides = array<i32>} : memref<8x16x128xbf16, #tpu.memory_space<vmem>>, vector<1x16x128xbf16>,
    %c3_i32 = arith.constant 3 : i32
    %125 = arith.index_cast %c3_i32 : i32 to index
    %c0_40 = arith.constant 0 : index
    %c0_41 = arith.constant 0 : index
    %126 = vector.load %arg6[%125, %c0_40, %c0_41] : memref<8x16x512xbf16, #tpu.memory_space<vmem>>, vector<1x16x512xbf16>
    %127 = vector.shape_cast %126 : vector<1x16x512xbf16> to vector<16x512xbf16>
    %128 = arith.extf %127 : vector<16x512xbf16> to vector<16x512xf32>
    %129 = arith.truncf %119 : vector<16x128xf32> to vector<16x128xbf16>
    %c0_42 = arith.constant 0 : index
    %c0_43 = arith.constant 0 : index
    %130 = vector.load %arg3[%c0_42, %c0_43] : memref<128x512xbf16, #tpu.memory_space<vmem>>, vector<128x512xbf16>
    %cst_44 = arith.constant dense<0.000000e+00> : vector<16x512xf32>
    %131 = tpu.matmul %129, %130, %cst_44 {dimension_numbers = #tpu.dot_dimension_numbers<[1], [0], [0], [1], [0, 0, 1, 1], [], []>} : vector<16x128xbf16>, vector<128x512xbf16>, vector<16x512xf32> -> vector<16x512xf32>
    %132 = arith.addf %128, %131 : vector<16x512xf32>
    %133 = vector.extract_strided_slice %132 {offsets = [0, 0], sizes = [16, 128], strides = [1, 1]} : vector<16x512xf32> to vector<16x128xf32>
    %134 = arith.negf %133 : vector<16x128xf32>
    %135 = math.exp %134 : vector<16x128xf32>
    %cst_45 = arith.constant 1.000000e+00 : f32
    %136 = vector.broadcast %cst_45 : f32 to vector<16x128xf32>
    %137 = arith.addf %136, %135 : vector<16x128xf32>
    %138 = arith.divf %136, %137 : vector<16x128xf32>
    %139 = vector.extract_strided_slice %132 {offsets = [0, 128], sizes = [16, 128], strides = [1, 1]} : vector<16x512xf32> to vector<16x128xf32>
    %140 = arith.negf %139 : vector<16x128xf32>
    %141 = math.exp %140 : vector<16x128xf32>
    %cst_46 = arith.constant 1.000000e+00 : f32
    %142 = vector.broadcast %cst_46 : f32 to vector<16x128xf32>
    %143 = arith.addf %142, %141 : vector<16x128xf32>
    %144 = arith.divf %142, %143 : vector<16x128xf32>
    %145 = vector.extract_strided_slice %132 {offsets = [0, 256], sizes = [16, 128], strides = [1, 1]} : vector<16x512xf32> to vector<16x128xf32>
    %146 = math.tanh %145 : vector<16x128xf32>
    %147 = vector.extract_strided_slice %132 {offsets = [0, 384], sizes = [16, 128], strides = [1, 1]} : vector<16x512xf32> to vector<16x128xf32>
    %148 = arith.negf %147 : vector<16x128xf32>
    %149 = math.exp %148 : vector<16x128xf32>
    %cst_47 = arith.constant 1.000000e+00 : f32
    %150 = vector.broadcast %cst_47 : f32 to vector<16x128xf32>
    %151 = arith.addf %150, %149 : vector<16x128xf32>
    %152 = arith.divf %150, %151 : vector<16x128xf32>
    %153 = arith.mulf %144, %117 : vector<16x128xf32>
    %154 = arith.mulf %138, %146 : vector<16x128xf32>
    %155 = arith.addf %153, %154 : vector<16x128xf32>
    %156 = math.tanh %155 : vector<16x128xf32>
    %157 = arith.mulf %152, %156 : vector<16x128xf32>
    %158 = arith.truncf %157 : vector<16x128xf32> to vector<16x128xbf16>
    %159 = arith.index_cast %c3_i32 : i32 to index
    %c0_48 = arith.constant 0 : index
    %c0_49 = arith.constant 0 : index
    %160 = vector.load %arg5[%159, %c0_48, %c0_49] : memref<8x16x128xbf16, #tpu.memory_space<vmem>>, vector<1x16x128xbf16>
    %161 = vector.shape_cast %160 : vector<1x16x128xbf16> to vector<16x128xbf16>
    %162 = vector.shape_cast %158 : vector<16x128xbf16> to vector<1x16x128xbf16>
    tpu.vector_store %arg5[%159, %c0_48, %c0_49], %162 {strides = array<i32>} : memref<8x16x128xbf16, #tpu.memory_space<vmem>>, vector<1x16x128xbf16>,
    %c4_i32 = arith.constant 4 : i32
    %163 = arith.index_cast %c4_i32 : i32 to index
    %c0_50 = arith.constant 0 : index
    %c0_51 = arith.constant 0 : index
    %164 = vector.load %arg6[%163, %c0_50, %c0_51] : memref<8x16x512xbf16, #tpu.memory_space<vmem>>, vector<1x16x512xbf16>
    %165 = vector.shape_cast %164 : vector<1x16x512xbf16> to vector<16x512xbf16>
    %166 = arith.extf %165 : vector<16x512xbf16> to vector<16x512xf32>
    %167 = arith.truncf %157 : vector<16x128xf32> to vector<16x128xbf16>
    %c0_52 = arith.constant 0 : index
    %c0_53 = arith.constant 0 : index
    %168 = vector.load %arg3[%c0_52, %c0_53] : memref<128x512xbf16, #tpu.memory_space<vmem>>, vector<128x512xbf16>
    %cst_54 = arith.constant dense<0.000000e+00> : vector<16x512xf32>
    %169 = tpu.matmul %167, %168, %cst_54 {dimension_numbers = #tpu.dot_dimension_numbers<[1], [0], [0], [1], [0, 0, 1, 1], [], []>} : vector<16x128xbf16>, vector<128x512xbf16>, vector<16x512xf32> -> vector<16x512xf32>
    %170 = arith.addf %166, %169 : vector<16x512xf32>
    %171 = vector.extract_strided_slice %170 {offsets = [0, 0], sizes = [16, 128], strides = [1, 1]} : vector<16x512xf32> to vector<16x128xf32>
    %172 = arith.negf %171 : vector<16x128xf32>
    %173 = math.exp %172 : vector<16x128xf32>
    %cst_55 = arith.constant 1.000000e+00 : f32
    %174 = vector.broadcast %cst_55 : f32 to vector<16x128xf32>
    %175 = arith.addf %174, %173 : vector<16x128xf32>
    %176 = arith.divf %174, %175 : vector<16x128xf32>
    %177 = vector.extract_strided_slice %170 {offsets = [0, 128], sizes = [16, 128], strides = [1, 1]} : vector<16x512xf32> to vector<16x128xf32>
    %178 = arith.negf %177 : vector<16x128xf32>
    %179 = math.exp %178 : vector<16x128xf32>
    %cst_56 = arith.constant 1.000000e+00 : f32
    %180 = vector.broadcast %cst_56 : f32 to vector<16x128xf32>
    %181 = arith.addf %180, %179 : vector<16x128xf32>
    %182 = arith.divf %180, %181 : vector<16x128xf32>
    %183 = vector.extract_strided_slice %170 {offsets = [0, 256], sizes = [16, 128], strides = [1, 1]} : vector<16x512xf32> to vector<16x128xf32>
    %184 = math.tanh %183 : vector<16x128xf32>
    %185 = vector.extract_strided_slice %170 {offsets = [0, 384], sizes = [16, 128], strides = [1, 1]} : vector<16x512xf32> to vector<16x128xf32>
    %186 = arith.negf %185 : vector<16x128xf32>
    %187 = math.exp %186 : vector<16x128xf32>
    %cst_57 = arith.constant 1.000000e+00 : f32
    %188 = vector.broadcast %cst_57 : f32 to vector<16x128xf32>
    %189 = arith.addf %188, %187 : vector<16x128xf32>
    %190 = arith.divf %188, %189 : vector<16x128xf32>
    %191 = arith.mulf %182, %155 : vector<16x128xf32>
    %192 = arith.mulf %176, %184 : vector<16x128xf32>
    %193 = arith.addf %191, %192 : vector<16x128xf32>
    %194 = math.tanh %193 : vector<16x128xf32>
    %195 = arith.mulf %190, %194 : vector<16x128xf32>
    %196 = arith.truncf %195 : vector<16x128xf32> to vector<16x128xbf16>
    %197 = arith.index_cast %c4_i32 : i32 to index
    %c0_58 = arith.constant 0 : index
    %c0_59 = arith.constant 0 : index
    %198 = vector.load %arg5[%197, %c0_58, %c0_59] : memref<8x16x128xbf16, #tpu.memory_space<vmem>>, vector<1x16x128xbf16>
    %199 = vector.shape_cast %198 : vector<1x16x128xbf16> to vector<16x128xbf16>
    %200 = vector.shape_cast %196 : vector<16x128xbf16> to vector<1x16x128xbf16>
    tpu.vector_store %arg5[%197, %c0_58, %c0_59], %200 {strides = array<i32>} : memref<8x16x128xbf16, #tpu.memory_space<vmem>>, vector<1x16x128xbf16>,
    %c5_i32 = arith.constant 5 : i32
    %201 = arith.index_cast %c5_i32 : i32 to index
    %c0_60 = arith.constant 0 : index
    %c0_61 = arith.constant 0 : index
    %202 = vector.load %arg6[%201, %c0_60, %c0_61] : memref<8x16x512xbf16, #tpu.memory_space<vmem>>, vector<1x16x512xbf16>
    %203 = vector.shape_cast %202 : vector<1x16x512xbf16> to vector<16x512xbf16>
    %204 = arith.extf %203 : vector<16x512xbf16> to vector<16x512xf32>
    %205 = arith.truncf %195 : vector<16x128xf32> to vector<16x128xbf16>
    %c0_62 = arith.constant 0 : index
    %c0_63 = arith.constant 0 : index
    %206 = vector.load %arg3[%c0_62, %c0_63] : memref<128x512xbf16, #tpu.memory_space<vmem>>, vector<128x512xbf16>
    %cst_64 = arith.constant dense<0.000000e+00> : vector<16x512xf32>
    %207 = tpu.matmul %205, %206, %cst_64 {dimension_numbers = #tpu.dot_dimension_numbers<[1], [0], [0], [1], [0, 0, 1, 1], [], []>} : vector<16x128xbf16>, vector<128x512xbf16>, vector<16x512xf32> -> vector<16x512xf32>
    %208 = arith.addf %204, %207 : vector<16x512xf32>
    %209 = vector.extract_strided_slice %208 {offsets = [0, 0], sizes = [16, 128], strides = [1, 1]} : vector<16x512xf32> to vector<16x128xf32>
    %210 = arith.negf %209 : vector<16x128xf32>
    %211 = math.exp %210 : vector<16x128xf32>
    %cst_65 = arith.constant 1.000000e+00 : f32
    %212 = vector.broadcast %cst_65 : f32 to vector<16x128xf32>
    %213 = arith.addf %212, %211 : vector<16x128xf32>
    %214 = arith.divf %212, %213 : vector<16x128xf32>
    %215 = vector.extract_strided_slice %208 {offsets = [0, 128], sizes = [16, 128], strides = [1, 1]} : vector<16x512xf32> to vector<16x128xf32>
    %216 = arith.negf %215 : vector<16x128xf32>
    %217 = math.exp %216 : vector<16x128xf32>
    %cst_66 = arith.constant 1.000000e+00 : f32
    %218 = vector.broadcast %cst_66 : f32 to vector<16x128xf32>
    %219 = arith.addf %218, %217 : vector<16x128xf32>
    %220 = arith.divf %218, %219 : vector<16x128xf32>
    %221 = vector.extract_strided_slice %208 {offsets = [0, 256], sizes = [16, 128], strides = [1, 1]} : vector<16x512xf32> to vector<16x128xf32>
    %222 = math.tanh %221 : vector<16x128xf32>
    %223 = vector.extract_strided_slice %208 {offsets = [0, 384], sizes = [16, 128], strides = [1, 1]} : vector<16x512xf32> to vector<16x128xf32>
    %224 = arith.negf %223 : vector<16x128xf32>
    %225 = math.exp %224 : vector<16x128xf32>
    %cst_67 = arith.constant 1.000000e+00 : f32
    %226 = vector.broadcast %cst_67 : f32 to vector<16x128xf32>
    %227 = arith.addf %226, %225 : vector<16x128xf32>
    %228 = arith.divf %226, %227 : vector<16x128xf32>
    %229 = arith.mulf %220, %193 : vector<16x128xf32>
    %230 = arith.mulf %214, %222 : vector<16x128xf32>
    %231 = arith.addf %229, %230 : vector<16x128xf32>
    %232 = math.tanh %231 : vector<16x128xf32>
    %233 = arith.mulf %228, %232 : vector<16x128xf32>
    %234 = arith.truncf %233 : vector<16x128xf32> to vector<16x128xbf16>
    %235 = arith.index_cast %c5_i32 : i32 to index
    %c0_68 = arith.constant 0 : index
    %c0_69 = arith.constant 0 : index
    %236 = vector.load %arg5[%235, %c0_68, %c0_69] : memref<8x16x128xbf16, #tpu.memory_space<vmem>>, vector<1x16x128xbf16>
    %237 = vector.shape_cast %236 : vector<1x16x128xbf16> to vector<16x128xbf16>
    %238 = vector.shape_cast %234 : vector<16x128xbf16> to vector<1x16x128xbf16>
    tpu.vector_store %arg5[%235, %c0_68, %c0_69], %238 {strides = array<i32>} : memref<8x16x128xbf16, #tpu.memory_space<vmem>>, vector<1x16x128xbf16>,
    %c6_i32 = arith.constant 6 : i32
    %239 = arith.index_cast %c6_i32 : i32 to index
    %c0_70 = arith.constant 0 : index
    %c0_71 = arith.constant 0 : index
    %240 = vector.load %arg6[%239, %c0_70, %c0_71] : memref<8x16x512xbf16, #tpu.memory_space<vmem>>, vector<1x16x512xbf16>
    %241 = vector.shape_cast %240 : vector<1x16x512xbf16> to vector<16x512xbf16>
    %242 = arith.extf %241 : vector<16x512xbf16> to vector<16x512xf32>
    %243 = arith.truncf %233 : vector<16x128xf32> to vector<16x128xbf16>
    %c0_72 = arith.constant 0 : index
    %c0_73 = arith.constant 0 : index
    %244 = vector.load %arg3[%c0_72, %c0_73] : memref<128x512xbf16, #tpu.memory_space<vmem>>, vector<128x512xbf16>
    %cst_74 = arith.constant dense<0.000000e+00> : vector<16x512xf32>
    %245 = tpu.matmul %243, %244, %cst_74 {dimension_numbers = #tpu.dot_dimension_numbers<[1], [0], [0], [1], [0, 0, 1, 1], [], []>} : vector<16x128xbf16>, vector<128x512xbf16>, vector<16x512xf32> -> vector<16x512xf32>
    %246 = arith.addf %242, %245 : vector<16x512xf32>
    %247 = vector.extract_strided_slice %246 {offsets = [0, 0], sizes = [16, 128], strides = [1, 1]} : vector<16x512xf32> to vector<16x128xf32>
    %248 = arith.negf %247 : vector<16x128xf32>
    %249 = math.exp %248 : vector<16x128xf32>
    %cst_75 = arith.constant 1.000000e+00 : f32
    %250 = vector.broadcast %cst_75 : f32 to vector<16x128xf32>
    %251 = arith.addf %250, %249 : vector<16x128xf32>
    %252 = arith.divf %250, %251 : vector<16x128xf32>
    %253 = vector.extract_strided_slice %246 {offsets = [0, 128], sizes = [16, 128], strides = [1, 1]} : vector<16x512xf32> to vector<16x128xf32>
    %254 = arith.negf %253 : vector<16x128xf32>
    %255 = math.exp %254 : vector<16x128xf32>
    %cst_76 = arith.constant 1.000000e+00 : f32
    %256 = vector.broadcast %cst_76 : f32 to vector<16x128xf32>
    %257 = arith.addf %256, %255 : vector<16x128xf32>
    %258 = arith.divf %256, %257 : vector<16x128xf32>
    %259 = vector.extract_strided_slice %246 {offsets = [0, 256], sizes = [16, 128], strides = [1, 1]} : vector<16x512xf32> to vector<16x128xf32>
    %260 = math.tanh %259 : vector<16x128xf32>
    %261 = vector.extract_strided_slice %246 {offsets = [0, 384], sizes = [16, 128], strides = [1, 1]} : vector<16x512xf32> to vector<16x128xf32>
    %262 = arith.negf %261 : vector<16x128xf32>
    %263 = math.exp %262 : vector<16x128xf32>
    %cst_77 = arith.constant 1.000000e+00 : f32
    %264 = vector.broadcast %cst_77 : f32 to vector<16x128xf32>
    %265 = arith.addf %264, %263 : vector<16x128xf32>
    %266 = arith.divf %264, %265 : vector<16x128xf32>
    %267 = arith.mulf %258, %231 : vector<16x128xf32>
    %268 = arith.mulf %252, %260 : vector<16x128xf32>
    %269 = arith.addf %267, %268 : vector<16x128xf32>
    %270 = math.tanh %269 : vector<16x128xf32>
    %271 = arith.mulf %266, %270 : vector<16x128xf32>
    %272 = arith.truncf %271 : vector<16x128xf32> to vector<16x128xbf16>
    %273 = arith.index_cast %c6_i32 : i32 to index
    %c0_78 = arith.constant 0 : index
    %c0_79 = arith.constant 0 : index
    %274 = vector.load %arg5[%273, %c0_78, %c0_79] : memref<8x16x128xbf16, #tpu.memory_space<vmem>>, vector<1x16x128xbf16>
    %275 = vector.shape_cast %274 : vector<1x16x128xbf16> to vector<16x128xbf16>
    %276 = vector.shape_cast %272 : vector<16x128xbf16> to vector<1x16x128xbf16>
    tpu.vector_store %arg5[%273, %c0_78, %c0_79], %276 {strides = array<i32>} : memref<8x16x128xbf16, #tpu.memory_space<vmem>>, vector<1x16x128xbf16>,
    %c7_i32 = arith.constant 7 : i32
    %277 = arith.index_cast %c7_i32 : i32 to index
    %c0_80 = arith.constant 0 : index
    %c0_81 = arith.constant 0 : index
    %278 = vector.load %arg6[%277, %c0_80, %c0_81] : memref<8x16x512xbf16, #tpu.memory_space<vmem>>, vector<1x16x512xbf16>
    %279 = vector.shape_cast %278 : vector<1x16x512xbf16> to vector<16x512xbf16>
    %280 = arith.extf %279 : vector<16x512xbf16> to vector<16x512xf32>
    %281 = arith.truncf %271 : vector<16x128xf32> to vector<16x128xbf16>
    %c0_82 = arith.constant 0 : index
    %c0_83 = arith.constant 0 : index
    %282 = vector.load %arg3[%c0_82, %c0_83] : memref<128x512xbf16, #tpu.memory_space<vmem>>, vector<128x512xbf16>
    %cst_84 = arith.constant dense<0.000000e+00> : vector<16x512xf32>
    %283 = tpu.matmul %281, %282, %cst_84 {dimension_numbers = #tpu.dot_dimension_numbers<[1], [0], [0], [1], [0, 0, 1, 1], [], []>} : vector<16x128xbf16>, vector<128x512xbf16>, vector<16x512xf32> -> vector<16x512xf32>
    %284 = arith.addf %280, %283 : vector<16x512xf32>
    %285 = vector.extract_strided_slice %284 {offsets = [0, 0], sizes = [16, 128], strides = [1, 1]} : vector<16x512xf32> to vector<16x128xf32>
    %286 = arith.negf %285 : vector<16x128xf32>
    %287 = math.exp %286 : vector<16x128xf32>
    %cst_85 = arith.constant 1.000000e+00 : f32
    %288 = vector.broadcast %cst_85 : f32 to vector<16x128xf32>
    %289 = arith.addf %288, %287 : vector<16x128xf32>
    %290 = arith.divf %288, %289 : vector<16x128xf32>
    %291 = vector.extract_strided_slice %284 {offsets = [0, 128], sizes = [16, 128], strides = [1, 1]} : vector<16x512xf32> to vector<16x128xf32>
    %292 = arith.negf %291 : vector<16x128xf32>
    %293 = math.exp %292 : vector<16x128xf32>
    %cst_86 = arith.constant 1.000000e+00 : f32
    %294 = vector.broadcast %cst_86 : f32 to vector<16x128xf32>
    %295 = arith.addf %294, %293 : vector<16x128xf32>
    %296 = arith.divf %294, %295 : vector<16x128xf32>
    %297 = vector.extract_strided_slice %284 {offsets = [0, 256], sizes = [16, 128], strides = [1, 1]} : vector<16x512xf32> to vector<16x128xf32>
    %298 = math.tanh %297 : vector<16x128xf32>
    %299 = vector.extract_strided_slice %284 {offsets = [0, 384], sizes = [16, 128], strides = [1, 1]} : vector<16x512xf32> to vector<16x128xf32>
    %300 = arith.negf %299 : vector<16x128xf32>
    %301 = math.exp %300 : vector<16x128xf32>
    %cst_87 = arith.constant 1.000000e+00 : f32
    %302 = vector.broadcast %cst_87 : f32 to vector<16x128xf32>
    %303 = arith.addf %302, %301 : vector<16x128xf32>
    %304 = arith.divf %302, %303 : vector<16x128xf32>
    %305 = arith.mulf %296, %269 : vector<16x128xf32>
    %306 = arith.mulf %290, %298 : vector<16x128xf32>
    %307 = arith.addf %305, %306 : vector<16x128xf32>
    %308 = math.tanh %307 : vector<16x128xf32>
    %309 = arith.mulf %304, %308 : vector<16x128xf32>
    %310 = arith.truncf %309 : vector<16x128xf32> to vector<16x128xbf16>
    %311 = arith.index_cast %c7_i32 : i32 to index
    %c0_88 = arith.constant 0 : index
    %c0_89 = arith.constant 0 : index
    %312 = vector.load %arg5[%311, %c0_88, %c0_89] : memref<8x16x128xbf16, #tpu.memory_space<vmem>>, vector<1x16x128xbf16>
    %313 = vector.shape_cast %312 : vector<1x16x128xbf16> to vector<16x128xbf16>
    %314 = vector.shape_cast %310 : vector<16x128xbf16> to vector<1x16x128xbf16>
    tpu.vector_store %arg5[%311, %c0_88, %c0_89], %314 {strides = array<i32>} : memref<8x16x128xbf16, #tpu.memory_space<vmem>>, vector<1x16x128xbf16>,
    %c8_i32 = arith.constant 8 : i32
    return
  }
  func.func @transform_0(%arg0: i32) -> (i32, i32, i32) {
    %c0_i32 = arith.constant 0 : i32
    %c0_i32_0 = arith.constant 0 : i32
    %c0_i32_1 = arith.constant 0 : i32
    return %c0_i32, %arg0, %c0_i32_0 : i32, i32, i32
  }
  func.func @transform_1(%arg0: i32) -> (i32, i32) {
    %c0_i32 = arith.constant 0 : i32
    %c0_i32_0 = arith.constant 0 : i32
    %c0_i32_1 = arith.constant 0 : i32
    return %c0_i32, %c0_i32_0 : i32, i32
  }
  func.func @transform_2(%arg0: i32) -> (i32, i32) {
    %c0_i32 = arith.constant 0 : i32
    %c0_i32_0 = arith.constant 0 : i32
    %c0_i32_1 = arith.constant 0 : i32
    return %c0_i32, %c0_i32_0 : i32, i32
  }
  func.func @transform_3(%arg0: i32) -> (i32, i32) {
    %c0_i32 = arith.constant 0 : i32
    %c0_i32_0 = arith.constant 0 : i32
    %c0_i32_1 = arith.constant 0 : i32
    return %c0_i32, %c0_i32_0 : i32, i32
  }
  func.func @transform_4(%arg0: i32) -> (i32, i32, i32) {
    %c0_i32 = arith.constant 0 : i32
    %c0_i32_0 = arith.constant 0 : i32
    %c0_i32_1 = arith.constant 0 : i32
    return %c0_i32, %arg0, %c0_i32_0 : i32, i32, i32
  }
}

module attributes {stable_mosaic.version = 11 : i64} {
  func.func @_lstm_last_fc_kernel(%arg0: i32, %arg1: memref<8x16x128xbf16, #tpu.memory_space<vmem>>, %arg2: memref<128x512xbf16, #tpu.memory_space<vmem>>, %arg3: memref<128x512xbf16, #tpu.memory_space<vmem>>, %arg4: memref<1x512xf32, #tpu.memory_space<vmem>>, %arg5: memref<128x128xbf16, #tpu.memory_space<vmem>>, %arg6: memref<1x128xf32, #tpu.memory_space<vmem>>, %arg7: memref<16x128xf32, #tpu.memory_space<vmem>>, %arg8: memref<8x16x512xbf16, #tpu.memory_space<vmem>>) attributes {dimension_semantics = [#tpu.dimension_semantics<parallel>], iteration_bounds = array<i64: 1>, scalar_prefetch = 0 : i64, scratch_operands = 1 : i64, tpu.core_type = #tpu.core_type<tc>, window_params = [{transform_indices = @transform_0, window_bounds = array<i64: 8, 16, 128>}, {pipeline_mode = #tpu.pipeline_mode<synchronous>, transform_indices = @transform_1, window_bounds = array<i64: 128, 512>}, {pipeline_mode = #tpu.pipeline_mode<synchronous>, transform_indices = @transform_2, window_bounds = array<i64: 128, 512>}, {pipeline_mode = #tpu.pipeline_mode<synchronous>, transform_indices = @transform_3, window_bounds = array<i64: 1, 512>}, {pipeline_mode = #tpu.pipeline_mode<synchronous>, transform_indices = @transform_4, window_bounds = array<i64: 128, 128>}, {pipeline_mode = #tpu.pipeline_mode<synchronous>, transform_indices = @transform_5, window_bounds = array<i64: 1, 128>}, {transform_indices = @transform_6, window_bounds = array<i64: 16, 128>}]} {
    %c0 = arith.constant 0 : index
    %c0_0 = arith.constant 0 : index
    %c0_1 = arith.constant 0 : index
    %0 = vector.load %arg1[%c0, %c0_0, %c0_1] : memref<8x16x128xbf16, #tpu.memory_space<vmem>>, vector<8x16x128xbf16>
    %1 = vector.shape_cast %0 : vector<8x16x128xbf16> to vector<128x128xbf16>
    %c0_2 = arith.constant 0 : index
    %c0_3 = arith.constant 0 : index
    %2 = vector.load %arg2[%c0_2, %c0_3] : memref<128x512xbf16, #tpu.memory_space<vmem>>, vector<128x512xbf16>
    %cst = arith.constant dense<0.000000e+00> : vector<128x512xf32>
    %3 = tpu.matmul %1, %2, %cst {dimension_numbers = #tpu.dot_dimension_numbers<[1], [0], [0], [1], [0, 0, 1, 1], [], []>} : vector<128x128xbf16>, vector<128x512xbf16>, vector<128x512xf32> -> vector<128x512xf32>
    %c0_4 = arith.constant 0 : index
    %c0_5 = arith.constant 0 : index
    %4 = vector.load %arg4[%c0_4, %c0_5] : memref<1x512xf32, #tpu.memory_space<vmem>>, vector<1x512xf32>
    %5 = vector.broadcast %4 : vector<1x512xf32> to vector<128x512xf32>
    %6 = arith.addf %3, %5 : vector<128x512xf32>
    %7 = vector.shape_cast %6 : vector<128x512xf32> to vector<8x16x512xf32>
    %8 = arith.truncf %7 : vector<8x16x512xf32> to vector<8x16x512xbf16>
    %c0_6 = arith.constant 0 : index
    %c0_7 = arith.constant 0 : index
    %c0_8 = arith.constant 0 : index
    %9 = vector.load %arg8[%c0_6, %c0_7, %c0_8] : memref<8x16x512xbf16, #tpu.memory_space<vmem>>, vector<8x16x512xbf16>
    tpu.vector_store %arg8[%c0_6, %c0_7, %c0_8], %8 {strides = array<i32>} : memref<8x16x512xbf16, #tpu.memory_space<vmem>>, vector<8x16x512xbf16>,
    %cst_9 = arith.constant 0.000000e+00 : f32
    %10 = vector.broadcast %cst_9 : f32 to vector<16x128xf32>
    %c0_i32 = arith.constant 0 : i32
    %11 = arith.index_cast %c0_i32 : i32 to index
    %c0_10 = arith.constant 0 : index
    %c0_11 = arith.constant 0 : index
    %12 = vector.load %arg8[%11, %c0_10, %c0_11] : memref<8x16x512xbf16, #tpu.memory_space<vmem>>, vector<1x16x512xbf16>
    %13 = vector.shape_cast %12 : vector<1x16x512xbf16> to vector<16x512xbf16>
    %14 = arith.extf %13 : vector<16x512xbf16> to vector<16x512xf32>
    %15 = arith.truncf %10 : vector<16x128xf32> to vector<16x128xbf16>
    %c0_12 = arith.constant 0 : index
    %c0_13 = arith.constant 0 : index
    %16 = vector.load %arg3[%c0_12, %c0_13] : memref<128x512xbf16, #tpu.memory_space<vmem>>, vector<128x512xbf16>
    %cst_14 = arith.constant dense<0.000000e+00> : vector<16x512xf32>
    %17 = tpu.matmul %15, %16, %cst_14 {dimension_numbers = #tpu.dot_dimension_numbers<[1], [0], [0], [1], [0, 0, 1, 1], [], []>} : vector<16x128xbf16>, vector<128x512xbf16>, vector<16x512xf32> -> vector<16x512xf32>
    %18 = arith.addf %14, %17 : vector<16x512xf32>
    %19 = vector.extract_strided_slice %18 {offsets = [0, 0], sizes = [16, 128], strides = [1, 1]} : vector<16x512xf32> to vector<16x128xf32>
    %20 = arith.negf %19 : vector<16x128xf32>
    %21 = math.exp %20 : vector<16x128xf32>
    %cst_15 = arith.constant 1.000000e+00 : f32
    %22 = vector.broadcast %cst_15 : f32 to vector<16x128xf32>
    %23 = arith.addf %22, %21 : vector<16x128xf32>
    %24 = arith.divf %22, %23 : vector<16x128xf32>
    %25 = vector.extract_strided_slice %18 {offsets = [0, 128], sizes = [16, 128], strides = [1, 1]} : vector<16x512xf32> to vector<16x128xf32>
    %26 = arith.negf %25 : vector<16x128xf32>
    %27 = math.exp %26 : vector<16x128xf32>
    %cst_16 = arith.constant 1.000000e+00 : f32
    %28 = vector.broadcast %cst_16 : f32 to vector<16x128xf32>
    %29 = arith.addf %28, %27 : vector<16x128xf32>
    %30 = arith.divf %28, %29 : vector<16x128xf32>
    %31 = vector.extract_strided_slice %18 {offsets = [0, 256], sizes = [16, 128], strides = [1, 1]} : vector<16x512xf32> to vector<16x128xf32>
    %32 = math.tanh %31 : vector<16x128xf32>
    %33 = vector.extract_strided_slice %18 {offsets = [0, 384], sizes = [16, 128], strides = [1, 1]} : vector<16x512xf32> to vector<16x128xf32>
    %34 = arith.negf %33 : vector<16x128xf32>
    %35 = math.exp %34 : vector<16x128xf32>
    %cst_17 = arith.constant 1.000000e+00 : f32
    %36 = vector.broadcast %cst_17 : f32 to vector<16x128xf32>
    %37 = arith.addf %36, %35 : vector<16x128xf32>
    %38 = arith.divf %36, %37 : vector<16x128xf32>
    %39 = arith.mulf %30, %10 : vector<16x128xf32>
    %40 = arith.mulf %24, %32 : vector<16x128xf32>
    %41 = arith.addf %39, %40 : vector<16x128xf32>
    %42 = math.tanh %41 : vector<16x128xf32>
    %43 = arith.mulf %38, %42 : vector<16x128xf32>
    %c1_i32 = arith.constant 1 : i32
    %44 = arith.index_cast %c1_i32 : i32 to index
    %c0_18 = arith.constant 0 : index
    %c0_19 = arith.constant 0 : index
    %45 = vector.load %arg8[%44, %c0_18, %c0_19] : memref<8x16x512xbf16, #tpu.memory_space<vmem>>, vector<1x16x512xbf16>
    %46 = vector.shape_cast %45 : vector<1x16x512xbf16> to vector<16x512xbf16>
    %47 = arith.extf %46 : vector<16x512xbf16> to vector<16x512xf32>
    %48 = arith.truncf %43 : vector<16x128xf32> to vector<16x128xbf16>
    %c0_20 = arith.constant 0 : index
    %c0_21 = arith.constant 0 : index
    %49 = vector.load %arg3[%c0_20, %c0_21] : memref<128x512xbf16, #tpu.memory_space<vmem>>, vector<128x512xbf16>
    %cst_22 = arith.constant dense<0.000000e+00> : vector<16x512xf32>
    %50 = tpu.matmul %48, %49, %cst_22 {dimension_numbers = #tpu.dot_dimension_numbers<[1], [0], [0], [1], [0, 0, 1, 1], [], []>} : vector<16x128xbf16>, vector<128x512xbf16>, vector<16x512xf32> -> vector<16x512xf32>
    %51 = arith.addf %47, %50 : vector<16x512xf32>
    %52 = vector.extract_strided_slice %51 {offsets = [0, 0], sizes = [16, 128], strides = [1, 1]} : vector<16x512xf32> to vector<16x128xf32>
    %53 = arith.negf %52 : vector<16x128xf32>
    %54 = math.exp %53 : vector<16x128xf32>
    %cst_23 = arith.constant 1.000000e+00 : f32
    %55 = vector.broadcast %cst_23 : f32 to vector<16x128xf32>
    %56 = arith.addf %55, %54 : vector<16x128xf32>
    %57 = arith.divf %55, %56 : vector<16x128xf32>
    %58 = vector.extract_strided_slice %51 {offsets = [0, 128], sizes = [16, 128], strides = [1, 1]} : vector<16x512xf32> to vector<16x128xf32>
    %59 = arith.negf %58 : vector<16x128xf32>
    %60 = math.exp %59 : vector<16x128xf32>
    %cst_24 = arith.constant 1.000000e+00 : f32
    %61 = vector.broadcast %cst_24 : f32 to vector<16x128xf32>
    %62 = arith.addf %61, %60 : vector<16x128xf32>
    %63 = arith.divf %61, %62 : vector<16x128xf32>
    %64 = vector.extract_strided_slice %51 {offsets = [0, 256], sizes = [16, 128], strides = [1, 1]} : vector<16x512xf32> to vector<16x128xf32>
    %65 = math.tanh %64 : vector<16x128xf32>
    %66 = vector.extract_strided_slice %51 {offsets = [0, 384], sizes = [16, 128], strides = [1, 1]} : vector<16x512xf32> to vector<16x128xf32>
    %67 = arith.negf %66 : vector<16x128xf32>
    %68 = math.exp %67 : vector<16x128xf32>
    %cst_25 = arith.constant 1.000000e+00 : f32
    %69 = vector.broadcast %cst_25 : f32 to vector<16x128xf32>
    %70 = arith.addf %69, %68 : vector<16x128xf32>
    %71 = arith.divf %69, %70 : vector<16x128xf32>
    %72 = arith.mulf %63, %41 : vector<16x128xf32>
    %73 = arith.mulf %57, %65 : vector<16x128xf32>
    %74 = arith.addf %72, %73 : vector<16x128xf32>
    %75 = math.tanh %74 : vector<16x128xf32>
    %76 = arith.mulf %71, %75 : vector<16x128xf32>
    %c2_i32 = arith.constant 2 : i32
    %77 = arith.index_cast %c2_i32 : i32 to index
    %c0_26 = arith.constant 0 : index
    %c0_27 = arith.constant 0 : index
    %78 = vector.load %arg8[%77, %c0_26, %c0_27] : memref<8x16x512xbf16, #tpu.memory_space<vmem>>, vector<1x16x512xbf16>
    %79 = vector.shape_cast %78 : vector<1x16x512xbf16> to vector<16x512xbf16>
    %80 = arith.extf %79 : vector<16x512xbf16> to vector<16x512xf32>
    %81 = arith.truncf %76 : vector<16x128xf32> to vector<16x128xbf16>
    %c0_28 = arith.constant 0 : index
    %c0_29 = arith.constant 0 : index
    %82 = vector.load %arg3[%c0_28, %c0_29] : memref<128x512xbf16, #tpu.memory_space<vmem>>, vector<128x512xbf16>
    %cst_30 = arith.constant dense<0.000000e+00> : vector<16x512xf32>
    %83 = tpu.matmul %81, %82, %cst_30 {dimension_numbers = #tpu.dot_dimension_numbers<[1], [0], [0], [1], [0, 0, 1, 1], [], []>} : vector<16x128xbf16>, vector<128x512xbf16>, vector<16x512xf32> -> vector<16x512xf32>
    %84 = arith.addf %80, %83 : vector<16x512xf32>
    %85 = vector.extract_strided_slice %84 {offsets = [0, 0], sizes = [16, 128], strides = [1, 1]} : vector<16x512xf32> to vector<16x128xf32>
    %86 = arith.negf %85 : vector<16x128xf32>
    %87 = math.exp %86 : vector<16x128xf32>
    %cst_31 = arith.constant 1.000000e+00 : f32
    %88 = vector.broadcast %cst_31 : f32 to vector<16x128xf32>
    %89 = arith.addf %88, %87 : vector<16x128xf32>
    %90 = arith.divf %88, %89 : vector<16x128xf32>
    %91 = vector.extract_strided_slice %84 {offsets = [0, 128], sizes = [16, 128], strides = [1, 1]} : vector<16x512xf32> to vector<16x128xf32>
    %92 = arith.negf %91 : vector<16x128xf32>
    %93 = math.exp %92 : vector<16x128xf32>
    %cst_32 = arith.constant 1.000000e+00 : f32
    %94 = vector.broadcast %cst_32 : f32 to vector<16x128xf32>
    %95 = arith.addf %94, %93 : vector<16x128xf32>
    %96 = arith.divf %94, %95 : vector<16x128xf32>
    %97 = vector.extract_strided_slice %84 {offsets = [0, 256], sizes = [16, 128], strides = [1, 1]} : vector<16x512xf32> to vector<16x128xf32>
    %98 = math.tanh %97 : vector<16x128xf32>
    %99 = vector.extract_strided_slice %84 {offsets = [0, 384], sizes = [16, 128], strides = [1, 1]} : vector<16x512xf32> to vector<16x128xf32>
    %100 = arith.negf %99 : vector<16x128xf32>
    %101 = math.exp %100 : vector<16x128xf32>
    %cst_33 = arith.constant 1.000000e+00 : f32
    %102 = vector.broadcast %cst_33 : f32 to vector<16x128xf32>
    %103 = arith.addf %102, %101 : vector<16x128xf32>
    %104 = arith.divf %102, %103 : vector<16x128xf32>
    %105 = arith.mulf %96, %74 : vector<16x128xf32>
    %106 = arith.mulf %90, %98 : vector<16x128xf32>
    %107 = arith.addf %105, %106 : vector<16x128xf32>
    %108 = math.tanh %107 : vector<16x128xf32>
    %109 = arith.mulf %104, %108 : vector<16x128xf32>
    %c3_i32 = arith.constant 3 : i32
    %110 = arith.index_cast %c3_i32 : i32 to index
    %c0_34 = arith.constant 0 : index
    %c0_35 = arith.constant 0 : index
    %111 = vector.load %arg8[%110, %c0_34, %c0_35] : memref<8x16x512xbf16, #tpu.memory_space<vmem>>, vector<1x16x512xbf16>
    %112 = vector.shape_cast %111 : vector<1x16x512xbf16> to vector<16x512xbf16>
    %113 = arith.extf %112 : vector<16x512xbf16> to vector<16x512xf32>
    %114 = arith.truncf %109 : vector<16x128xf32> to vector<16x128xbf16>
    %c0_36 = arith.constant 0 : index
    %c0_37 = arith.constant 0 : index
    %115 = vector.load %arg3[%c0_36, %c0_37] : memref<128x512xbf16, #tpu.memory_space<vmem>>, vector<128x512xbf16>
    %cst_38 = arith.constant dense<0.000000e+00> : vector<16x512xf32>
    %116 = tpu.matmul %114, %115, %cst_38 {dimension_numbers = #tpu.dot_dimension_numbers<[1], [0], [0], [1], [0, 0, 1, 1], [], []>} : vector<16x128xbf16>, vector<128x512xbf16>, vector<16x512xf32> -> vector<16x512xf32>
    %117 = arith.addf %113, %116 : vector<16x512xf32>
    %118 = vector.extract_strided_slice %117 {offsets = [0, 0], sizes = [16, 128], strides = [1, 1]} : vector<16x512xf32> to vector<16x128xf32>
    %119 = arith.negf %118 : vector<16x128xf32>
    %120 = math.exp %119 : vector<16x128xf32>
    %cst_39 = arith.constant 1.000000e+00 : f32
    %121 = vector.broadcast %cst_39 : f32 to vector<16x128xf32>
    %122 = arith.addf %121, %120 : vector<16x128xf32>
    %123 = arith.divf %121, %122 : vector<16x128xf32>
    %124 = vector.extract_strided_slice %117 {offsets = [0, 128], sizes = [16, 128], strides = [1, 1]} : vector<16x512xf32> to vector<16x128xf32>
    %125 = arith.negf %124 : vector<16x128xf32>
    %126 = math.exp %125 : vector<16x128xf32>
    %cst_40 = arith.constant 1.000000e+00 : f32
    %127 = vector.broadcast %cst_40 : f32 to vector<16x128xf32>
    %128 = arith.addf %127, %126 : vector<16x128xf32>
    %129 = arith.divf %127, %128 : vector<16x128xf32>
    %130 = vector.extract_strided_slice %117 {offsets = [0, 256], sizes = [16, 128], strides = [1, 1]} : vector<16x512xf32> to vector<16x128xf32>
    %131 = math.tanh %130 : vector<16x128xf32>
    %132 = vector.extract_strided_slice %117 {offsets = [0, 384], sizes = [16, 128], strides = [1, 1]} : vector<16x512xf32> to vector<16x128xf32>
    %133 = arith.negf %132 : vector<16x128xf32>
    %134 = math.exp %133 : vector<16x128xf32>
    %cst_41 = arith.constant 1.000000e+00 : f32
    %135 = vector.broadcast %cst_41 : f32 to vector<16x128xf32>
    %136 = arith.addf %135, %134 : vector<16x128xf32>
    %137 = arith.divf %135, %136 : vector<16x128xf32>
    %138 = arith.mulf %129, %107 : vector<16x128xf32>
    %139 = arith.mulf %123, %131 : vector<16x128xf32>
    %140 = arith.addf %138, %139 : vector<16x128xf32>
    %141 = math.tanh %140 : vector<16x128xf32>
    %142 = arith.mulf %137, %141 : vector<16x128xf32>
    %c4_i32 = arith.constant 4 : i32
    %143 = arith.index_cast %c4_i32 : i32 to index
    %c0_42 = arith.constant 0 : index
    %c0_43 = arith.constant 0 : index
    %144 = vector.load %arg8[%143, %c0_42, %c0_43] : memref<8x16x512xbf16, #tpu.memory_space<vmem>>, vector<1x16x512xbf16>
    %145 = vector.shape_cast %144 : vector<1x16x512xbf16> to vector<16x512xbf16>
    %146 = arith.extf %145 : vector<16x512xbf16> to vector<16x512xf32>
    %147 = arith.truncf %142 : vector<16x128xf32> to vector<16x128xbf16>
    %c0_44 = arith.constant 0 : index
    %c0_45 = arith.constant 0 : index
    %148 = vector.load %arg3[%c0_44, %c0_45] : memref<128x512xbf16, #tpu.memory_space<vmem>>, vector<128x512xbf16>
    %cst_46 = arith.constant dense<0.000000e+00> : vector<16x512xf32>
    %149 = tpu.matmul %147, %148, %cst_46 {dimension_numbers = #tpu.dot_dimension_numbers<[1], [0], [0], [1], [0, 0, 1, 1], [], []>} : vector<16x128xbf16>, vector<128x512xbf16>, vector<16x512xf32> -> vector<16x512xf32>
    %150 = arith.addf %146, %149 : vector<16x512xf32>
    %151 = vector.extract_strided_slice %150 {offsets = [0, 0], sizes = [16, 128], strides = [1, 1]} : vector<16x512xf32> to vector<16x128xf32>
    %152 = arith.negf %151 : vector<16x128xf32>
    %153 = math.exp %152 : vector<16x128xf32>
    %cst_47 = arith.constant 1.000000e+00 : f32
    %154 = vector.broadcast %cst_47 : f32 to vector<16x128xf32>
    %155 = arith.addf %154, %153 : vector<16x128xf32>
    %156 = arith.divf %154, %155 : vector<16x128xf32>
    %157 = vector.extract_strided_slice %150 {offsets = [0, 128], sizes = [16, 128], strides = [1, 1]} : vector<16x512xf32> to vector<16x128xf32>
    %158 = arith.negf %157 : vector<16x128xf32>
    %159 = math.exp %158 : vector<16x128xf32>
    %cst_48 = arith.constant 1.000000e+00 : f32
    %160 = vector.broadcast %cst_48 : f32 to vector<16x128xf32>
    %161 = arith.addf %160, %159 : vector<16x128xf32>
    %162 = arith.divf %160, %161 : vector<16x128xf32>
    %163 = vector.extract_strided_slice %150 {offsets = [0, 256], sizes = [16, 128], strides = [1, 1]} : vector<16x512xf32> to vector<16x128xf32>
    %164 = math.tanh %163 : vector<16x128xf32>
    %165 = vector.extract_strided_slice %150 {offsets = [0, 384], sizes = [16, 128], strides = [1, 1]} : vector<16x512xf32> to vector<16x128xf32>
    %166 = arith.negf %165 : vector<16x128xf32>
    %167 = math.exp %166 : vector<16x128xf32>
    %cst_49 = arith.constant 1.000000e+00 : f32
    %168 = vector.broadcast %cst_49 : f32 to vector<16x128xf32>
    %169 = arith.addf %168, %167 : vector<16x128xf32>
    %170 = arith.divf %168, %169 : vector<16x128xf32>
    %171 = arith.mulf %162, %140 : vector<16x128xf32>
    %172 = arith.mulf %156, %164 : vector<16x128xf32>
    %173 = arith.addf %171, %172 : vector<16x128xf32>
    %174 = math.tanh %173 : vector<16x128xf32>
    %175 = arith.mulf %170, %174 : vector<16x128xf32>
    %c5_i32 = arith.constant 5 : i32
    %176 = arith.index_cast %c5_i32 : i32 to index
    %c0_50 = arith.constant 0 : index
    %c0_51 = arith.constant 0 : index
    %177 = vector.load %arg8[%176, %c0_50, %c0_51] : memref<8x16x512xbf16, #tpu.memory_space<vmem>>, vector<1x16x512xbf16>
    %178 = vector.shape_cast %177 : vector<1x16x512xbf16> to vector<16x512xbf16>
    %179 = arith.extf %178 : vector<16x512xbf16> to vector<16x512xf32>
    %180 = arith.truncf %175 : vector<16x128xf32> to vector<16x128xbf16>
    %c0_52 = arith.constant 0 : index
    %c0_53 = arith.constant 0 : index
    %181 = vector.load %arg3[%c0_52, %c0_53] : memref<128x512xbf16, #tpu.memory_space<vmem>>, vector<128x512xbf16>
    %cst_54 = arith.constant dense<0.000000e+00> : vector<16x512xf32>
    %182 = tpu.matmul %180, %181, %cst_54 {dimension_numbers = #tpu.dot_dimension_numbers<[1], [0], [0], [1], [0, 0, 1, 1], [], []>} : vector<16x128xbf16>, vector<128x512xbf16>, vector<16x512xf32> -> vector<16x512xf32>
    %183 = arith.addf %179, %182 : vector<16x512xf32>
    %184 = vector.extract_strided_slice %183 {offsets = [0, 0], sizes = [16, 128], strides = [1, 1]} : vector<16x512xf32> to vector<16x128xf32>
    %185 = arith.negf %184 : vector<16x128xf32>
    %186 = math.exp %185 : vector<16x128xf32>
    %cst_55 = arith.constant 1.000000e+00 : f32
    %187 = vector.broadcast %cst_55 : f32 to vector<16x128xf32>
    %188 = arith.addf %187, %186 : vector<16x128xf32>
    %189 = arith.divf %187, %188 : vector<16x128xf32>
    %190 = vector.extract_strided_slice %183 {offsets = [0, 128], sizes = [16, 128], strides = [1, 1]} : vector<16x512xf32> to vector<16x128xf32>
    %191 = arith.negf %190 : vector<16x128xf32>
    %192 = math.exp %191 : vector<16x128xf32>
    %cst_56 = arith.constant 1.000000e+00 : f32
    %193 = vector.broadcast %cst_56 : f32 to vector<16x128xf32>
    %194 = arith.addf %193, %192 : vector<16x128xf32>
    %195 = arith.divf %193, %194 : vector<16x128xf32>
    %196 = vector.extract_strided_slice %183 {offsets = [0, 256], sizes = [16, 128], strides = [1, 1]} : vector<16x512xf32> to vector<16x128xf32>
    %197 = math.tanh %196 : vector<16x128xf32>
    %198 = vector.extract_strided_slice %183 {offsets = [0, 384], sizes = [16, 128], strides = [1, 1]} : vector<16x512xf32> to vector<16x128xf32>
    %199 = arith.negf %198 : vector<16x128xf32>
    %200 = math.exp %199 : vector<16x128xf32>
    %cst_57 = arith.constant 1.000000e+00 : f32
    %201 = vector.broadcast %cst_57 : f32 to vector<16x128xf32>
    %202 = arith.addf %201, %200 : vector<16x128xf32>
    %203 = arith.divf %201, %202 : vector<16x128xf32>
    %204 = arith.mulf %195, %173 : vector<16x128xf32>
    %205 = arith.mulf %189, %197 : vector<16x128xf32>
    %206 = arith.addf %204, %205 : vector<16x128xf32>
    %207 = math.tanh %206 : vector<16x128xf32>
    %208 = arith.mulf %203, %207 : vector<16x128xf32>
    %c6_i32 = arith.constant 6 : i32
    %209 = arith.index_cast %c6_i32 : i32 to index
    %c0_58 = arith.constant 0 : index
    %c0_59 = arith.constant 0 : index
    %210 = vector.load %arg8[%209, %c0_58, %c0_59] : memref<8x16x512xbf16, #tpu.memory_space<vmem>>, vector<1x16x512xbf16>
    %211 = vector.shape_cast %210 : vector<1x16x512xbf16> to vector<16x512xbf16>
    %212 = arith.extf %211 : vector<16x512xbf16> to vector<16x512xf32>
    %213 = arith.truncf %208 : vector<16x128xf32> to vector<16x128xbf16>
    %c0_60 = arith.constant 0 : index
    %c0_61 = arith.constant 0 : index
    %214 = vector.load %arg3[%c0_60, %c0_61] : memref<128x512xbf16, #tpu.memory_space<vmem>>, vector<128x512xbf16>
    %cst_62 = arith.constant dense<0.000000e+00> : vector<16x512xf32>
    %215 = tpu.matmul %213, %214, %cst_62 {dimension_numbers = #tpu.dot_dimension_numbers<[1], [0], [0], [1], [0, 0, 1, 1], [], []>} : vector<16x128xbf16>, vector<128x512xbf16>, vector<16x512xf32> -> vector<16x512xf32>
    %216 = arith.addf %212, %215 : vector<16x512xf32>
    %217 = vector.extract_strided_slice %216 {offsets = [0, 0], sizes = [16, 128], strides = [1, 1]} : vector<16x512xf32> to vector<16x128xf32>
    %218 = arith.negf %217 : vector<16x128xf32>
    %219 = math.exp %218 : vector<16x128xf32>
    %cst_63 = arith.constant 1.000000e+00 : f32
    %220 = vector.broadcast %cst_63 : f32 to vector<16x128xf32>
    %221 = arith.addf %220, %219 : vector<16x128xf32>
    %222 = arith.divf %220, %221 : vector<16x128xf32>
    %223 = vector.extract_strided_slice %216 {offsets = [0, 128], sizes = [16, 128], strides = [1, 1]} : vector<16x512xf32> to vector<16x128xf32>
    %224 = arith.negf %223 : vector<16x128xf32>
    %225 = math.exp %224 : vector<16x128xf32>
    %cst_64 = arith.constant 1.000000e+00 : f32
    %226 = vector.broadcast %cst_64 : f32 to vector<16x128xf32>
    %227 = arith.addf %226, %225 : vector<16x128xf32>
    %228 = arith.divf %226, %227 : vector<16x128xf32>
    %229 = vector.extract_strided_slice %216 {offsets = [0, 256], sizes = [16, 128], strides = [1, 1]} : vector<16x512xf32> to vector<16x128xf32>
    %230 = math.tanh %229 : vector<16x128xf32>
    %231 = vector.extract_strided_slice %216 {offsets = [0, 384], sizes = [16, 128], strides = [1, 1]} : vector<16x512xf32> to vector<16x128xf32>
    %232 = arith.negf %231 : vector<16x128xf32>
    %233 = math.exp %232 : vector<16x128xf32>
    %cst_65 = arith.constant 1.000000e+00 : f32
    %234 = vector.broadcast %cst_65 : f32 to vector<16x128xf32>
    %235 = arith.addf %234, %233 : vector<16x128xf32>
    %236 = arith.divf %234, %235 : vector<16x128xf32>
    %237 = arith.mulf %228, %206 : vector<16x128xf32>
    %238 = arith.mulf %222, %230 : vector<16x128xf32>
    %239 = arith.addf %237, %238 : vector<16x128xf32>
    %240 = math.tanh %239 : vector<16x128xf32>
    %241 = arith.mulf %236, %240 : vector<16x128xf32>
    %c7_i32 = arith.constant 7 : i32
    %242 = arith.index_cast %c7_i32 : i32 to index
    %c0_66 = arith.constant 0 : index
    %c0_67 = arith.constant 0 : index
    %243 = vector.load %arg8[%242, %c0_66, %c0_67] : memref<8x16x512xbf16, #tpu.memory_space<vmem>>, vector<1x16x512xbf16>
    %244 = vector.shape_cast %243 : vector<1x16x512xbf16> to vector<16x512xbf16>
    %245 = arith.extf %244 : vector<16x512xbf16> to vector<16x512xf32>
    %246 = arith.truncf %241 : vector<16x128xf32> to vector<16x128xbf16>
    %c0_68 = arith.constant 0 : index
    %c0_69 = arith.constant 0 : index
    %247 = vector.load %arg3[%c0_68, %c0_69] : memref<128x512xbf16, #tpu.memory_space<vmem>>, vector<128x512xbf16>
    %cst_70 = arith.constant dense<0.000000e+00> : vector<16x512xf32>
    %248 = tpu.matmul %246, %247, %cst_70 {dimension_numbers = #tpu.dot_dimension_numbers<[1], [0], [0], [1], [0, 0, 1, 1], [], []>} : vector<16x128xbf16>, vector<128x512xbf16>, vector<16x512xf32> -> vector<16x512xf32>
    %249 = arith.addf %245, %248 : vector<16x512xf32>
    %250 = vector.extract_strided_slice %249 {offsets = [0, 0], sizes = [16, 128], strides = [1, 1]} : vector<16x512xf32> to vector<16x128xf32>
    %251 = arith.negf %250 : vector<16x128xf32>
    %252 = math.exp %251 : vector<16x128xf32>
    %cst_71 = arith.constant 1.000000e+00 : f32
    %253 = vector.broadcast %cst_71 : f32 to vector<16x128xf32>
    %254 = arith.addf %253, %252 : vector<16x128xf32>
    %255 = arith.divf %253, %254 : vector<16x128xf32>
    %256 = vector.extract_strided_slice %249 {offsets = [0, 128], sizes = [16, 128], strides = [1, 1]} : vector<16x512xf32> to vector<16x128xf32>
    %257 = arith.negf %256 : vector<16x128xf32>
    %258 = math.exp %257 : vector<16x128xf32>
    %cst_72 = arith.constant 1.000000e+00 : f32
    %259 = vector.broadcast %cst_72 : f32 to vector<16x128xf32>
    %260 = arith.addf %259, %258 : vector<16x128xf32>
    %261 = arith.divf %259, %260 : vector<16x128xf32>
    %262 = vector.extract_strided_slice %249 {offsets = [0, 256], sizes = [16, 128], strides = [1, 1]} : vector<16x512xf32> to vector<16x128xf32>
    %263 = math.tanh %262 : vector<16x128xf32>
    %264 = vector.extract_strided_slice %249 {offsets = [0, 384], sizes = [16, 128], strides = [1, 1]} : vector<16x512xf32> to vector<16x128xf32>
    %265 = arith.negf %264 : vector<16x128xf32>
    %266 = math.exp %265 : vector<16x128xf32>
    %cst_73 = arith.constant 1.000000e+00 : f32
    %267 = vector.broadcast %cst_73 : f32 to vector<16x128xf32>
    %268 = arith.addf %267, %266 : vector<16x128xf32>
    %269 = arith.divf %267, %268 : vector<16x128xf32>
    %270 = arith.mulf %261, %239 : vector<16x128xf32>
    %271 = arith.mulf %255, %263 : vector<16x128xf32>
    %272 = arith.addf %270, %271 : vector<16x128xf32>
    %273 = math.tanh %272 : vector<16x128xf32>
    %274 = arith.mulf %269, %273 : vector<16x128xf32>
    %c8_i32 = arith.constant 8 : i32
    %275 = arith.truncf %274 : vector<16x128xf32> to vector<16x128xbf16>
    %c0_74 = arith.constant 0 : index
    %c0_75 = arith.constant 0 : index
    %276 = vector.load %arg5[%c0_74, %c0_75] : memref<128x128xbf16, #tpu.memory_space<vmem>>, vector<128x128xbf16>
    %cst_76 = arith.constant dense<0.000000e+00> : vector<16x128xf32>
    %277 = tpu.matmul %275, %276, %cst_76 {dimension_numbers = #tpu.dot_dimension_numbers<[1], [0], [0], [1], [0, 0, 1, 1], [], []>} : vector<16x128xbf16>, vector<128x128xbf16>, vector<16x128xf32> -> vector<16x128xf32>
    %c0_77 = arith.constant 0 : index
    %c0_78 = arith.constant 0 : index
    %278 = vector.load %arg6[%c0_77, %c0_78] : memref<1x128xf32, #tpu.memory_space<vmem>>, vector<1x128xf32>
    %279 = vector.broadcast %278 : vector<1x128xf32> to vector<16x128xf32>
    %280 = arith.addf %277, %279 : vector<16x128xf32>
    %c0_79 = arith.constant 0 : index
    %c0_80 = arith.constant 0 : index
    %281 = vector.load %arg7[%c0_79, %c0_80] : memref<16x128xf32, #tpu.memory_space<vmem>>, vector<16x128xf32>
    tpu.vector_store %arg7[%c0_79, %c0_80], %280 {strides = array<i32>} : memref<16x128xf32, #tpu.memory_space<vmem>>, vector<16x128xf32>,
    return
  }
  func.func @transform_0(%arg0: i32) -> (i32, i32, i32) {
    %c0_i32 = arith.constant 0 : i32
    %c0_i32_0 = arith.constant 0 : i32
    %c0_i32_1 = arith.constant 0 : i32
    return %c0_i32, %arg0, %c0_i32_0 : i32, i32, i32
  }
  func.func @transform_1(%arg0: i32) -> (i32, i32) {
    %c0_i32 = arith.constant 0 : i32
    %c0_i32_0 = arith.constant 0 : i32
    %c0_i32_1 = arith.constant 0 : i32
    return %c0_i32, %c0_i32_0 : i32, i32
  }
  func.func @transform_2(%arg0: i32) -> (i32, i32) {
    %c0_i32 = arith.constant 0 : i32
    %c0_i32_0 = arith.constant 0 : i32
    %c0_i32_1 = arith.constant 0 : i32
    return %c0_i32, %c0_i32_0 : i32, i32
  }
  func.func @transform_3(%arg0: i32) -> (i32, i32) {
    %c0_i32 = arith.constant 0 : i32
    %c0_i32_0 = arith.constant 0 : i32
    %c0_i32_1 = arith.constant 0 : i32
    return %c0_i32, %c0_i32_0 : i32, i32
  }
  func.func @transform_4(%arg0: i32) -> (i32, i32) {
    %c0_i32 = arith.constant 0 : i32
    %c0_i32_0 = arith.constant 0 : i32
    %c0_i32_1 = arith.constant 0 : i32
    return %c0_i32, %c0_i32_0 : i32, i32
  }
  func.func @transform_5(%arg0: i32) -> (i32, i32) {
    %c0_i32 = arith.constant 0 : i32
    %c0_i32_0 = arith.constant 0 : i32
    %c0_i32_1 = arith.constant 0 : i32
    return %c0_i32, %c0_i32_0 : i32, i32
  }
  func.func @transform_6(%arg0: i32) -> (i32, i32) {
    %c0_i32 = arith.constant 0 : i32
    %c0_i32_0 = arith.constant 0 : i32
    return %arg0, %c0_i32 : i32, i32
  }
}

</mosaic_0001>

<bundles_post_ra>
// kernel: lstm_forward.3
= control target key start
LH: loop header
LB: loop body
LE: loop exit
PB: predicated region body
PF: predicated region fallthrough
CT: control target
= control target key end

     0   :  { %11 = vsyncpa [#allocation4], 0  ;;  %s3851_s0 = inlined_call_operand.vmem [shape: bf16[8,16,128], index: 0, kind: input, shape index: {}]   ;;  %s3852_s1 = inlined_call_operand.vmem [shape: bf16[128,512], index: 1, kind: input, shape index: {}]   ;;  %s3853_s2 = inlined_call_operand.vmem [shape: bf16[128,512], index: 2, kind: input, shape index: {}]   ;;  %s3854_s3 = inlined_call_operand.vmem [shape: f32[1,512], index: 3, kind: input, shape index: {}]   ;;  %s3855_s4 = inlined_call_operand.hbm [shape: bf16[128,128], index: 4, kind: input, shape index: {}]   ;;  %s3856_s5 = inlined_call_operand.hbm [shape: f32[1,128], index: 5, kind: input, shape index: {}]   ;;  %s3857_s6 = inlined_call_operand.vmem [shape: f32[16,128], index: 6, kind: output, shape index: {}]  }
   0x1   :  { %12 = vsyncpa [#allocation6], 0  ;;  %s2790_s21 = smov [#allocation3]   ;;  %s2742_s25 = scalar_lea.hbm %s3855_s4, 1024 }
   0x2   :  { %s26_s22 = sshll.u32 %s2790_s21, 4  ;;  %p2743_p0 = scmp.ne.s32.totalorder %s3855_s4, %s2742_s25  ;;  %s27_s22 = int_to_ptr.vmem [resolvable:$true] %s26_s22 }
   0x3   :  { %p2746_p1 = scmp.lt.u32.totalorder %s2742_s25, %s3855_s4 }
   0x5   :  { %p2748_p2 = pnand %p2746_p1, %p2743_p0 }
   0x7   :  { %2751 = shalt.err (!%p2748_p2)
}
   0x8   :  { %s2752_s30 = scalar_lea.vmem %s27_s22, 1024  ;;  %p2757_p4 = scmp.lt.s32.totalorder %s27_s22, %s27_s22 }
   0x9   :  { %p2753_p3 = scmp.ne.s32.totalorder %s27_s22, %s2752_s30  ;;  %p2758_p5 = scmp.lt.s32.totalorder %s2752_s30, %s2752_s30 }
   0xb   :  { %p2759_p6 = por %p2758_p5, %p2757_p4 }
   0xd   :  { %p2760_p7 = pnand %p2759_p6, %p2753_p3 }
   0xf   :  { %2763 = shalt.err (!%p2760_p7)
}
  0x10   :  { %s2791_s7 = smov 64   ;;  %s2792_s8 = smov 4  }
  0x11   :  { %32 = dma.hbm_to_vmem [thread:$0]  %s3855_s4, 1024, %s27_s22, [#allocation4], %s2791_s7, %s2791_s7, %s2792_s8  }
  0x12   :  { %s2793_s11 = smov [#allocation5]   ;;  %s2764_s15 = scalar_lea.hbm %s3856_s5, 16 }
  0x13   :  { %s39_s12 = sshll.u32 %s2793_s11, 4  ;;  %p2765_p8 = scmp.ne.s32.totalorder %s3856_s5, %s2764_s15  ;;  %s40_s12 = int_to_ptr.vmem [resolvable:$true] %s39_s12 }
  0x14   :  { %p2768_p9 = scmp.lt.u32.totalorder %s2764_s15, %s3856_s5 }
  0x16   :  { %p2770_p10 = pnand %p2768_p9, %p2765_p8 }
  0x18   :  { %2773 = shalt.err (!%p2770_p10)
}
  0x19   :  { %s2774_s20 = scalar_lea.vmem %s40_s12, 16  ;;  %s2778_s4 = scalar_lea.vmem %s40_s12, 32 }
  0x1a   :  { %p2775_p11 = scmp.ne.s32.totalorder %s40_s12, %s2774_s20  ;;  %p2779_p12 = scmp.lt.s32.totalorder %s40_s12, %s40_s12 }
  0x1b   :  { %p2780_p13 = scmp.lt.s32.totalorder %s2778_s4, %s2774_s20 }
  0x1d   :  { %p2781_p0 = por %p2780_p13, %p2779_p12 }
  0x1f   :  { %p2782_p1 = pnand %p2781_p0, %p2775_p11 }
  0x21   :  { %2785 = shalt.err (!%p2782_p1)
}
  0x22   :  { %42 = dma.hbm_to_vmem [thread:$0]  %s3856_s5, 16, %s40_s12, [#allocation6]  }
  0x23   :  { %2786 = dma.done.wait [#allocation4], 1024  }
  0x24   :  { %2787 = vsyncadd [#allocation4], 4294966272 }
  0x25   :  { %2788 = dma.done.wait [#allocation6], 16  }
  0x26   :  { %2789 = vsyncadd [#allocation6], 4294967280  ;;  %v3858_v0 = vmov 0   ;;  %v2342_v1 = vld [vmem:[%s3852_s1 + $0x4] ss:$16 sps:$4 sm:$0xff]   ;;  %v2394_v43 = vld [vmem:[%s3851_s0 + $0x8] sm:$0xff]  }
  0x27   :  { %360 = vmatprep.mubr.bf16.mxu0 %v3858_v0  ;;  %473 = vmatprep.mubr.bf16.mxu1 %v3858_v0  ;;  %v2344_v2 = vld [vmem:[%s3852_s1 + $0xc] ss:$16 sps:$4 sm:$0xff]   ;;  %v2346_v3 = vld [vmem:[%s3852_s1] ss:$16 sps:$4 sm:$0xff]   ;;  %v2347_v4 = vld [vmem:[%s3852_s1 + $0x8] ss:$16 sps:$4 sm:$0xff]  }
  0x28   :  { %328 = vmatprep.subr.bf16.mxu0 %v2342_v1  ;;  %441 = vmatprep.subr.bf16.mxu1 %v2344_v2  ;;  %v2348_v5 = vld [vmem:[%s3852_s1 + $0x24] ss:$16 sps:$4 sm:$0xff]   ;;  %v2350_v6 = vld [vmem:[%s3852_s1 + $0x2c] ss:$16 sps:$4 sm:$0xff]   ;;  %v2352_v7 = vld [vmem:[%s3852_s1 + $0x20] ss:$16 sps:$4 sm:$0xff]  }
  0x29   :  { %329 = vmatpush1.bf16.msra.mxu0 %v2346_v3  ;;  %442 = vmatpush1.bf16.msra.mxu1 %v2347_v4  ;;  %v2353_v8 = vld [vmem:[%s3852_s1 + $0x28] ss:$16 sps:$4 sm:$0xff]   ;;  %v2354_v9 = vld [vmem:[%s3852_s1 + $0x44] ss:$16 sps:$4 sm:$0xff]   ;;  %v2356_v10 = vld [vmem:[%s3852_s1 + $0x4c] ss:$16 sps:$4 sm:$0xff]  }
  0x2a   :  { %330 = vmatprep.subr.bf16.mxu0 %v2348_v5  ;;  %443 = vmatprep.subr.bf16.mxu1 %v2350_v6  ;;  %v2358_v11 = vld [vmem:[%s3852_s1 + $0x40] ss:$16 sps:$4 sm:$0xff]   ;;  %v2359_v12 = vld [vmem:[%s3852_s1 + $0x48] ss:$16 sps:$4 sm:$0xff]   ;;  %v2360_v13 = vld [vmem:[%s3852_s1 + $0x64] ss:$16 sps:$4 sm:$0xff]  }
  0x2b   :  { %v2362_v14 = vld [vmem:[%s3852_s1 + $0x6c] ss:$16 sps:$4 sm:$0xff]   ;;  %v2364_v15 = vld [vmem:[%s3852_s1 + $0x60] ss:$16 sps:$4 sm:$0xff]   ;;  %v2365_v16 = vld [vmem:[%s3852_s1 + $0x68] ss:$16 sps:$4 sm:$0xff]  }
  0x2c   :  { %v2366_v17 = vld [vmem:[%s3852_s1 + $0x84] ss:$16 sps:$4 sm:$0xff]   ;;  %v2368_v18 = vld [vmem:[%s3852_s1 + $0x8c] ss:$16 sps:$4 sm:$0xff]   ;;  %v2370_v19 = vld [vmem:[%s3852_s1 + $0x80] ss:$16 sps:$4 sm:$0xff]  }
  0x2d   :  { %331 = vmatpush1.bf16.msra.mxu0 %v2352_v7  ;;  %444 = vmatpush1.bf16.msra.mxu1 %v2353_v8  ;;  %v2371_v20 = vld [vmem:[%s3852_s1 + $0x88] ss:$16 sps:$4 sm:$0xff]   ;;  %v2372_v21 = vld [vmem:[%s3852_s1 + $0xa4] ss:$16 sps:$4 sm:$0xff]   ;;  %v2374_v22 = vld [vmem:[%s3852_s1 + $0xac] ss:$16 sps:$4 sm:$0xff]  }
  0x2e   :  { %332 = vmatprep.subr.bf16.mxu0 %v2354_v9  ;;  %445 = vmatprep.subr.bf16.mxu1 %v2356_v10  ;;  %v2376_v23 = vld [vmem:[%s3852_s1 + $0xa0] ss:$16 sps:$4 sm:$0xff]   ;;  %v2377_v24 = vld [vmem:[%s3852_s1 + $0xa8] ss:$16 sps:$4 sm:$0xff]   ;;  %v2378_v25 = vld [vmem:[%s3852_s1 + $0xc4] ss:$16 sps:$4 sm:$0xff]   ;;  %v100_v10 = vlaneseq }
  0x2f   :  { %v2380_v26 = vld [vmem:[%s3852_s1 + $0xcc] ss:$16 sps:$4 sm:$0xff]   ;;  %v2382_v27 = vld [vmem:[%s3852_s1 + $0xc0] ss:$16 sps:$4 sm:$0xff]   ;;  %v2383_v28 = vld [vmem:[%s3852_s1 + $0xc8] ss:$16 sps:$4 sm:$0xff]  }
  0x30   :  { %v2384_v29 = vld [vmem:[%s3852_s1 + $0xe4] ss:$16 sps:$4 sm:$0xff]   ;;  %v2386_v30 = vld [vmem:[%s3852_s1 + $0xec] ss:$16 sps:$4 sm:$0xff]   ;;  %v2388_v31 = vld [vmem:[%s3852_s1 + $0xe0] ss:$16 sps:$4 sm:$0xff]  }
  0x31   :  { %333 = vmatpush1.bf16.msra.mxu0 %v2358_v11  ;;  %446 = vmatpush1.bf16.msra.mxu1 %v2359_v12  ;;  %v2389_v32 = vld [vmem:[%s3852_s1 + $0xe8] ss:$16 sps:$4 sm:$0xff]   ;;  %v2957_v33 = vld [vmem:[%s3853_s2 + $0x4] ss:$16 sps:$4 sm:$0xff]   ;;  %v2962_v34 = vld [vmem:[%s3853_s2 + $0xc] ss:$16 sps:$4 sm:$0xff]  }
  0x32   :  { %334 = vmatprep.subr.bf16.mxu0 %v2360_v13  ;;  %447 = vmatprep.subr.bf16.mxu1 %v2362_v14  ;;  %v2390_v35 = vld [vmem:[%s3851_s0] sm:$0xff]   ;;  %v2982_v38 = vld [vmem:[%s3853_s2 + $0x8] ss:$16 sps:$4 sm:$0xff]   ;;  %v2987_v39 = vld [vmem:[%s3853_s2 + $0x2c] ss:$16 sps:$4 sm:$0xff]   ;;  %v101_v11 = vshrl.u32 %v100_v10, 7 }
  0x33   :  { %v2970_v36 = vld [vmem:[%s3853_s2] ss:$16 sps:$4 sm:$0xff]   ;;  %v2976_v37 = vld [vmem:[%s3853_s2 + $0x24] ss:$16 sps:$4 sm:$0xff]   ;;  %v3007_v42 = vld [vmem:[%s3853_s2 + $0x28] ss:$16 sps:$4 sm:$0xff]  }
  0x34   :  { %v2994_v40 = vld [vmem:[%s3853_s2 + $0x20] ss:$16 sps:$4 sm:$0xff]   ;;  %v3001_v41 = vld [vmem:[%s3853_s2 + $0x44] ss:$16 sps:$4 sm:$0xff]   ;;  %v3028_v46 = vld [vmem:[%s3853_s2 + $0x4c] ss:$16 sps:$4 sm:$0xff]  }
  0x35   :  { %335 = vmatpush1.bf16.msra.mxu0 %v2364_v15  ;;  %448 = vmatpush1.bf16.msra.mxu1 %v2365_v16  ;;  %v3017_v44 = vld [vmem:[%s3853_s2 + $0x40] ss:$16 sps:$4 sm:$0xff]   ;;  %v3022_v45 = vld [vmem:[%s3853_s2 + $0x64] ss:$16 sps:$4 sm:$0xff]   ;;  %v3034_v47 = vld [vmem:[%s3853_s2 + $0x48] ss:$16 sps:$4 sm:$0xff]  }
  0x36   :  { %336 = vmatprep.subr.bf16.mxu0 %v2366_v17  ;;  %449 = vmatprep.subr.bf16.mxu1 %v2368_v18  ;;  %v3039_v48 = vld [vmem:[%s3853_s2 + $0x6c] ss:$16 sps:$4 sm:$0xff]   ;;  %v3047_v49 = vld [vmem:[%s3853_s2 + $0x60] ss:$16 sps:$4 sm:$0xff]   ;;  %v3053_v50 = vld [vmem:[%s3853_s2 + $0x84] ss:$16 sps:$4 sm:$0xff]  }
  0x37   :  { %v3060_v51 = vld [vmem:[%s3853_s2 + $0x68] ss:$16 sps:$4 sm:$0xff]   ;;  %v2400_v52 = vld [vmem:[%s3851_s0 + $0x10] sm:$0xff]   ;;  %v3075_v54 = vld [vmem:[%s3853_s2 + $0x8c] ss:$16 sps:$4 sm:$0xff]   ;;  %v110_v12 = vsub.s32 2, %v101_v11 }
  0x38   :  { %v3069_v53 = vld [vmem:[%s3853_s2 + $0x80] ss:$16 sps:$4 sm:$0xff]   ;;  %v3081_v55 = vld [vmem:[%s3853_s2 + $0xa4] ss:$16 sps:$4 sm:$0xff]   ;;  %v3087_v56 = vld [vmem:[%s3853_s2 + $0x88] ss:$16 sps:$4 sm:$0xff]  }
  0x39   :  { %337 = vmatpush1.bf16.msra.mxu0 %v2370_v19  ;;  %450 = vmatpush1.bf16.msra.mxu1 %v2371_v20  ;;  %v3092_v57 = vld [vmem:[%s3853_s2 + $0xac] ss:$16 sps:$4 sm:$0xff]   ;;  %v3097_v58 = vld [vmem:[%s3853_s2 + $0xa0] ss:$16 sps:$4 sm:$0xff]   ;;  %v3104_v59 = vld [vmem:[%s3853_s2 + $0xc4] ss:$16 sps:$4 sm:$0xff]  }
  0x3a   :  { %338 = vmatprep.subr.bf16.mxu0 %v2372_v21  ;;  %451 = vmatprep.subr.bf16.mxu1 %v2374_v22  ;;  %v3109_v60 = vld [vmem:[%s3853_s2 + $0xa8] ss:$16 sps:$4 sm:$0xff]   ;;  %v3123_v62 = vld [vmem:[%s3853_s2 + $0xc0] ss:$16 sps:$4 sm:$0xff]   ;;  %v3128_v63 = vld [vmem:[%s3853_s2 + $0xcc] ss:$16 sps:$4 sm:$0xff]  }
  0x3b   :  { %v2407_v61 = vld [vmem:[%s3851_s0 + $0x18] sm:$0xff]   ;;  %v3135_v1 = vld [vmem:[%s3853_s2 + $0xe4] ss:$16 sps:$4 sm:$0xff]   ;;  %v3154_v4 = vld [vmem:[%s3853_s2 + $0xe0] ss:$16 sps:$4 sm:$0xff]   ;;  %v114_v13 = vsub.s32 3, %v101_v11 }
  0x3c   :  { %v3140_v2 = vld [vmem:[%s3853_s2 + $0xc8] ss:$16 sps:$4 sm:$0xff]   ;;  %v3145_v3 = vld [vmem:[%s3853_s2 + $0xec] ss:$16 sps:$4 sm:$0xff]   ;;  %v2414_v6 = vld [vmem:[%s3851_s0 + $0x20] sm:$0xff]   ;;  %v102_v14 = vsub.s32 0, %v101_v11 }
  0x3d   :  { %339 = vmatpush1.bf16.msra.mxu0 %v2376_v23  ;;  %452 = vmatpush1.bf16.msra.mxu1 %v2377_v24  ;;  %v3161_v5 = vld [vmem:[%s3853_s2 + $0xe8] ss:$16 sps:$4 sm:$0xff]   ;;  %v2428_v8 = vld [vmem:[%s3851_s0 + $0x30] sm:$0xff]   ;;  %v98_v15 = vld [vmem:[%s3854_s3] sm:$0xf]  ;;  %v106_v16 = vsub.s32 1, %v101_v11 }
  0x3e   :  { %340 = vmatprep.subr.bf16.mxu0 %v2378_v25  ;;  %453 = vmatprep.subr.bf16.mxu1 %v2380_v26  ;;  %v2421_v7 = vld [vmem:[%s3851_s0 + $0x28] sm:$0xff]   ;;  %v2436_v9 = vld [vmem:[%s3851_s0 + $0x38] sm:$0xff]   ;;  %v3227_v17 = vrot.slane %v98_v15, %v110_v12  ;;  %v3229_v18 = vrot.slane %v98_v15, %v114_v13  ;;  %v3231_v19 = vrot.slane %v98_v15, %v102_v14  ;;  %vm2796_vm0 = vmmov 0  }
  0x3f   :  { %v3233_v21 = vrot.slane %v98_v15, %v106_v16 }
  0x41   :  { %341 = vmatpush1.bf16.msra.mxu0 %v2382_v27  ;;  %454 = vmatpush1.bf16.msra.mxu1 %v2383_v28 }
  0x42   :  { %342 = vmatprep.subr.bf16.mxu0 %v2384_v29  ;;  %455 = vmatprep.subr.bf16.mxu1 %v2386_v30 }
  0x45   :  { %343 = vmatpush1.bf16.msra.mxu0 %v2388_v31  ;;  %456 = vmatpush1.bf16.msra.mxu1 %v2389_v32 }
  0x46   :  { %822 = vmatprep.subr.bf16.mxu0 %v2957_v33  ;;  %865 = vmatprep.subr.bf16.mxu1 %v2962_v34 }
  0x48   :  { %361 = vmatmul.mubr.bf16.vlgmr.msra.gmra.mrb[0].mxu0 %v2390_v35  ;;  %474 = vmatmul.mubr.bf16.vlgmr.msra.gmra.mrb[0].mxu1 %v2390_v35 }
  0x49   :  { %823 = vmatpush1.bf16.msra.mxu0 %v2970_v36  ;;  %370 = vmatprep.mubr.bf16.mxu0 %v3858_v0 }
  0x4a   :  { %483 = vmatprep.mubr.bf16.mxu1 %v3858_v0  ;;  %824 = vmatprep.subr.bf16.mxu0 %v2976_v37 }
  0x4b   :  { %866 = vmatpush1.bf16.msra.mxu1 %v2982_v38 }
  0x4c   :  { %867 = vmatprep.subr.bf16.mxu1 %v2987_v39 }
  0x4d   :  { %825 = vmatpush1.bf16.msra.mxu0 %v2994_v40 }
  0x4e   :  { %826 = vmatprep.subr.bf16.mxu0 %v3001_v41 }
  0x4f   :  { %868 = vmatpush1.bf16.msra.mxu1 %v3007_v42 }
  0x50   :  { %371 = vmatmul.mubr.bf16.gmra.mrb[4].mxu0 %v2394_v43  ;;  %484 = vmatmul.mubr.bf16.gmra.mrb[4].mxu1 %v2394_v43 }
  0x51   :  { %380 = vmatprep.mubr.bf16.mxu0 %v3858_v0  ;;  %493 = vmatprep.mubr.bf16.mxu1 %v3858_v0 }
  0x52   :  { %827 = vmatpush1.bf16.msra.mxu0 %v3017_v44  ;;  %869 = vmatprep.subr.bf16.mxu1 %v3028_v46 }
  0x53   :  { %828 = vmatprep.subr.bf16.mxu0 %v3022_v45  ;;  %870 = vmatpush1.bf16.msra.mxu1 %v3034_v47 }
  0x54   :  { %871 = vmatprep.subr.bf16.mxu1 %v3039_v48 }
  0x56   :  { %829 = vmatpush1.bf16.msra.mxu0 %v3047_v49 }
  0x57   :  { %830 = vmatprep.subr.bf16.mxu0 %v3053_v50  ;;  %872 = vmatpush1.bf16.msra.mxu1 %v3060_v51 }
  0x58   :  { %381 = vmatmul.mubr.bf16.gmra.mrb[8].mxu0 %v2400_v52  ;;  %494 = vmatmul.mubr.bf16.gmra.mrb[8].mxu1 %v2400_v52 }
  0x59   :  { %390 = vmatprep.mubr.bf16.mxu0 %v3858_v0  ;;  %503 = vmatprep.mubr.bf16.mxu1 %v3858_v0 }
  0x5a   :  { %831 = vmatpush1.bf16.msra.mxu0 %v3069_v53  ;;  %873 = vmatprep.subr.bf16.mxu1 %v3075_v54 }
  0x5b   :  { %832 = vmatprep.subr.bf16.mxu0 %v3081_v55  ;;  %874 = vmatpush1.bf16.msra.mxu1 %v3087_v56 }
  0x5c   :  { %875 = vmatprep.subr.bf16.mxu1 %v3092_v57 }
  0x5e   :  { %833 = vmatpush1.bf16.msra.mxu0 %v3097_v58 }
  0x5f   :  { %834 = vmatprep.subr.bf16.mxu0 %v3104_v59  ;;  %876 = vmatpush1.bf16.msra.mxu1 %v3109_v60 }
  0x60   :  { %391 = vmatmul.mubr.bf16.gmra.mrb[12].mxu0 %v2407_v61  ;;  %504 = vmatmul.mubr.bf16.gmra.mrb[12].mxu1 %v2407_v61 }
  0x61   :  { %400 = vmatprep.mubr.bf16.mxu0 %v3858_v0  ;;  %513 = vmatprep.mubr.bf16.mxu1 %v3858_v0 }
  0x62   :  { %835 = vmatpush1.bf16.msra.mxu0 %v3123_v62  ;;  %877 = vmatprep.subr.bf16.mxu1 %v3128_v63 }
  0x63   :  { %836 = vmatprep.subr.bf16.mxu0 %v3135_v1  ;;  %878 = vmatpush1.bf16.msra.mxu1 %v3140_v2 }
  0x64   :  { %879 = vmatprep.subr.bf16.mxu1 %v3145_v3 }
  0x66   :  { %837 = vmatpush1.bf16.msra.mxu0 %v3154_v4 }
  0x67   :  { %880 = vmatpush1.bf16.msra.mxu1 %v3161_v5  ;;  %978 = vmatprep.subr.bf16.mxu0 %v2957_v33 }
  0x68   :  { %401 = vmatmul.mubr.bf16.gmra.mrb[16].mxu0 %v2414_v6  ;;  %514 = vmatmul.mubr.bf16.gmra.mrb[16].mxu1 %v2414_v6 }
  0x69   :  { %410 = vmatprep.mubr.bf16.mxu0 %v3858_v0  ;;  %523 = vmatprep.mubr.bf16.mxu1 %v3858_v0 }
  0x6a   :  { %1021 = vmatprep.subr.bf16.mxu1 %v2962_v34 }
  0x70   :  { %411 = vmatmul.mubr.bf16.gmra.mrb[20].mxu0 %v2421_v7  ;;  %524 = vmatmul.mubr.bf16.gmra.mrb[20].mxu1 %v2421_v7 }
  0x71   :  { %420 = vmatprep.mubr.bf16.mxu0 %v3858_v0  ;;  %533 = vmatprep.mubr.bf16.mxu1 %v3858_v0 }
  0x78   :  { %421 = vmatmul.mubr.bf16.gmra.mrb[24].mxu0 %v2428_v8  ;;  %534 = vmatmul.mubr.bf16.gmra.mrb[24].mxu1 %v2428_v8 }
  0x79   :  { %430 = vmatprep.mubr.bf16.mxu0 %v3858_v0  ;;  %543 = vmatprep.mubr.bf16.mxu1 %v3858_v0 }
  0x80   :  { %431 = vmatmul.mubr.bf16.gmra.mrb[28].mxu0 %v2436_v9  ;;  %544 = vmatmul.mubr.bf16.gmra.mrb[28].mxu1 %v2436_v9 }
  0x81   :  { %854 = vmatprep.mubr.bf16.mxu0 %v3858_v0  ;;  %897 = vmatprep.mubr.bf16.mxu1 %v3858_v0 }
  0x88   :  { %855 = vmatmul.mubr.bf16.vlgmr.msra.gmra.mrb[32].mxu0 %v3858_v0  ;;  %898 = vmatmul.mubr.bf16.vlgmr.msra.gmra.mrb[32].mxu1 %v3858_v0 }
  0x89   :  { %979 = vmatpush1.bf16.msra.mxu0 %v2970_v36  ;;  %1022 = vmatpush1.bf16.msra.mxu1 %v2982_v38 }
  0x8a   :  { %980 = vmatprep.subr.bf16.mxu0 %v2976_v37  ;;  %1023 = vmatprep.subr.bf16.mxu1 %v2987_v39 }
  0x8b   :  { %1010 = vmatprep.mubr.bf16.mxu0 %v3858_v0  ;;  %1053 = vmatprep.mubr.bf16.mxu1 %v3858_v0 }
  0x8d   :  { %981 = vmatpush1.bf16.msra.mxu0 %v2994_v40  ;;  %1024 = vmatpush1.bf16.msra.mxu1 %v3007_v42 }
  0x8e   :  { %982 = vmatprep.subr.bf16.mxu0 %v3001_v41  ;;  %1025 = vmatprep.subr.bf16.mxu1 %v3028_v46 }
  0x91   :  { %983 = vmatpush1.bf16.msra.mxu0 %v3017_v44  ;;  %1026 = vmatpush1.bf16.msra.mxu1 %v3034_v47 }
  0x92   :  { %984 = vmatprep.subr.bf16.mxu0 %v3022_v45  ;;  %1027 = vmatprep.subr.bf16.mxu1 %v3039_v48 }
  0x95   :  { %985 = vmatpush1.bf16.msra.mxu0 %v3047_v49  ;;  %1028 = vmatpush1.bf16.msra.mxu1 %v3060_v51 }
  0x96   :  { %986 = vmatprep.subr.bf16.mxu0 %v3053_v50  ;;  %1029 = vmatprep.subr.bf16.mxu1 %v3075_v54 }
  0x99   :  { %987 = vmatpush1.bf16.msra.mxu0 %v3069_v53  ;;  %1030 = vmatpush1.bf16.msra.mxu1 %v3087_v56 }
  0x9a   :  { %988 = vmatprep.subr.bf16.mxu0 %v3081_v55  ;;  %1031 = vmatprep.subr.bf16.mxu1 %v3092_v57 }
  0x9d   :  { %989 = vmatpush1.bf16.msra.mxu0 %v3097_v58  ;;  %1032 = vmatpush1.bf16.msra.mxu1 %v3109_v60 }
  0x9e   :  { %990 = vmatprep.subr.bf16.mxu0 %v3104_v59  ;;  %1033 = vmatprep.subr.bf16.mxu1 %v3128_v63 }
  0xa1   :  { %991 = vmatpush1.bf16.msra.mxu0 %v3123_v62  ;;  %1034 = vmatpush1.bf16.msra.mxu1 %v3140_v2 }
  0xa2   :  { %992 = vmatprep.subr.bf16.mxu0 %v3135_v1  ;;  %1035 = vmatprep.subr.bf16.mxu1 %v3145_v3 }
  0xa5   :  { %993 = vmatpush1.bf16.msra.mxu0 %v3154_v4  ;;  %1036 = vmatpush1.bf16.msra.mxu1 %v3161_v5 }
  0xa6   :  { %1134 = vmatprep.subr.bf16.mxu0 %v2957_v33  ;;  %1177 = vmatprep.subr.bf16.mxu1 %v2962_v34 }
 0x11b   :  { %v362_v20 = vpop.f32.mrb[0].mxu0  ;;  %v475_v22 = vpop.f32.mrb[0].mxu1 }
 0x11c   :  { %v364_v23 = vpop.f32.mrb[1].mxu0  ;;  %v476_v24 = vadd.f32 %v475_v22, %v3227_v17  ;;  %v477_v25 = vpop.f32.mrb[1].mxu1  ;;  %v363_v29 = vadd.f32 %v362_v20, %v3231_v19 }
 0x11d   :  { %v366_v26 = vpop.f32.mrb[2].mxu0  ;;  %v478_v27 = vadd.f32 %v477_v25, %v3229_v18  ;;  %v479_v28 = vpop.f32.mrb[2].mxu1  ;;  %v365_v43 = vadd.f32 %v364_v23, %v3233_v21 }
 0x11e   :  { %v367_v30 = vadd.f32 %v366_v26, %v3231_v19  ;;  %v368_v31 = vpop.f32.mrb[3].mxu0  ;;  %v480_v32 = vadd.f32 %v479_v28, %v3227_v17  ;;  %v481_v35 = vpop.f32.mrb[3].mxu1 }
 0x11f   :  { %v369_v52 = vadd.f32 %v368_v31, %v3233_v21  ;;  %v482_v61 = vadd.f32 %v481_v35, %v3229_v18 }
 0x120   :  { %v3243_v6 = vpack.c.bf16 %v367_v30, %v363_v29  ;;  %v3245_v7 = vpack.c.bf16 %v480_v32, %v476_v24 }
 0x121   :  { %v3247_v8 = vpack.c.bf16 %v369_v52, %v365_v43  ;;  %v3249_v9 = vpack.c.bf16 %v482_v61, %v478_v27 }
 0x123   :  { %v372_v10 = vpop.f32.mrb[4].mxu0  ;;  %v485_v11 = vpop.f32.mrb[4].mxu1 }
 0x124   :  { %v373_v12 = vadd.f32 %v372_v10, %v3231_v19  ;;  %v374_v13 = vpop.f32.mrb[5].mxu0  ;;  %v486_v14 = vadd.f32 %v485_v11, %v3227_v17  ;;  %v487_v15 = vpop.f32.mrb[5].mxu1 }
 0x125   :  { %v375_v16 = vadd.f32 %v374_v13, %v3233_v21  ;;  %v376_v20 = vpop.f32.mrb[6].mxu0  ;;  %v488_v22 = vadd.f32 %v487_v15, %v3229_v18  ;;  %v489_v23 = vpop.f32.mrb[6].mxu1 }
 0x126   :  { %v377_v24 = vadd.f32 %v376_v20, %v3231_v19  ;;  %v378_v25 = vpop.f32.mrb[7].mxu0  ;;  %v490_v26 = vadd.f32 %v489_v23, %v3227_v17  ;;  %v491_v27 = vpop.f32.mrb[7].mxu1 }
 0x127   :  { %v379_v28 = vadd.f32 %v378_v25, %v3233_v21  ;;  %v492_v29 = vadd.f32 %v491_v27, %v3229_v18 }
 0x128   :  { %v3259_v30 = vpack.c.bf16 %v377_v24, %v373_v12  ;;  %v3261_v31 = vpack.c.bf16 %v490_v26, %v486_v14 }
 0x129   :  { %v3263_v32 = vpack.c.bf16 %v379_v28, %v375_v16  ;;  %v3265_v35 = vpack.c.bf16 %v492_v29, %v488_v22 }
 0x12b   :  { %3882 = vst [vmem:[#allocation9_spill] sm:$0xff] %v3265_v35  ;;  %v382_v43 = vpop.f32.mrb[8].mxu0  ;;  %v495_v52 = vpop.f32.mrb[8].mxu1 }
 0x12c   :  { %v383_v61 = vadd.f32 %v382_v43, %v3231_v19  ;;  %v384_v10 = vpop.f32.mrb[9].mxu0  ;;  %v496_v11 = vadd.f32 %v495_v52, %v3227_v17  ;;  %v497_v13 = vpop.f32.mrb[9].mxu1 }
 0x12d   :  { %v385_v15 = vadd.f32 %v384_v10, %v3233_v21  ;;  %v386_v20 = vpop.f32.mrb[10].mxu0  ;;  %v498_v12 = vadd.f32 %v497_v13, %v3229_v18  ;;  %v499_v23 = vpop.f32.mrb[10].mxu1 }
 0x12e   :  { %v387_v14 = vadd.f32 %v386_v20, %v3231_v19  ;;  %v388_v16 = vpop.f32.mrb[11].mxu0  ;;  %v500_v22 = vadd.f32 %v499_v23, %v3227_v17  ;;  %v501_v24 = vpop.f32.mrb[11].mxu1 }
 0x12f   :  { %v389_v25 = vadd.f32 %v388_v16, %v3233_v21  ;;  %v502_v26 = vadd.f32 %v501_v24, %v3229_v18 }
 0x130   :  { %v3275_v27 = vpack.c.bf16 %v387_v14, %v383_v61  ;;  %v3277_v28 = vpack.c.bf16 %v500_v22, %v496_v11 }
 0x131   :  { %v3279_v29 = vpack.c.bf16 %v389_v25, %v385_v15  ;;  %v3281_v43 = vpack.c.bf16 %v502_v26, %v498_v12 }
 0x132   :  { %3883 = vst [vmem:[#allocation10_spill] sm:$0xff] %v3275_v27  ;;  %3884 = vst [vmem:[#allocation11_spill] sm:$0xff] %v3277_v28 }
 0x133   :  { %3885 = vst [vmem:[#allocation12_spill] sm:$0xff] %v3279_v29  ;;  %3886 = vst [vmem:[#allocation13_spill] sm:$0xff] %v3281_v43  ;;  %v392_v52 = vpop.f32.mrb[12].mxu0  ;;  %v505_v10 = vpop.f32.mrb[12].mxu1 }
 0x134   :  { %v393_v13 = vadd.f32 %v392_v52, %v3231_v19  ;;  %v394_v20 = vpop.f32.mrb[13].mxu0  ;;  %v506_v23 = vadd.f32 %v505_v10, %v3227_v17  ;;  %v507_v0 = vpop.f32.mrb[13].mxu1 }
 0x135   :  { %v395_v16 = vadd.f32 %v394_v20, %v3233_v21  ;;  %v396_v35 = vpop.f32.mrb[14].mxu0  ;;  %v508_v61 = vadd.f32 %v507_v0, %v3229_v18  ;;  %v509_v14 = vpop.f32.mrb[14].mxu1 }
 0x136   :  { %v397_v11 = vadd.f32 %v396_v35, %v3231_v19  ;;  %v398_v15 = vpop.f32.mrb[15].mxu0  ;;  %v510_v12 = vadd.f32 %v509_v14, %v3227_v17  ;;  %v511_v22 = vpop.f32.mrb[15].mxu1 }
 0x137   :  { %v399_v24 = vadd.f32 %v398_v15, %v3233_v21  ;;  %v512_v25 = vadd.f32 %v511_v22, %v3229_v18 }
 0x138   :  { %v3291_v26 = vpack.c.bf16 %v397_v11, %v393_v13  ;;  %v3293_v52 = vpack.c.bf16 %v510_v12, %v506_v23 }
 0x139   :  { %v3295_v10 = vpack.c.bf16 %v399_v24, %v395_v16  ;;  %v3297_v20 = vpack.c.bf16 %v512_v25, %v508_v61 }
 0x13a   :  { %3887 = vst [vmem:[#allocation14_spill] sm:$0xff] %v3291_v26  ;;  %3888 = vst [vmem:[#allocation15_spill] sm:$0xff] %v3293_v52 }
 0x13b   :  { %3889 = vst [vmem:[#allocation16_spill] sm:$0xff] %v3295_v10  ;;  %3890 = vst [vmem:[#allocation17_spill] sm:$0xff] %v3297_v20  ;;  %v402_v0 = vpop.f32.mrb[16].mxu0  ;;  %v515_v43 = vpop.f32.mrb[16].mxu1 }
 0x13c   :  { %v403_v35 = vadd.f32 %v402_v0, %v3231_v19  ;;  %v404_v29 = vpop.f32.mrb[17].mxu0  ;;  %v516_v14 = vadd.f32 %v515_v43, %v3227_v17  ;;  %v517_v28 = vpop.f32.mrb[17].mxu1 }
 0x13d   :  { %v405_v15 = vadd.f32 %v404_v29, %v3233_v21  ;;  %v406_v27 = vpop.f32.mrb[18].mxu0  ;;  %v518_v13 = vadd.f32 %v517_v28, %v3229_v18  ;;  %v519_v11 = vpop.f32.mrb[18].mxu1 }
 0x13e   :  { %v407_v23 = vadd.f32 %v406_v27, %v3231_v19  ;;  %v408_v16 = vpop.f32.mrb[19].mxu0  ;;  %v520_v61 = vadd.f32 %v519_v11, %v3227_v17  ;;  %v521_v12 = vpop.f32.mrb[19].mxu1 }
 0x13f   :  { %v409_v22 = vadd.f32 %v408_v16, %v3233_v21  ;;  %v522_v24 = vadd.f32 %v521_v12, %v3229_v18 }
 0x140   :  { %v3307_v25 = vpack.c.bf16 %v407_v23, %v403_v35  ;;  %v3309_v43 = vpack.c.bf16 %v520_v61, %v516_v14 }
 0x141   :  { %v3311_v0 = vpack.c.bf16 %v409_v22, %v405_v15  ;;  %v3313_v29 = vpack.c.bf16 %v522_v24, %v518_v13 }
 0x142   :  { %3891 = vst [vmem:[#allocation18_spill] sm:$0xff] %v3307_v25  ;;  %3892 = vst [vmem:[#allocation19_spill] sm:$0xff] %v3309_v43 }
 0x143   :  { %3893 = vst [vmem:[#allocation20_spill] sm:$0xff] %v3311_v0  ;;  %3894 = vst [vmem:[#allocation21_spill] sm:$0xff] %v3313_v29  ;;  %v412_v28 = vpop.f32.mrb[20].mxu0  ;;  %v525_v20 = vpop.f32.mrb[20].mxu1 }
 0x144   :  { %v413_v27 = vadd.f32 %v412_v28, %v3231_v19  ;;  %v414_v10 = vpop.f32.mrb[21].mxu0  ;;  %v526_v11 = vadd.f32 %v525_v20, %v3227_v17  ;;  %v527_v52 = vpop.f32.mrb[21].mxu1 }
 0x145   :  { %v415_v16 = vadd.f32 %v414_v10, %v3233_v21  ;;  %v416_v26 = vpop.f32.mrb[22].mxu0  ;;  %v528_v35 = vadd.f32 %v527_v52, %v3229_v18  ;;  %v529_v23 = vpop.f32.mrb[22].mxu1 }
 0x146   :  { %v417_v14 = vadd.f32 %v416_v26, %v3231_v19  ;;  %v418_v15 = vpop.f32.mrb[23].mxu0  ;;  %v530_v13 = vadd.f32 %v529_v23, %v3227_v17  ;;  %v531_v61 = vpop.f32.mrb[23].mxu1 }
 0x147   :  { %v419_v12 = vadd.f32 %v418_v15, %v3233_v21  ;;  %v532_v22 = vadd.f32 %v531_v61, %v3229_v18 }
 0x148   :  { %v3323_v24 = vpack.c.bf16 %v417_v14, %v413_v27  ;;  %v3325_v20 = vpack.c.bf16 %v530_v13, %v526_v11 }
 0x149   :  { %v3327_v28 = vpack.c.bf16 %v419_v12, %v415_v16  ;;  %v3329_v10 = vpack.c.bf16 %v532_v22, %v528_v35 }
 0x14a   :  { %3895 = vst [vmem:[#allocation22_spill] sm:$0xff] %v3323_v24  ;;  %3896 = vst [vmem:[#allocation23_spill] sm:$0xff] %v3325_v20 }
 0x14b   :  { %3897 = vst [vmem:[#allocation24_spill] sm:$0xff] %v3327_v28  ;;  %3898 = vst [vmem:[#allocation25_spill] sm:$0xff] %v3329_v10  ;;  %v422_v52 = vpop.f32.mrb[24].mxu0  ;;  %v535_v29 = vpop.f32.mrb[24].mxu1 }
 0x14c   :  { %v423_v26 = vadd.f32 %v422_v52, %v3231_v19  ;;  %v424_v0 = vpop.f32.mrb[25].mxu0  ;;  %v536_v23 = vadd.f32 %v535_v29, %v3227_v17  ;;  %v537_v43 = vpop.f32.mrb[25].mxu1 }
 0x14d   :  { %v425_v15 = vadd.f32 %v424_v0, %v3233_v21  ;;  %v426_v25 = vpop.f32.mrb[26].mxu0  ;;  %v538_v27 = vadd.f32 %v537_v43, %v3229_v18  ;;  %v539_v14 = vpop.f32.mrb[26].mxu1 }
 0x14e   :  { %v427_v11 = vadd.f32 %v426_v25, %v3231_v19  ;;  %v428_v16 = vpop.f32.mrb[27].mxu0  ;;  %v540_v35 = vadd.f32 %v539_v14, %v3227_v17  ;;  %v541_v13 = vpop.f32.mrb[27].mxu1 }
 0x14f   :  { %v429_v61 = vadd.f32 %v428_v16, %v3233_v21  ;;  %v542_v12 = vadd.f32 %v541_v13, %v3229_v18 }
 0x150   :  { %v3339_v22 = vpack.c.bf16 %v427_v11, %v423_v26  ;;  %v3341_v29 = vpack.c.bf16 %v540_v35, %v536_v23 }
 0x151   :  { %v3343_v52 = vpack.c.bf16 %v429_v61, %v425_v15  ;;  %v3345_v0 = vpack.c.bf16 %v542_v12, %v538_v27 }
 0x153   :  { %3899 = vst [vmem:[#allocation26_spill] sm:$0xff] %v3345_v0  ;;  %v432_v43 = vpop.f32.mrb[28].mxu0  ;;  %v545_v10 = vpop.f32.mrb[28].mxu1 }
 0x154   :  { %v433_v25 = vadd.f32 %v432_v43, %v3231_v19  ;;  %v434_v28 = vpop.f32.mrb[29].mxu0  ;;  %v546_v14 = vadd.f32 %v545_v10, %v3227_v17  ;;  %v547_v20 = vpop.f32.mrb[29].mxu1 }
 0x155   :  { %v435_v16 = vadd.f32 %v434_v28, %v3233_v21  ;;  %v436_v24 = vpop.f32.mrb[30].mxu0  ;;  %v548_v26 = vadd.f32 %v547_v20, %v3229_v18  ;;  %v549_v11 = vpop.f32.mrb[30].mxu1  ;;  %v622_v20 = vunpack.c.l.bf16 %v3243_v6 }
 0x156   :  { %v437_v23 = vadd.f32 %v436_v24, %v3231_v19  ;;  %v438_v15 = vpop.f32.mrb[31].mxu0  ;;  %v550_v27 = vadd.f32 %v549_v11, %v3227_v17  ;;  %v551_v35 = vpop.f32.mrb[31].mxu1  ;;  %v624_v19 = vunpack.c.l.bf16 %v3245_v7  ;;  %v623_v17 = vunpack.c.l.bf16 %v3247_v8 }
 0x157   :  { %v439_v13 = vadd.f32 %v438_v15, %v3233_v21  ;;  %v552_v61 = vadd.f32 %v551_v35, %v3229_v18  ;;  %v625_v21 = vunpack.c.l.bf16 %v3249_v9 }
 0x158   :  { %v3355_v12 = vpack.c.bf16 %v437_v23, %v433_v25  ;;  %v3357_v10 = vpack.c.bf16 %v550_v27, %v546_v14  ;;  %v626_v14 = vunpack.c.h.bf16 %v3243_v6 }
 0x159   :  { %v3359_v43 = vpack.c.bf16 %v439_v13, %v435_v16  ;;  %v3361_v28 = vpack.c.bf16 %v552_v61, %v548_v26  ;;  %v628_v16 = vunpack.c.h.bf16 %v3245_v7  ;;  %v627_v13 = vunpack.c.h.bf16 %v3247_v8 }
 0x15a   :  { %3900 = vst [vmem:[#allocation27_spill] sm:$0xff] %v3355_v12  ;;  %3901 = vst [vmem:[#allocation28_spill] sm:$0xff] %v3357_v10  ;;  %v629_v61 = vunpack.c.h.bf16 %v3249_v9 }
 0x15b   :  { %3902 = vst [vmem:[#allocation29_spill] sm:$0xff] %v3359_v43  ;;  %3903 = vst [vmem:[#allocation30_spill] sm:$0xff] %v3361_v28  ;;  %v856_v24 = vpop.f32.mrb[32].mxu0  ;;  %v899_v0 = vpop.f32.mrb[32].mxu1 }
 0x15c   :  { %v908_v11 = vadd.f32 %v856_v24, %v622_v20  ;;  %v910_v18 = vadd.f32 %v899_v0, %v624_v19  ;;  %v858_v25 = vpop.f32.mrb[33].mxu0  ;;  %v901_v23 = vpop.f32.mrb[33].mxu1 }
 0x15d   :  { %v909_v26 = vadd.f32 %v858_v25, %v623_v17  ;;  %v911_v15 = vadd.f32 %v901_v23, %v625_v21  ;;  %v860_v27 = vpop.f32.mrb[34].mxu0  ;;  %v903_v35 = vpop.f32.mrb[34].mxu1 }
 0x15e   :  { %v2249_v28 = vmul.f32 -1.442695, %v908_v11  ;;  %v912_v43 = vadd.f32 %v860_v27, %v626_v14  ;;  %v914_v10 = vadd.f32 %v903_v35, %v628_v16  ;;  %v862_v12 = vpop.f32.mrb[35].mxu0  ;;  %v905_v20 = vpop.f32.mrb[35].mxu1 }
 0x15f   :  { %v2251_v0 = vmul.f32 -1.442695, %v909_v26  ;;  %v913_v19 = vadd.f32 %v862_v12, %v627_v13  ;;  %v915_v24 = vadd.f32 %v905_v20, %v629_v61  ;;  %v2253_v17 = vmul.f32 -1.442695, %v911_v15 }
 0x160   :  { %2454 = vpow2.f32 %v2249_v28  ;;  %v2250_v6 = vmul.f32 -1.442695, %v912_v43 }
 0x161   :  { %2456 = vpow2.f32 %v2251_v0  ;;  %v2252_v7 = vmul.f32 -1.442695, %v913_v19  ;;  %v2254_v9 = vmul.f32 -1.442695, %v915_v24 }
 0x162   :  { %2458 = vpow2.f32 %v2250_v6 }
 0x163   :  { %2460 = vpow2.f32 %v2252_v7 }
 0x164   :  { %2462 = vtanh.f32 %v910_v18 }
 0x165   :  { %2464 = vpow2.f32 %v2253_v17 }
 0x166   :  { %2466 = vtanh.f32 %v914_v10 }
 0x16a   :  { %v2455_v21 = vpop.eup %2454 }
 0x16b   :  { %v2457_v8 = vpop.eup %2456  ;;  %v922_v25 = vadd.f32 1.0, %v2455_v21 }
 0x16c   :  { %v934_v11 = vadd.f32 1.0, %v2457_v8  ;;  %v2459_v23 = vpop.eup %2458 }
 0x16d   :  { %2468 = vrcp.f32 %v922_v25  ;;  %v923_v12 = vadd.f32 1.0, %v2459_v23  ;;  %v2461_v14 = vpop.eup %2460 }
 0x16e   :  { %2470 = vrcp.f32 %v934_v11  ;;  %v935_v43 = vadd.f32 1.0, %v2461_v14  ;;  %v2463_v28 = vpop.eup %2462 }
 0x16f   :  { %2472 = vpow2.f32 %v2254_v9  ;;  %v2465_v16 = vpop.eup %2464 }
 0x170   :  { %2474 = vrcp.f32 %v923_v12  ;;  %v2467_v26 = vpop.eup %2466  ;;  %v948_v20 = vadd.f32 1.0, %v2465_v16  ;;  %v3904_v12 = vmov 0   ;;  %v974_v16 = vunpack.c.h.bf16 %v3263_v32 }
 0x171   :  { %2476 = vrcp.f32 %v935_v43 }
 0x172   :  { %2478 = vrcp.f32 %v948_v20 }
 0x177   :  { %v2469_v15 = vpop.eup %2468 }
 0x178   :  { %v2471_v18 = vpop.eup %2470  ;;  %v956_v27 = vmul.f32 %v2469_v15, %v2463_v28 }
 0x179   :  { %v2473_v35 = vpop.eup %2472  ;;  %v954_v13 = vmul.f32 0.0, %v2471_v18 }
 0x17a   :  { %v2475_v61 = vpop.eup %2474  ;;  %v949_v24 = vadd.f32 1.0, %v2473_v35 }
 0x17b   :  { %v3371_v10 = vadd.f32 %v956_v27, %v954_v13  ;;  %v957_v0 = vmul.f32 %v2475_v61, %v2467_v26  ;;  %v2477_v19 = vpop.eup %2476 }
 0x17c   :  { %v955_v6 = vmul.f32 0.0, %v2477_v19  ;;  %v2479_v17 = vpop.eup %2478 }
 0x17d   :  { %2480 = vtanh.f32 %v3371_v10 }
 0x17e   :  { %v3374_v7 = vadd.f32 %v957_v0, %v955_v6  ;;  %2482 = vrcp.f32 %v949_v24 }
 0x180   :  { %2484 = vtanh.f32 %v3374_v7 }
 0x187   :  { %v2481_v21 = vpop.eup %2480 }
 0x188   :  { %v2483_v8 = vpop.eup %2482  ;;  %v962_v9 = vmul.f32 %v2481_v21, %v2479_v17 }
 0x18a   :  { %v2485_v25 = vpop.eup %2484 }
 0x18b   :  { %v963_v11 = vmul.f32 %v2485_v25, %v2483_v8 }
 0x18d   :  { %v977_v23 = vpack.c.bf16 %v963_v11, %v962_v9 }
 0x18f   :  { %1011 = vmatmul.mubr.bf16.vlgmr.msra.gmra.mrb[36].mxu0 %v977_v23  ;;  %1054 = vmatmul.mubr.bf16.vlgmr.msra.gmra.mrb[36].mxu1 %v977_v23 }
 0x190   :  { %1135 = vmatpush1.bf16.msra.mxu0 %v2970_v36  ;;  %1178 = vmatpush1.bf16.msra.mxu1 %v2982_v38  ;;  %v969_v36 = vunpack.c.l.bf16 %v3259_v30 }
 0x191   :  { %1136 = vmatprep.subr.bf16.mxu0 %v2976_v37  ;;  %1179 = vmatprep.subr.bf16.mxu1 %v2987_v39  ;;  %v971_v37 = vunpack.c.l.bf16 %v3261_v31 }
 0x192   :  { %1166 = vmatprep.mubr.bf16.mxu0 %v3904_v12  ;;  %1209 = vmatprep.mubr.bf16.mxu1 %v3904_v12 }
 0x194   :  { %1137 = vmatpush1.bf16.msra.mxu0 %v2994_v40  ;;  %1180 = vmatpush1.bf16.msra.mxu1 %v3007_v42  ;;  %v970_v40 = vunpack.c.l.bf16 %v3263_v32 }
 0x195   :  { %1138 = vmatprep.subr.bf16.mxu0 %v3001_v41  ;;  %1181 = vmatprep.subr.bf16.mxu1 %v3028_v46  ;;  %v3905_v41 = vld [vmem:[#allocation9_spill] sm:$0xff] }
 0x196   :  { %v972_v42 = vunpack.c.l.bf16 %v3905_v41  ;;  %v976_v26 = vunpack.c.h.bf16 %v3905_v41 }
 0x198   :  { %1139 = vmatpush1.bf16.msra.mxu0 %v3017_v44  ;;  %1182 = vmatpush1.bf16.msra.mxu1 %v3034_v47 }
 0x199   :  { %1140 = vmatprep.subr.bf16.mxu0 %v3022_v45  ;;  %1183 = vmatprep.subr.bf16.mxu1 %v3039_v48  ;;  %v973_v48 = vunpack.c.h.bf16 %v3259_v30 }
 0x19c   :  { %1141 = vmatpush1.bf16.msra.mxu0 %v3047_v49  ;;  %1184 = vmatpush1.bf16.msra.mxu1 %v3060_v51 }
 0x19d   :  { %1142 = vmatprep.subr.bf16.mxu0 %v3053_v50  ;;  %1185 = vmatprep.subr.bf16.mxu1 %v3075_v54 }
 0x1a0   :  { %1143 = vmatpush1.bf16.msra.mxu0 %v3069_v53  ;;  %1186 = vmatpush1.bf16.msra.mxu1 %v3087_v56 }
 0x1a1   :  { %1144 = vmatprep.subr.bf16.mxu0 %v3081_v55  ;;  %1187 = vmatprep.subr.bf16.mxu1 %v3092_v57 }
 0x1a4   :  { %1145 = vmatpush1.bf16.msra.mxu0 %v3097_v58  ;;  %1188 = vmatpush1.bf16.msra.mxu1 %v3109_v60 }
 0x1a5   :  { %1146 = vmatprep.subr.bf16.mxu0 %v3104_v59  ;;  %1189 = vmatprep.subr.bf16.mxu1 %v3128_v63 }
 0x1a8   :  { %1147 = vmatpush1.bf16.msra.mxu0 %v3123_v62  ;;  %1190 = vmatpush1.bf16.msra.mxu1 %v3140_v2 }
 0x1a9   :  { %1148 = vmatprep.subr.bf16.mxu0 %v3135_v1  ;;  %1191 = vmatprep.subr.bf16.mxu1 %v3145_v3 }
 0x1ac   :  { %1149 = vmatpush1.bf16.msra.mxu0 %v3154_v4  ;;  %1192 = vmatpush1.bf16.msra.mxu1 %v3161_v5 }
 0x1ad   :  { %1290 = vmatprep.subr.bf16.mxu0 %v2957_v33  ;;  %1333 = vmatprep.subr.bf16.mxu1 %v2962_v34  ;;  %v975_v33 = vunpack.c.h.bf16 %v3261_v31 }
 0x262   :  { %v1012_v38 = vpop.f32.mrb[36].mxu0  ;;  %v1055_v39 = vpop.f32.mrb[36].mxu1 }
 0x263   :  { %v1064_v44 = vadd.f32 %v1012_v38, %v969_v36  ;;  %v1066_v45 = vadd.f32 %v1055_v39, %v971_v37  ;;  %v1014_v46 = vpop.f32.mrb[37].mxu0  ;;  %v1057_v47 = vpop.f32.mrb[37].mxu1 }
 0x264   :  { %v1065_v14 = vadd.f32 %v1014_v46, %v970_v40  ;;  %v1067_v34 = vadd.f32 %v1057_v47, %v972_v42  ;;  %v1016_v43 = vpop.f32.mrb[38].mxu0  ;;  %v1059_v28 = vpop.f32.mrb[38].mxu1 }
 0x265   :  { %v2255_v15 = vmul.f32 -1.442695, %v1064_v44  ;;  %v1068_v18 = vadd.f32 %v1016_v43, %v973_v48  ;;  %v1070_v27 = vadd.f32 %v1059_v28, %v975_v33  ;;  %v1018_v35 = vpop.f32.mrb[39].mxu0  ;;  %v1061_v13 = vpop.f32.mrb[39].mxu1 }
 0x266   :  { %v2257_v61 = vmul.f32 -1.442695, %v1065_v14  ;;  %v1069_v20 = vadd.f32 %v1018_v35, %v974_v16  ;;  %v1071_v0 = vadd.f32 %v1061_v13, %v976_v26  ;;  %v2259_v19 = vmul.f32 -1.442695, %v1067_v34  ;;  %v3442_v35 = vld [vmem:[%s3853_s2 + $0x24] ss:$16 sps:$4 sm:$0xff]  }
 0x267   :  { %2486 = vpow2.f32 %v2255_v15  ;;  %v2256_v30 = vmul.f32 -1.442695, %v1068_v18  ;;  %v3448_v13 = vld [vmem:[%s3853_s2 + $0x2c] ss:$16 sps:$4 sm:$0xff]  }
 0x268   :  { %2488 = vpow2.f32 %v2257_v61  ;;  %v2258_v31 = vmul.f32 -1.442695, %v1069_v20  ;;  %v2260_v17 = vmul.f32 -1.442695, %v1071_v0  ;;  %v3456_v61 = vld [vmem:[%s3853_s2 + $0x20] ss:$16 sps:$4 sm:$0xff]  }
 0x269   :  { %2490 = vpow2.f32 %v2256_v30  ;;  %v3462_v20 = vld [vmem:[%s3853_s2 + $0x28] ss:$16 sps:$4 sm:$0xff]   ;;  %v3468_v0 = vld [vmem:[%s3853_s2 + $0x44] ss:$16 sps:$4 sm:$0xff]   ;;  %v3474_v30 = vld [vmem:[%s3853_s2 + $0x4c] ss:$16 sps:$4 sm:$0xff]  }
 0x26a   :  { %2492 = vpow2.f32 %v2258_v31  ;;  %v3480_v31 = vld [vmem:[%s3853_s2 + $0x40] ss:$16 sps:$4 sm:$0xff]  }
 0x26b   :  { %2494 = vtanh.f32 %v1066_v45 }
 0x26c   :  { %2496 = vpow2.f32 %v2259_v19  ;;  %v3486_v19 = vld [vmem:[%s3853_s2 + $0x48] ss:$16 sps:$4 sm:$0xff]  }
 0x26d   :  { %2498 = vtanh.f32 %v1070_v27  ;;  %v3436_v27 = vld [vmem:[%s3853_s2 + $0x8] ss:$16 sps:$4 sm:$0xff]  }
 0x271   :  { %v2487_v24 = vpop.eup %2486 }
 0x272   :  { %v2489_v32 = vpop.eup %2488  ;;  %v1078_v6 = vadd.f32 1.0, %v2487_v24  ;;  %v3492_v24 = vld [vmem:[%s3853_s2 + $0x64] ss:$16 sps:$4 sm:$0xff]  }
 0x273   :  { %v1090_v21 = vadd.f32 1.0, %v2489_v32  ;;  %v2491_v8 = vpop.eup %2490  ;;  %v3498_v32 = vld [vmem:[%s3853_s2 + $0x6c] ss:$16 sps:$4 sm:$0xff]  }
 0x274   :  { %2500 = vrcp.f32 %v1078_v6  ;;  %v1079_v25 = vadd.f32 1.0, %v2491_v8  ;;  %v2493_v9 = vpop.eup %2492 }
 0x275   :  { %2502 = vrcp.f32 %v1090_v21  ;;  %v1091_v11 = vadd.f32 1.0, %v2493_v9  ;;  %v2495_v23 = vpop.eup %2494 }
 0x276   :  { %2504 = vpow2.f32 %v2260_v17  ;;  %v2497_v36 = vpop.eup %2496 }
 0x277   :  { %2506 = vrcp.f32 %v1079_v25  ;;  %v2499_v37 = vpop.eup %2498  ;;  %v1104_v45 = vadd.f32 1.0, %v2497_v36 }
 0x278   :  { %2508 = vrcp.f32 %v1091_v11 }
 0x279   :  { %2510 = vrcp.f32 %v1104_v45 }
 0x27e   :  { %v2501_v38 = vpop.eup %2500 }
 0x27f   :  { %v2503_v39 = vpop.eup %2502  ;;  %v1112_v40 = vmul.f32 %v2501_v38, %v2495_v23 }
 0x280   :  { %v2505_v41 = vpop.eup %2504  ;;  %v1110_v42 = vmul.f32 %v2503_v39, %v3371_v10 }
 0x281   :  { %v2507_v44 = vpop.eup %2506  ;;  %v1105_v33 = vadd.f32 1.0, %v2505_v41 }
 0x282   :  { %v3420_v46 = vadd.f32 %v1112_v40, %v1110_v42  ;;  %v1113_v47 = vmul.f32 %v2507_v44, %v2499_v37  ;;  %v2509_v48 = vpop.eup %2508 }
 0x283   :  { %v1111_v14 = vmul.f32 %v2509_v48, %v3374_v7  ;;  %v2511_v43 = vpop.eup %2510  ;;  %v3430_v7 = vld [vmem:[%s3853_s2] ss:$16 sps:$4 sm:$0xff]  }
 0x284   :  { %2512 = vtanh.f32 %v3420_v46 }
 0x285   :  { %v3424_v34 = vadd.f32 %v1113_v47, %v1111_v14  ;;  %2514 = vrcp.f32 %v1105_v33 }
 0x287   :  { %2516 = vtanh.f32 %v3424_v34 }
 0x28e   :  { %v2513_v28 = vpop.eup %2512 }
 0x28f   :  { %v2515_v10 = vpop.eup %2514  ;;  %v1118_v26 = vmul.f32 %v2513_v28, %v2511_v43 }
 0x291   :  { %v2517_v16 = vpop.eup %2516 }
 0x292   :  { %v1119_v15 = vmul.f32 %v2517_v16, %v2515_v10 }
 0x294   :  { %v1133_v18 = vpack.c.bf16 %v1119_v15, %v1118_v26 }
 0x296   :  { %1167 = vmatmul.mubr.bf16.vlgmr.msra.gmra.mrb[40].mxu0 %v1133_v18  ;;  %1210 = vmatmul.mubr.bf16.vlgmr.msra.gmra.mrb[40].mxu1 %v1133_v18 }
 0x297   :  { %1291 = vmatpush1.bf16.msra.mxu0 %v3430_v7  ;;  %1334 = vmatpush1.bf16.msra.mxu1 %v3436_v27 }
 0x298   :  { %1292 = vmatprep.subr.bf16.mxu0 %v3442_v35  ;;  %1335 = vmatprep.subr.bf16.mxu1 %v3448_v13 }
 0x299   :  { %1322 = vmatprep.mubr.bf16.mxu0 %v3904_v12  ;;  %1365 = vmatprep.mubr.bf16.mxu1 %v3904_v12 }
 0x29b   :  { %1293 = vmatpush1.bf16.msra.mxu0 %v3456_v61  ;;  %1336 = vmatpush1.bf16.msra.mxu1 %v3462_v20 }
 0x29c   :  { %1294 = vmatprep.subr.bf16.mxu0 %v3468_v0  ;;  %1337 = vmatprep.subr.bf16.mxu1 %v3474_v30 }
 0x29f   :  { %1295 = vmatpush1.bf16.msra.mxu0 %v3480_v31  ;;  %1338 = vmatpush1.bf16.msra.mxu1 %v3486_v19 }
 0x2a0   :  { %1296 = vmatprep.subr.bf16.mxu0 %v3492_v24  ;;  %1339 = vmatprep.subr.bf16.mxu1 %v3498_v32 }
 0x2a3   :  { %1297 = vmatpush1.bf16.msra.mxu0 %v3047_v49  ;;  %1340 = vmatpush1.bf16.msra.mxu1 %v3060_v51  ;;  %v3522_v49 = vld [vmem:[%s3853_s2 + $0x4] ss:$16 sps:$4 sm:$0xff]   ;;  %v3906_v51 = vld [vmem:[#allocation10_spill] sm:$0xff] }
 0x2a4   :  { %1298 = vmatprep.subr.bf16.mxu0 %v3053_v50  ;;  %1341 = vmatprep.subr.bf16.mxu1 %v3075_v54  ;;  %v3528_v50 = vld [vmem:[%s3853_s2 + $0xc] ss:$16 sps:$4 sm:$0xff]   ;;  %v3907_v54 = vld [vmem:[#allocation11_spill] sm:$0xff] }
 0x2a7   :  { %1299 = vmatpush1.bf16.msra.mxu0 %v3069_v53  ;;  %1342 = vmatpush1.bf16.msra.mxu1 %v3087_v56  ;;  %v1125_v53 = vunpack.c.l.bf16 %v3906_v51 }
 0x2a8   :  { %1300 = vmatprep.subr.bf16.mxu0 %v3081_v55  ;;  %1343 = vmatprep.subr.bf16.mxu1 %v3092_v57  ;;  %v1127_v55 = vunpack.c.l.bf16 %v3907_v54 }
 0x2ab   :  { %1301 = vmatpush1.bf16.msra.mxu0 %v3097_v58  ;;  %1344 = vmatpush1.bf16.msra.mxu1 %v3109_v60  ;;  %v3908_v58 = vld [vmem:[#allocation12_spill] sm:$0xff]  ;;  %v3909_v60 = vld [vmem:[#allocation13_spill] sm:$0xff] }
 0x2ac   :  { %1302 = vmatprep.subr.bf16.mxu0 %v3104_v59  ;;  %1345 = vmatprep.subr.bf16.mxu1 %v3128_v63  ;;  %v1126_v59 = vunpack.c.l.bf16 %v3908_v58  ;;  %v1130_v25 = vunpack.c.h.bf16 %v3908_v58  ;;  %v1132_v9 = vunpack.c.h.bf16 %v3909_v60 }
 0x2af   :  { %1303 = vmatpush1.bf16.msra.mxu0 %v3123_v62  ;;  %1346 = vmatpush1.bf16.msra.mxu1 %v3140_v2  ;;  %v1128_v62 = vunpack.c.l.bf16 %v3909_v60 }
 0x2b0   :  { %1304 = vmatprep.subr.bf16.mxu0 %v3135_v1  ;;  %1347 = vmatprep.subr.bf16.mxu1 %v3145_v3 }
 0x2b3   :  { %1305 = vmatpush1.bf16.msra.mxu0 %v3154_v4  ;;  %1348 = vmatpush1.bf16.msra.mxu1 %v3161_v5  ;;  %v1129_v4 = vunpack.c.h.bf16 %v3906_v51  ;;  %v1131_v5 = vunpack.c.h.bf16 %v3907_v54 }
 0x2b4   :  { %1446 = vmatprep.subr.bf16.mxu0 %v3522_v49  ;;  %1489 = vmatprep.subr.bf16.mxu1 %v3528_v50 }
 0x369   :  { %v1168_v56 = vpop.f32.mrb[40].mxu0  ;;  %v1211_v57 = vpop.f32.mrb[40].mxu1 }
 0x36a   :  { %v1220_v63 = vadd.f32 %v1168_v56, %v1125_v53  ;;  %v1222_v1 = vadd.f32 %v1211_v57, %v1127_v55  ;;  %v1170_v2 = vpop.f32.mrb[41].mxu0  ;;  %v1213_v3 = vpop.f32.mrb[41].mxu1 }
 0x36b   :  { %v1221_v6 = vadd.f32 %v1170_v2, %v1126_v59  ;;  %v1223_v17 = vadd.f32 %v1213_v3, %v1128_v62  ;;  %v1172_v21 = vpop.f32.mrb[42].mxu0  ;;  %v1215_v8 = vpop.f32.mrb[42].mxu1 }
 0x36c   :  { %v2261_v11 = vmul.f32 -1.442695, %v1220_v63  ;;  %v1224_v23 = vadd.f32 %v1172_v21, %v1129_v4  ;;  %v1226_v36 = vadd.f32 %v1215_v8, %v1131_v5  ;;  %v1174_v37 = vpop.f32.mrb[43].mxu0  ;;  %v1217_v38 = vpop.f32.mrb[43].mxu1 }
 0x36d   :  { %v2263_v39 = vmul.f32 -1.442695, %v1221_v6  ;;  %v1225_v40 = vadd.f32 %v1174_v37, %v1130_v25  ;;  %v1227_v41 = vadd.f32 %v1217_v38, %v1132_v9  ;;  %v2265_v45 = vmul.f32 -1.442695, %v1223_v17  ;;  %v3570_v25 = vld [vmem:[%s3853_s2 + $0x68] ss:$16 sps:$4 sm:$0xff]  }
 0x36e   :  { %2518 = vpow2.f32 %v2261_v11  ;;  %v2262_v42 = vmul.f32 -1.442695, %v1224_v23  ;;  %v3576_v9 = vld [vmem:[%s3853_s2 + $0x84] ss:$16 sps:$4 sm:$0xff]   ;;  %v3582_v11 = vld [vmem:[%s3853_s2 + $0x8c] ss:$16 sps:$4 sm:$0xff]  }
 0x36f   :  { %2520 = vpow2.f32 %v2263_v39  ;;  %v2264_v44 = vmul.f32 -1.442695, %v1225_v40  ;;  %v2266_v14 = vmul.f32 -1.442695, %v1227_v41  ;;  %v3588_v23 = vld [vmem:[%s3853_s2 + $0x80] ss:$16 sps:$4 sm:$0xff]  }
 0x370   :  { %2522 = vpow2.f32 %v2262_v42  ;;  %v3600_v37 = vld [vmem:[%s3853_s2 + $0xa4] ss:$16 sps:$4 sm:$0xff]   ;;  %v3606_v38 = vld [vmem:[%s3853_s2 + $0xac] ss:$16 sps:$4 sm:$0xff]   ;;  %v3612_v39 = vld [vmem:[%s3853_s2 + $0xa0] ss:$16 sps:$4 sm:$0xff]  }
 0x371   :  { %2524 = vpow2.f32 %v2264_v44  ;;  %v3618_v40 = vld [vmem:[%s3853_s2 + $0xa8] ss:$16 sps:$4 sm:$0xff]   ;;  %v3624_v41 = vld [vmem:[%s3853_s2 + $0xc4] ss:$16 sps:$4 sm:$0xff]   ;;  %v3630_v42 = vld [vmem:[%s3853_s2 + $0xcc] ss:$16 sps:$4 sm:$0xff]  }
 0x372   :  { %2526 = vtanh.f32 %v1222_v1  ;;  %v3636_v44 = vld [vmem:[%s3853_s2 + $0xc0] ss:$16 sps:$4 sm:$0xff]  }
 0x373   :  { %2528 = vpow2.f32 %v2265_v45  ;;  %v3642_v45 = vld [vmem:[%s3853_s2 + $0xc8] ss:$16 sps:$4 sm:$0xff]  }
 0x374   :  { %2530 = vtanh.f32 %v1226_v36  ;;  %v3594_v36 = vld [vmem:[%s3853_s2 + $0x88] ss:$16 sps:$4 sm:$0xff]  }
 0x378   :  { %v2519_v47 = vpop.eup %2518 }
 0x379   :  { %v2521_v48 = vpop.eup %2520  ;;  %v1234_v33 = vadd.f32 1.0, %v2519_v47  ;;  %v3648_v47 = vld [vmem:[%s3853_s2 + $0xe4] ss:$16 sps:$4 sm:$0xff]  }
 0x37a   :  { %v1246_v43 = vadd.f32 1.0, %v2521_v48  ;;  %v2523_v28 = vpop.eup %2522  ;;  %v3654_v48 = vld [vmem:[%s3853_s2 + $0xec] ss:$16 sps:$4 sm:$0xff]  }
 0x37b   :  { %2532 = vrcp.f32 %v1234_v33  ;;  %v1235_v10 = vadd.f32 1.0, %v2523_v28  ;;  %v2525_v16 = vpop.eup %2524  ;;  %v3660_v33 = vld [vmem:[%s3853_s2 + $0xe0] ss:$16 sps:$4 sm:$0xff]  }
 0x37c   :  { %2534 = vrcp.f32 %v1246_v43  ;;  %v1247_v26 = vadd.f32 1.0, %v2525_v16  ;;  %v2527_v15 = vpop.eup %2526  ;;  %v3910_v43 = vld [vmem:[#allocation14_spill] sm:$0xff] }
 0x37d   :  { %2536 = vpow2.f32 %v2266_v14  ;;  %v2529_v18 = vpop.eup %2528  ;;  %v3666_v14 = vld [vmem:[%s3853_s2 + $0xe8] ss:$16 sps:$4 sm:$0xff]   ;;  %v1281_v28 = vunpack.c.l.bf16 %v3910_v43 }
 0x37e   :  { %2538 = vrcp.f32 %v1235_v10  ;;  %v2531_v51 = vpop.eup %2530  ;;  %v1260_v59 = vadd.f32 1.0, %v2529_v18  ;;  %v3911_v10 = vld [vmem:[#allocation15_spill] sm:$0xff]  ;;  %v3912_v18 = vld [vmem:[#allocation16_spill] sm:$0xff] }
 0x37f   :  { %2540 = vrcp.f32 %v1247_v26  ;;  %v1283_v16 = vunpack.c.l.bf16 %v3911_v10 }
 0x380   :  { %2542 = vrcp.f32 %v1260_v59  ;;  %v1285_v59 = vunpack.c.h.bf16 %v3910_v43 }
 0x385   :  { %v2533_v53 = vpop.eup %2532 }
 0x386   :  { %v2535_v54 = vpop.eup %2534  ;;  %v1268_v55 = vmul.f32 %v2533_v53, %v2527_v15  ;;  %v3913_v53 = vld [vmem:[#allocation17_spill] sm:$0xff] }
 0x387   :  { %v2537_v56 = vpop.eup %2536  ;;  %v1266_v57 = vmul.f32 %v2535_v54, %v3420_v46  ;;  %v1284_v54 = vunpack.c.l.bf16 %v3913_v53 }
 0x388   :  { %v2539_v58 = vpop.eup %2538  ;;  %v1261_v1 = vadd.f32 1.0, %v2537_v56 }
 0x389   :  { %v3540_v60 = vadd.f32 %v1268_v55, %v1266_v57  ;;  %v1269_v62 = vmul.f32 %v2539_v58, %v2531_v51  ;;  %v2541_v63 = vpop.eup %2540  ;;  %v1282_v51 = vunpack.c.l.bf16 %v3912_v18 }
 0x38a   :  { %v1267_v2 = vmul.f32 %v2541_v63, %v3424_v34  ;;  %v2543_v4 = vpop.eup %2542  ;;  %v3564_v34 = vld [vmem:[%s3853_s2 + $0x60] ss:$16 sps:$4 sm:$0xff]  }
 0x38b   :  { %2544 = vtanh.f32 %v3540_v60 }
 0x38c   :  { %v3544_v3 = vadd.f32 %v1269_v62, %v1267_v2  ;;  %2546 = vrcp.f32 %v1261_v1  ;;  %v1287_v62 = vunpack.c.h.bf16 %v3911_v10 }
 0x38e   :  { %2548 = vtanh.f32 %v3544_v3 }
 0x395   :  { %v2545_v5 = vpop.eup %2544 }
 0x396   :  { %v2547_v46 = vpop.eup %2546  ;;  %v1274_v17 = vmul.f32 %v2545_v5, %v2543_v4  ;;  %v1286_v5 = vunpack.c.h.bf16 %v3912_v18 }
 0x398   :  { %v2549_v6 = vpop.eup %2548 }
 0x399   :  { %v1275_v21 = vmul.f32 %v2549_v6, %v2547_v46  ;;  %v1288_v46 = vunpack.c.h.bf16 %v3913_v53 }
 0x39b   :  { %v1289_v8 = vpack.c.bf16 %v1275_v21, %v1274_v17 }
 0x39d   :  { %1323 = vmatmul.mubr.bf16.vlgmr.msra.gmra.mrb[44].mxu0 %v1289_v8  ;;  %1366 = vmatmul.mubr.bf16.vlgmr.msra.gmra.mrb[44].mxu1 %v1289_v8 }
 0x39e   :  { %1447 = vmatpush1.bf16.msra.mxu0 %v3430_v7  ;;  %1490 = vmatpush1.bf16.msra.mxu1 %v3436_v27 }
 0x39f   :  { %1448 = vmatprep.subr.bf16.mxu0 %v3442_v35  ;;  %1491 = vmatprep.subr.bf16.mxu1 %v3448_v13 }
 0x3a0   :  { %1478 = vmatprep.mubr.bf16.mxu0 %v3904_v12  ;;  %1521 = vmatprep.mubr.bf16.mxu1 %v3904_v12 }
 0x3a2   :  { %1449 = vmatpush1.bf16.msra.mxu0 %v3456_v61  ;;  %1492 = vmatpush1.bf16.msra.mxu1 %v3462_v20 }
 0x3a3   :  { %1450 = vmatprep.subr.bf16.mxu0 %v3468_v0  ;;  %1493 = vmatprep.subr.bf16.mxu1 %v3474_v30 }
 0x3a6   :  { %1451 = vmatpush1.bf16.msra.mxu0 %v3480_v31  ;;  %1494 = vmatpush1.bf16.msra.mxu1 %v3486_v19 }
 0x3a7   :  { %1452 = vmatprep.subr.bf16.mxu0 %v3492_v24  ;;  %1495 = vmatprep.subr.bf16.mxu1 %v3498_v32 }
 0x3aa   :  { %1453 = vmatpush1.bf16.msra.mxu0 %v3564_v34  ;;  %1496 = vmatpush1.bf16.msra.mxu1 %v3570_v25 }
 0x3ab   :  { %1454 = vmatprep.subr.bf16.mxu0 %v3576_v9  ;;  %1497 = vmatprep.subr.bf16.mxu1 %v3582_v11 }
 0x3ae   :  { %1455 = vmatpush1.bf16.msra.mxu0 %v3588_v23  ;;  %1498 = vmatpush1.bf16.msra.mxu1 %v3594_v36 }
 0x3af   :  { %1456 = vmatprep.subr.bf16.mxu0 %v3600_v37  ;;  %1499 = vmatprep.subr.bf16.mxu1 %v3606_v38 }
 0x3b2   :  { %1457 = vmatpush1.bf16.msra.mxu0 %v3612_v39  ;;  %1500 = vmatpush1.bf16.msra.mxu1 %v3618_v40 }
 0x3b3   :  { %1458 = vmatprep.subr.bf16.mxu0 %v3624_v41  ;;  %1501 = vmatprep.subr.bf16.mxu1 %v3630_v42 }
 0x3b6   :  { %1459 = vmatpush1.bf16.msra.mxu0 %v3636_v44  ;;  %1502 = vmatpush1.bf16.msra.mxu1 %v3642_v45 }
 0x3b7   :  { %1460 = vmatprep.subr.bf16.mxu0 %v3648_v47  ;;  %1503 = vmatprep.subr.bf16.mxu1 %v3654_v48 }
 0x3ba   :  { %1461 = vmatpush1.bf16.msra.mxu0 %v3660_v33  ;;  %1504 = vmatpush1.bf16.msra.mxu1 %v3666_v14 }
 0x3bb   :  { %1602 = vmatprep.subr.bf16.mxu0 %v3522_v49  ;;  %1645 = vmatprep.subr.bf16.mxu1 %v3528_v50 }
 0x470   :  { %v1324_v26 = vpop.f32.mrb[44].mxu0  ;;  %v1367_v15 = vpop.f32.mrb[44].mxu1 }
 0x471   :  { %v1376_v55 = vadd.f32 %v1324_v26, %v1281_v28  ;;  %v1378_v56 = vadd.f32 %v1367_v15, %v1283_v16  ;;  %v1326_v57 = vpop.f32.mrb[45].mxu0  ;;  %v1369_v58 = vpop.f32.mrb[45].mxu1 }
 0x472   :  { %v1377_v63 = vadd.f32 %v1326_v57, %v1282_v51  ;;  %v1379_v1 = vadd.f32 %v1369_v58, %v1284_v54  ;;  %v1328_v2 = vpop.f32.mrb[46].mxu0  ;;  %v1371_v4 = vpop.f32.mrb[46].mxu1 }
 0x473   :  { %v2267_v6 = vmul.f32 -1.442695, %v1376_v55  ;;  %v1380_v17 = vadd.f32 %v1328_v2, %v1285_v59  ;;  %v1382_v21 = vadd.f32 %v1371_v4, %v1287_v62  ;;  %v1330_v8 = vpop.f32.mrb[47].mxu0  ;;  %v1373_v28 = vpop.f32.mrb[47].mxu1 }
 0x474   :  { %v2269_v16 = vmul.f32 -1.442695, %v1377_v63  ;;  %v1381_v26 = vadd.f32 %v1330_v8, %v1286_v5  ;;  %v1383_v15 = vadd.f32 %v1373_v28, %v1288_v46  ;;  %v2271_v51 = vmul.f32 -1.442695, %v1379_v1 }
 0x475   :  { %2550 = vpow2.f32 %v2267_v6  ;;  %v2268_v43 = vmul.f32 -1.442695, %v1380_v17 }
 0x476   :  { %2552 = vpow2.f32 %v2269_v16  ;;  %v2270_v10 = vmul.f32 -1.442695, %v1381_v26  ;;  %v2272_v53 = vmul.f32 -1.442695, %v1383_v15 }
 0x477   :  { %2554 = vpow2.f32 %v2268_v43 }
 0x478   :  { %2556 = vpow2.f32 %v2270_v10 }
 0x479   :  { %2558 = vtanh.f32 %v1378_v56 }
 0x47a   :  { %2560 = vpow2.f32 %v2271_v51 }
 0x47b   :  { %2562 = vtanh.f32 %v1382_v21 }
 0x47f   :  { %v2551_v54 = vpop.eup %2550 }
 0x480   :  { %v2553_v18 = vpop.eup %2552  ;;  %v1390_v57 = vadd.f32 1.0, %v2551_v54 }
 0x481   :  { %v1402_v55 = vadd.f32 1.0, %v2553_v18  ;;  %v2555_v58 = vpop.eup %2554 }
 0x482   :  { %2564 = vrcp.f32 %v1390_v57  ;;  %v1391_v59 = vadd.f32 1.0, %v2555_v58  ;;  %v2557_v62 = vpop.eup %2556 }
 0x483   :  { %2566 = vrcp.f32 %v1402_v55  ;;  %v1403_v63 = vadd.f32 1.0, %v2557_v62  ;;  %v2559_v2 = vpop.eup %2558 }
 0x484   :  { %2568 = vpow2.f32 %v2272_v53  ;;  %v2561_v4 = vpop.eup %2560 }
 0x485   :  { %2570 = vrcp.f32 %v1391_v59  ;;  %v2563_v1 = vpop.eup %2562  ;;  %v1416_v21 = vadd.f32 1.0, %v2561_v4  ;;  %v3915_v59 = vld [vmem:[#allocation19_spill] sm:$0xff]  ;;  %v3916_v4 = vld [vmem:[#allocation20_spill] sm:$0xff] }
 0x486   :  { %2572 = vrcp.f32 %v1403_v63  ;;  %v1439_v62 = vunpack.c.l.bf16 %v3915_v59 }
 0x487   :  { %2574 = vrcp.f32 %v1416_v21 }
 0x48c   :  { %v2565_v5 = vpop.eup %2564 }
 0x48d   :  { %v2567_v56 = vpop.eup %2566  ;;  %v1424_v46 = vmul.f32 %v2565_v5, %v2559_v2  ;;  %v3917_v5 = vld [vmem:[#allocation21_spill] sm:$0xff] }
 0x48e   :  { %v2569_v6 = vpop.eup %2568  ;;  %v1422_v17 = vmul.f32 %v2567_v56, %v3540_v60  ;;  %v1440_v56 = vunpack.c.l.bf16 %v3917_v5 }
 0x48f   :  { %v2571_v8 = vpop.eup %2570  ;;  %v1417_v15 = vadd.f32 1.0, %v2569_v6 }
 0x490   :  { %v3680_v28 = vadd.f32 %v1424_v46, %v1422_v17  ;;  %v1425_v16 = vmul.f32 %v2571_v8, %v2563_v1  ;;  %v2573_v26 = vpop.eup %2572  ;;  %v1438_v1 = vunpack.c.l.bf16 %v3916_v4 }
 0x491   :  { %v1423_v43 = vmul.f32 %v2573_v26, %v3544_v3  ;;  %v2575_v51 = vpop.eup %2574  ;;  %v3914_v3 = vld [vmem:[#allocation18_spill] sm:$0xff] }
 0x492   :  { %2576 = vtanh.f32 %v3680_v28  ;;  %v1437_v58 = vunpack.c.l.bf16 %v3914_v3  ;;  %v1441_v21 = vunpack.c.h.bf16 %v3914_v3 }
 0x493   :  { %v3684_v10 = vadd.f32 %v1425_v16, %v1423_v43  ;;  %2578 = vrcp.f32 %v1417_v15  ;;  %v1443_v16 = vunpack.c.h.bf16 %v3915_v59 }
 0x495   :  { %2580 = vtanh.f32 %v3684_v10 }
 0x49c   :  { %v2577_v54 = vpop.eup %2576 }
 0x49d   :  { %v2579_v60 = vpop.eup %2578  ;;  %v1430_v57 = vmul.f32 %v2577_v54, %v2575_v51  ;;  %v1442_v54 = vunpack.c.h.bf16 %v3916_v4 }
 0x49f   :  { %v2581_v18 = vpop.eup %2580 }
 0x4a0   :  { %v1431_v53 = vmul.f32 %v2581_v18, %v2579_v60  ;;  %v1444_v60 = vunpack.c.h.bf16 %v3917_v5 }
 0x4a2   :  { %v1445_v55 = vpack.c.bf16 %v1431_v53, %v1430_v57 }
 0x4a4   :  { %1479 = vmatmul.mubr.bf16.vlgmr.msra.gmra.mrb[48].mxu0 %v1445_v55  ;;  %1522 = vmatmul.mubr.bf16.vlgmr.msra.gmra.mrb[48].mxu1 %v1445_v55 }
 0x4a5   :  { %1603 = vmatpush1.bf16.msra.mxu0 %v3430_v7  ;;  %1646 = vmatpush1.bf16.msra.mxu1 %v3436_v27 }
 0x4a6   :  { %1604 = vmatprep.subr.bf16.mxu0 %v3442_v35  ;;  %1647 = vmatprep.subr.bf16.mxu1 %v3448_v13 }
 0x4a7   :  { %1634 = vmatprep.mubr.bf16.mxu0 %v3904_v12  ;;  %1677 = vmatprep.mubr.bf16.mxu1 %v3904_v12 }
 0x4a9   :  { %1605 = vmatpush1.bf16.msra.mxu0 %v3456_v61  ;;  %1648 = vmatpush1.bf16.msra.mxu1 %v3462_v20 }
 0x4aa   :  { %1606 = vmatprep.subr.bf16.mxu0 %v3468_v0  ;;  %1649 = vmatprep.subr.bf16.mxu1 %v3474_v30 }
 0x4ad   :  { %1607 = vmatpush1.bf16.msra.mxu0 %v3480_v31  ;;  %1650 = vmatpush1.bf16.msra.mxu1 %v3486_v19 }
 0x4ae   :  { %1608 = vmatprep.subr.bf16.mxu0 %v3492_v24  ;;  %1651 = vmatprep.subr.bf16.mxu1 %v3498_v32 }
 0x4b1   :  { %1609 = vmatpush1.bf16.msra.mxu0 %v3564_v34  ;;  %1652 = vmatpush1.bf16.msra.mxu1 %v3570_v25 }
 0x4b2   :  { %1610 = vmatprep.subr.bf16.mxu0 %v3576_v9  ;;  %1653 = vmatprep.subr.bf16.mxu1 %v3582_v11 }
 0x4b5   :  { %1611 = vmatpush1.bf16.msra.mxu0 %v3588_v23  ;;  %1654 = vmatpush1.bf16.msra.mxu1 %v3594_v36 }
 0x4b6   :  { %1612 = vmatprep.subr.bf16.mxu0 %v3600_v37  ;;  %1655 = vmatprep.subr.bf16.mxu1 %v3606_v38 }
 0x4b9   :  { %1613 = vmatpush1.bf16.msra.mxu0 %v3612_v39  ;;  %1656 = vmatpush1.bf16.msra.mxu1 %v3618_v40 }
 0x4ba   :  { %1614 = vmatprep.subr.bf16.mxu0 %v3624_v41  ;;  %1657 = vmatprep.subr.bf16.mxu1 %v3630_v42 }
 0x4bd   :  { %1615 = vmatpush1.bf16.msra.mxu0 %v3636_v44  ;;  %1658 = vmatpush1.bf16.msra.mxu1 %v3642_v45 }
 0x4be   :  { %1616 = vmatprep.subr.bf16.mxu0 %v3648_v47  ;;  %1659 = vmatprep.subr.bf16.mxu1 %v3654_v48 }
 0x4c1   :  { %1617 = vmatpush1.bf16.msra.mxu0 %v3660_v33  ;;  %1660 = vmatpush1.bf16.msra.mxu1 %v3666_v14 }
 0x4c2   :  { %1758 = vmatprep.subr.bf16.mxu0 %v3522_v49  ;;  %1801 = vmatprep.subr.bf16.mxu1 %v3528_v50 }
 0x577   :  { %v1480_v63 = vpop.f32.mrb[48].mxu0  ;;  %v1523_v2 = vpop.f32.mrb[48].mxu1 }
 0x578   :  { %v1532_v46 = vadd.f32 %v1480_v63, %v1437_v58  ;;  %v1534_v6 = vadd.f32 %v1523_v2, %v1439_v62  ;;  %v1482_v17 = vpop.f32.mrb[49].mxu0  ;;  %v1525_v8 = vpop.f32.mrb[49].mxu1 }
 0x579   :  { %v1533_v26 = vadd.f32 %v1482_v17, %v1438_v1  ;;  %v1535_v15 = vadd.f32 %v1525_v8, %v1440_v56  ;;  %v1484_v43 = vpop.f32.mrb[50].mxu0  ;;  %v1527_v51 = vpop.f32.mrb[50].mxu1 }
 0x57a   :  { %v2273_v18 = vmul.f32 -1.442695, %v1532_v46  ;;  %v1536_v57 = vadd.f32 %v1484_v43, %v1441_v21  ;;  %v1538_v53 = vadd.f32 %v1527_v51, %v1443_v16  ;;  %v1486_v55 = vpop.f32.mrb[51].mxu0  ;;  %v1529_v58 = vpop.f32.mrb[51].mxu1 }
 0x57b   :  { %v2275_v62 = vmul.f32 -1.442695, %v1533_v26  ;;  %v1537_v63 = vadd.f32 %v1486_v55, %v1442_v54  ;;  %v1539_v2 = vadd.f32 %v1529_v58, %v1444_v60  ;;  %v2277_v1 = vmul.f32 -1.442695, %v1535_v15 }
 0x57c   :  { %2582 = vpow2.f32 %v2273_v18  ;;  %v2274_v3 = vmul.f32 -1.442695, %v1536_v57 }
 0x57d   :  { %2584 = vpow2.f32 %v2275_v62  ;;  %v2276_v59 = vmul.f32 -1.442695, %v1537_v63  ;;  %v2278_v5 = vmul.f32 -1.442695, %v1539_v2 }
 0x57e   :  { %2586 = vpow2.f32 %v2274_v3 }
 0x57f   :  { %2588 = vpow2.f32 %v2276_v59 }
 0x580   :  { %2590 = vtanh.f32 %v1534_v6 }
 0x581   :  { %2592 = vpow2.f32 %v2277_v1 }
 0x582   :  { %2594 = vtanh.f32 %v1538_v53 }
 0x586   :  { %v2583_v56 = vpop.eup %2582 }
 0x587   :  { %v2585_v4 = vpop.eup %2584  ;;  %v1546_v17 = vadd.f32 1.0, %v2583_v56 }
 0x588   :  { %v1558_v46 = vadd.f32 1.0, %v2585_v4  ;;  %v2587_v8 = vpop.eup %2586 }
 0x589   :  { %2596 = vrcp.f32 %v1546_v17  ;;  %v1547_v21 = vadd.f32 1.0, %v2587_v8  ;;  %v2589_v16 = vpop.eup %2588 }
 0x58a   :  { %2598 = vrcp.f32 %v1558_v46  ;;  %v1559_v26 = vadd.f32 1.0, %v2589_v16  ;;  %v2591_v43 = vpop.eup %2590 }
 0x58b   :  { %2600 = vpow2.f32 %v2278_v5  ;;  %v2593_v51 = vpop.eup %2592 }
 0x58c   :  { %2602 = vrcp.f32 %v1547_v21  ;;  %v2595_v15 = vpop.eup %2594  ;;  %v1572_v53 = vadd.f32 1.0, %v2593_v51  ;;  %v3919_v21 = vld [vmem:[#allocation23_spill] sm:$0xff]  ;;  %v3920_v51 = vld [vmem:[#allocation24_spill] sm:$0xff] }
 0x58d   :  { %2604 = vrcp.f32 %v1559_v26  ;;  %v1595_v16 = vunpack.c.l.bf16 %v3919_v21 }
 0x58e   :  { %2606 = vrcp.f32 %v1572_v53 }
 0x593   :  { %v2597_v54 = vpop.eup %2596 }
 0x594   :  { %v2599_v6 = vpop.eup %2598  ;;  %v1580_v60 = vmul.f32 %v2597_v54, %v2591_v43  ;;  %v3921_v54 = vld [vmem:[#allocation25_spill] sm:$0xff] }
 0x595   :  { %v2601_v18 = vpop.eup %2600  ;;  %v1578_v57 = vmul.f32 %v2599_v6, %v3680_v28  ;;  %v1596_v6 = vunpack.c.l.bf16 %v3921_v54 }
 0x596   :  { %v2603_v55 = vpop.eup %2602  ;;  %v1573_v2 = vadd.f32 1.0, %v2601_v18 }
 0x597   :  { %v3730_v58 = vadd.f32 %v1580_v60, %v1578_v57  ;;  %v1581_v62 = vmul.f32 %v2603_v55, %v2595_v15  ;;  %v2605_v63 = vpop.eup %2604  ;;  %v1594_v15 = vunpack.c.l.bf16 %v3920_v51 }
 0x598   :  { %v1579_v3 = vmul.f32 %v2605_v63, %v3684_v10  ;;  %v2607_v1 = vpop.eup %2606  ;;  %v3918_v10 = vld [vmem:[#allocation22_spill] sm:$0xff] }
 0x599   :  { %2608 = vtanh.f32 %v3730_v58  ;;  %v1593_v8 = vunpack.c.l.bf16 %v3918_v10  ;;  %v1597_v53 = vunpack.c.h.bf16 %v3918_v10 }
 0x59a   :  { %v3734_v59 = vadd.f32 %v1581_v62, %v1579_v3  ;;  %2610 = vrcp.f32 %v1573_v2  ;;  %v1598_v3 = vunpack.c.h.bf16 %v3920_v51 }
 0x59c   :  { %2612 = vtanh.f32 %v3734_v59 }
 0x5a3   :  { %v2609_v56 = vpop.eup %2608 }
 0x5a4   :  { %v2611_v28 = vpop.eup %2610  ;;  %v1586_v17 = vmul.f32 %v2609_v56, %v2607_v1  ;;  %v1600_v1 = vunpack.c.h.bf16 %v3921_v54 }
 0x5a6   :  { %v2613_v4 = vpop.eup %2612 }
 0x5a7   :  { %v1587_v5 = vmul.f32 %v2613_v4, %v2611_v28 }
 0x5a9   :  { %v1601_v46 = vpack.c.bf16 %v1587_v5, %v1586_v17 }
 0x5ab   :  { %1635 = vmatmul.mubr.bf16.vlgmr.msra.gmra.mrb[52].mxu0 %v1601_v46  ;;  %1678 = vmatmul.mubr.bf16.vlgmr.msra.gmra.mrb[52].mxu1 %v1601_v46 }
 0x5ac   :  { %1759 = vmatpush1.bf16.msra.mxu0 %v3430_v7  ;;  %1802 = vmatpush1.bf16.msra.mxu1 %v3436_v27 }
 0x5ad   :  { %1760 = vmatprep.subr.bf16.mxu0 %v3442_v35  ;;  %1803 = vmatprep.subr.bf16.mxu1 %v3448_v13 }
 0x5ae   :  { %1790 = vmatprep.mubr.bf16.mxu0 %v3904_v12  ;;  %1833 = vmatprep.mubr.bf16.mxu1 %v3904_v12 }
 0x5b0   :  { %1761 = vmatpush1.bf16.msra.mxu0 %v3456_v61  ;;  %1804 = vmatpush1.bf16.msra.mxu1 %v3462_v20 }
 0x5b1   :  { %1762 = vmatprep.subr.bf16.mxu0 %v3468_v0  ;;  %1805 = vmatprep.subr.bf16.mxu1 %v3474_v30 }
 0x5b4   :  { %1763 = vmatpush1.bf16.msra.mxu0 %v3480_v31  ;;  %1806 = vmatpush1.bf16.msra.mxu1 %v3486_v19 }
 0x5b5   :  { %1764 = vmatprep.subr.bf16.mxu0 %v3492_v24  ;;  %1807 = vmatprep.subr.bf16.mxu1 %v3498_v32 }
 0x5b8   :  { %1765 = vmatpush1.bf16.msra.mxu0 %v3564_v34  ;;  %1808 = vmatpush1.bf16.msra.mxu1 %v3570_v25 }
 0x5b9   :  { %1766 = vmatprep.subr.bf16.mxu0 %v3576_v9  ;;  %1809 = vmatprep.subr.bf16.mxu1 %v3582_v11 }
 0x5bc   :  { %1767 = vmatpush1.bf16.msra.mxu0 %v3588_v23  ;;  %1810 = vmatpush1.bf16.msra.mxu1 %v3594_v36 }
 0x5bd   :  { %1768 = vmatprep.subr.bf16.mxu0 %v3600_v37  ;;  %1811 = vmatprep.subr.bf16.mxu1 %v3606_v38 }
 0x5c0   :  { %1769 = vmatpush1.bf16.msra.mxu0 %v3612_v39  ;;  %1812 = vmatpush1.bf16.msra.mxu1 %v3618_v40 }
 0x5c1   :  { %1770 = vmatprep.subr.bf16.mxu0 %v3624_v41  ;;  %1813 = vmatprep.subr.bf16.mxu1 %v3630_v42 }
 0x5c4   :  { %1771 = vmatpush1.bf16.msra.mxu0 %v3636_v44  ;;  %1814 = vmatpush1.bf16.msra.mxu1 %v3642_v45 }
 0x5c5   :  { %1772 = vmatprep.subr.bf16.mxu0 %v3648_v47  ;;  %1815 = vmatprep.subr.bf16.mxu1 %v3654_v48 }
 0x5c8   :  { %1773 = vmatpush1.bf16.msra.mxu0 %v3660_v33  ;;  %1816 = vmatpush1.bf16.msra.mxu1 %v3666_v14 }
 0x5c9   :  { %1914 = vmatprep.subr.bf16.mxu0 %v3522_v49  ;;  %1957 = vmatprep.subr.bf16.mxu1 %v3528_v50  ;;  %v1599_v49 = vunpack.c.h.bf16 %v3919_v21 }
 0x67e   :  { %v1636_v26 = vpop.f32.mrb[52].mxu0  ;;  %v1679_v43 = vpop.f32.mrb[52].mxu1 }
 0x67f   :  { %v1688_v60 = vadd.f32 %v1636_v26, %v1593_v8  ;;  %v1690_v18 = vadd.f32 %v1679_v43, %v1595_v16  ;;  %v1638_v57 = vpop.f32.mrb[53].mxu0  ;;  %v1681_v55 = vpop.f32.mrb[53].mxu1 }
 0x680   :  { %v1689_v62 = vadd.f32 %v1638_v57, %v1594_v15  ;;  %v1691_v50 = vadd.f32 %v1681_v55, %v1596_v6  ;;  %v1640_v63 = vpop.f32.mrb[54].mxu0  ;;  %v1683_v2 = vpop.f32.mrb[54].mxu1 }
 0x681   :  { %v2279_v56 = vmul.f32 -1.442695, %v1688_v60  ;;  %v1692_v28 = vadd.f32 %v1640_v63, %v1597_v53  ;;  %v1694_v4 = vadd.f32 %v1683_v2, %v1599_v49  ;;  %v1642_v17 = vpop.f32.mrb[55].mxu0  ;;  %v1685_v5 = vpop.f32.mrb[55].mxu1 }
 0x682   :  { %v2281_v46 = vmul.f32 -1.442695, %v1689_v62  ;;  %v1693_v8 = vadd.f32 %v1642_v17, %v1598_v3  ;;  %v1695_v16 = vadd.f32 %v1685_v5, %v1600_v1  ;;  %v2283_v26 = vmul.f32 -1.442695, %v1691_v50 }
 0x683   :  { %2614 = vpow2.f32 %v2279_v56  ;;  %v2280_v10 = vmul.f32 -1.442695, %v1692_v28 }
 0x684   :  { %2616 = vpow2.f32 %v2281_v46  ;;  %v2282_v21 = vmul.f32 -1.442695, %v1693_v8  ;;  %v2284_v54 = vmul.f32 -1.442695, %v1695_v16 }
 0x685   :  { %2618 = vpow2.f32 %v2280_v10 }
 0x686   :  { %2620 = vpow2.f32 %v2282_v21 }
 0x687   :  { %2622 = vtanh.f32 %v1690_v18 }
 0x688   :  { %2624 = vpow2.f32 %v2283_v26 }
 0x689   :  { %2626 = vtanh.f32 %v1694_v4 }
 0x68d   :  { %v2615_v43 = vpop.eup %2614 }
 0x68e   :  { %v2617_v51 = vpop.eup %2616  ;;  %v1702_v15 = vadd.f32 1.0, %v2615_v43 }
 0x68f   :  { %v1714_v6 = vadd.f32 1.0, %v2617_v51  ;;  %v2619_v60 = vpop.eup %2618 }
 0x690   :  { %2628 = vrcp.f32 %v1702_v15  ;;  %v1703_v57 = vadd.f32 1.0, %v2619_v60  ;;  %v2621_v55 = vpop.eup %2620 }
 0x691   :  { %2630 = vrcp.f32 %v1714_v6  ;;  %v1715_v53 = vadd.f32 1.0, %v2621_v55  ;;  %v2623_v49 = vpop.eup %2622 }
 0x692   :  { %2632 = vpow2.f32 %v2284_v54  ;;  %v2625_v62 = vpop.eup %2624 }
 0x693   :  { %2634 = vrcp.f32 %v1703_v57  ;;  %v2627_v50 = vpop.eup %2626  ;;  %v1728_v28 = vadd.f32 1.0, %v2625_v62 }
 0x694   :  { %2636 = vrcp.f32 %v1715_v53 }
 0x695   :  { %2638 = vrcp.f32 %v1728_v28 }
 0x69a   :  { %v2629_v63 = vpop.eup %2628 }
 0x69b   :  { %v2631_v18 = vpop.eup %2630  ;;  %v1736_v2 = vmul.f32 %v2629_v63, %v2623_v49 }
 0x69c   :  { %v2633_v3 = vpop.eup %2632  ;;  %v1734_v1 = vmul.f32 %v2631_v18, %v3730_v58 }
 0x69d   :  { %v2635_v56 = vpop.eup %2634  ;;  %v1729_v46 = vadd.f32 1.0, %v2633_v3 }
 0x69e   :  { %v3780_v4 = vadd.f32 %v1736_v2, %v1734_v1  ;;  %v1737_v17 = vmul.f32 %v2635_v56, %v2627_v50  ;;  %v2637_v5 = vpop.eup %2636 }
 0x69f   :  { %v1735_v8 = vmul.f32 %v2637_v5, %v3734_v59  ;;  %v2639_v10 = vpop.eup %2638 }
 0x6a0   :  { %2640 = vtanh.f32 %v3780_v4 }
 0x6a1   :  { %v3784_v16 = vadd.f32 %v1737_v17, %v1735_v8  ;;  %2642 = vrcp.f32 %v1729_v46 }
 0x6a3   :  { %2644 = vtanh.f32 %v3784_v16 }
 0x6aa   :  { %v2641_v21 = vpop.eup %2640 }
 0x6ab   :  { %v2643_v58 = vpop.eup %2642  ;;  %v1742_v43 = vmul.f32 %v2641_v21, %v2639_v10 }
 0x6ad   :  { %v2645_v26 = vpop.eup %2644 }
 0x6ae   :  { %v1743_v51 = vmul.f32 %v2645_v26, %v2643_v58 }
 0x6b0   :  { %v1757_v15 = vpack.c.bf16 %v1743_v51, %v1742_v43 }
 0x6b2   :  { %1791 = vmatmul.mubr.bf16.vlgmr.msra.gmra.mrb[56].mxu0 %v1757_v15  ;;  %1834 = vmatmul.mubr.bf16.vlgmr.msra.gmra.mrb[56].mxu1 %v1757_v15  ;;  %v2446_v15 = vld [vmem:[#allocation3] sm:$0xff]  }
 0x6b3   :  { %1915 = vmatpush1.bf16.msra.mxu0 %v3430_v7  ;;  %1958 = vmatpush1.bf16.msra.mxu1 %v3436_v27  ;;  %v1751_v7 = vunpack.c.l.bf16 %v3341_v29 }
 0x6b4   :  { %1916 = vmatprep.subr.bf16.mxu0 %v3442_v35  ;;  %1959 = vmatprep.subr.bf16.mxu1 %v3448_v13  ;;  %v1750_v13 = vunpack.c.l.bf16 %v3343_v52 }
 0x6b5   :  { %1946 = vmatprep.mubr.bf16.mxu0 %v3904_v12  ;;  %1989 = vmatprep.mubr.bf16.mxu1 %v3904_v12  ;;  %v1749_v12 = vunpack.c.l.bf16 %v3339_v22 }
 0x6b7   :  { %1917 = vmatpush1.bf16.msra.mxu0 %v3456_v61  ;;  %1960 = vmatpush1.bf16.msra.mxu1 %v3462_v20  ;;  %v3922_v61 = vld [vmem:[#allocation26_spill] sm:$0xff] }
 0x6b8   :  { %1918 = vmatprep.subr.bf16.mxu0 %v3468_v0  ;;  %1961 = vmatprep.subr.bf16.mxu1 %v3474_v30  ;;  %v1752_v20 = vunpack.c.l.bf16 %v3922_v61 }
 0x6bb   :  { %1919 = vmatpush1.bf16.msra.mxu0 %v3480_v31  ;;  %1962 = vmatpush1.bf16.msra.mxu1 %v3486_v19 }
 0x6bc   :  { %1920 = vmatprep.subr.bf16.mxu0 %v3492_v24  ;;  %1963 = vmatprep.subr.bf16.mxu1 %v3498_v32  ;;  %v1753_v24 = vunpack.c.h.bf16 %v3339_v22  ;;  %v1755_v32 = vunpack.c.h.bf16 %v3341_v29 }
 0x6bf   :  { %1921 = vmatpush1.bf16.msra.mxu0 %v3564_v34  ;;  %1964 = vmatpush1.bf16.msra.mxu1 %v3570_v25 }
 0x6c0   :  { %1922 = vmatprep.subr.bf16.mxu0 %v3576_v9  ;;  %1965 = vmatprep.subr.bf16.mxu1 %v3582_v11 }
 0x6c3   :  { %1923 = vmatpush1.bf16.msra.mxu0 %v3588_v23  ;;  %1966 = vmatpush1.bf16.msra.mxu1 %v3594_v36  ;;  %v1754_v23 = vunpack.c.h.bf16 %v3343_v52  ;;  %v1756_v36 = vunpack.c.h.bf16 %v3922_v61  ;;  %v2452_v61 = vld [vmem:[#allocation3 + $0x30] sm:$0xff]  }
 0x6c4   :  { %1924 = vmatprep.subr.bf16.mxu0 %v3600_v37  ;;  %1967 = vmatprep.subr.bf16.mxu1 %v3606_v38 }
 0x6c7   :  { %1925 = vmatpush1.bf16.msra.mxu0 %v3612_v39  ;;  %1968 = vmatpush1.bf16.msra.mxu1 %v3618_v40 }
 0x6c8   :  { %1926 = vmatprep.subr.bf16.mxu0 %v3624_v41  ;;  %1969 = vmatprep.subr.bf16.mxu1 %v3630_v42 }
 0x6cb   :  { %1927 = vmatpush1.bf16.msra.mxu0 %v3636_v44  ;;  %1970 = vmatpush1.bf16.msra.mxu1 %v3642_v45 }
 0x6cc   :  { %1928 = vmatprep.subr.bf16.mxu0 %v3648_v47  ;;  %1971 = vmatprep.subr.bf16.mxu1 %v3654_v48 }
 0x6cf   :  { %1929 = vmatpush1.bf16.msra.mxu0 %v3660_v33  ;;  %1972 = vmatpush1.bf16.msra.mxu1 %v3666_v14 }
 0x785   :  { %v1792_v27 = vpop.f32.mrb[56].mxu0  ;;  %v1835_v35 = vpop.f32.mrb[56].mxu1 }
 0x786   :  { %v1844_v0 = vadd.f32 %v1792_v27, %v1749_v12  ;;  %v1846_v30 = vadd.f32 %v1835_v35, %v1751_v7  ;;  %v1794_v31 = vpop.f32.mrb[57].mxu0  ;;  %v1837_v19 = vpop.f32.mrb[57].mxu1  ;;  %v2795_v12 = vmov 0.0   ;;  %v2448_v7 = vld [vmem:[#allocation3 + $0x10] sm:$0xff]   ;;  %v2449_v27 = vld [vmem:[#allocation3 + $0x18] sm:$0xff]   ;;  %v2450_v35 = vld [vmem:[#allocation3 + $0x20] sm:$0xff]  }
 0x787   :  { %v1845_v34 = vadd.f32 %v1794_v31, %v1750_v13  ;;  %v1847_v25 = vadd.f32 %v1837_v19, %v1752_v20  ;;  %v1796_v9 = vpop.f32.mrb[58].mxu0  ;;  %v1839_v11 = vpop.f32.mrb[58].mxu1  ;;  %2315 = vmatprep.subr.bf16.mxu0 %v2795_v12  ;;  %v2451_v13 = vld [vmem:[#allocation3 + $0x28] sm:$0xff]   ;;  %v2453_v20 = vld [vmem:[#allocation3 + $0x38] sm:$0xff]  }
 0x788   :  { %v2285_v37 = vmul.f32 -1.442695, %v1844_v0  ;;  %v1848_v38 = vadd.f32 %v1796_v9, %v1753_v24  ;;  %v1850_v39 = vadd.f32 %v1839_v11, %v1755_v32  ;;  %v1798_v40 = vpop.f32.mrb[59].mxu0  ;;  %v1841_v41 = vpop.f32.mrb[59].mxu1  ;;  %v3923_v0 = vld [vmem:[#allocation27_spill] sm:$0xff]  ;;  %v3924_v31 = vld [vmem:[#allocation28_spill] sm:$0xff] }
 0x789   :  { %v2287_v42 = vmul.f32 -1.442695, %v1845_v34  ;;  %v1849_v44 = vadd.f32 %v1798_v40, %v1754_v23  ;;  %v1851_v45 = vadd.f32 %v1841_v41, %v1756_v36  ;;  %v2289_v47 = vmul.f32 -1.442695, %v1847_v25  ;;  %v3925_v34 = vld [vmem:[#allocation29_spill] sm:$0xff]  ;;  %v3926_v9 = vld [vmem:[#allocation30_spill] sm:$0xff] }
 0x78a   :  { %2646 = vpow2.f32 %v2285_v37  ;;  %v2286_v22 = vmul.f32 -1.442695, %v1848_v38  ;;  %v1907_v19 = vunpack.c.l.bf16 %v3924_v31  ;;  %v1906_v25 = vunpack.c.l.bf16 %v3925_v34 }
 0x78b   :  { %2648 = vpow2.f32 %v2287_v42  ;;  %v2288_v29 = vmul.f32 -1.442695, %v1849_v44  ;;  %v2290_v14 = vmul.f32 -1.442695, %v1851_v45  ;;  %v1908_v11 = vunpack.c.l.bf16 %v3926_v9 }
 0x78c   :  { %2650 = vpow2.f32 %v2286_v22  ;;  %v1911_v40 = vunpack.c.h.bf16 %v3924_v31  ;;  %v1910_v22 = vunpack.c.h.bf16 %v3925_v34 }
 0x78d   :  { %2652 = vpow2.f32 %v2288_v29  ;;  %v1912_v29 = vunpack.c.h.bf16 %v3926_v9 }
 0x78e   :  { %2654 = vtanh.f32 %v1846_v30  ;;  %v1905_v30 = vunpack.c.l.bf16 %v3923_v0 }
 0x78f   :  { %2656 = vpow2.f32 %v2289_v47 }
 0x790   :  { %2658 = vtanh.f32 %v1850_v39  ;;  %v1909_v39 = vunpack.c.h.bf16 %v3923_v0 }
 0x794   :  { %v2647_v48 = vpop.eup %2646 }
 0x795   :  { %v2649_v52 = vpop.eup %2648  ;;  %v1858_v33 = vadd.f32 1.0, %v2647_v48 }
 0x796   :  { %v1870_v59 = vadd.f32 1.0, %v2649_v52  ;;  %v2651_v54 = vpop.eup %2650 }
 0x797   :  { %2660 = vrcp.f32 %v1858_v33  ;;  %v1859_v6 = vadd.f32 1.0, %v2651_v54  ;;  %v2653_v60 = vpop.eup %2652 }
 0x798   :  { %2662 = vrcp.f32 %v1870_v59  ;;  %v1871_v57 = vadd.f32 1.0, %v2653_v60  ;;  %v2655_v55 = vpop.eup %2654 }
 0x799   :  { %2664 = vpow2.f32 %v2290_v14  ;;  %v2657_v53 = vpop.eup %2656 }
 0x79a   :  { %2666 = vrcp.f32 %v1859_v6  ;;  %v2659_v49 = vpop.eup %2658  ;;  %v1884_v1 = vadd.f32 1.0, %v2657_v53 }
 0x79b   :  { %2668 = vrcp.f32 %v1871_v57 }
 0x79c   :  { %2670 = vrcp.f32 %v1884_v1 }
 0x7a1   :  { %v2661_v62 = vpop.eup %2660 }
 0x7a2   :  { %v2663_v50 = vpop.eup %2662  ;;  %v1892_v63 = vmul.f32 %v2661_v62, %v2655_v55 }
 0x7a3   :  { %v2665_v18 = vpop.eup %2664  ;;  %v1890_v2 = vmul.f32 %v2663_v50, %v3780_v4 }
 0x7a4   :  { %v2667_v3 = vpop.eup %2666  ;;  %v1885_v5 = vadd.f32 1.0, %v2665_v18 }
 0x7a5   :  { %v3828_v56 = vadd.f32 %v1892_v63, %v1890_v2  ;;  %v1893_v28 = vmul.f32 %v2667_v3, %v2659_v49  ;;  %v2669_v17 = vpop.eup %2668 }
 0x7a6   :  { %v1891_v46 = vmul.f32 %v2669_v17, %v3784_v16  ;;  %v2671_v10 = vpop.eup %2670  ;;  %v2447_v16 = vld [vmem:[#allocation3 + $0x8] sm:$0xff]  }
 0x7a7   :  { %2672 = vtanh.f32 %v3828_v56 }
 0x7a8   :  { %v3832_v8 = vadd.f32 %v1893_v28, %v1891_v46  ;;  %2674 = vrcp.f32 %v1885_v5 }
 0x7aa   :  { %2676 = vtanh.f32 %v3832_v8 }
 0x7b1   :  { %v2673_v21 = vpop.eup %2672 }
 0x7b2   :  { %v2675_v4 = vpop.eup %2674  ;;  %v1898_v26 = vmul.f32 %v2673_v21, %v2671_v10 }
 0x7b4   :  { %v2677_v58 = vpop.eup %2676 }
 0x7b5   :  { %v1899_v43 = vmul.f32 %v2677_v58, %v2675_v4 }
 0x7b7   :  { %v1913_v51 = vpack.c.bf16 %v1899_v43, %v1898_v26 }
 0x7b9   :  { %1947 = vmatmul.mubr.bf16.vlgmr.msra.gmra.mrb[60].mxu0 %v1913_v51  ;;  %1990 = vmatmul.mubr.bf16.vlgmr.msra.gmra.mrb[60].mxu1 %v1913_v51 }
 0x7ba   :  { %2316 = vmatpush3.bf16.msra.mxu0 %v2446_v15  ;;  %2331 = vmatprep.mubr.msk.bf16.mxu0 %vm2796_vm0, %v2795_v12 }
 0x7bb   :  { %2317 = vmatprep.subr.bf16.mxu0 %v2795_v12 }
 0x7be   :  { %2318 = vmatpush3.bf16.msra.mxu0 %v2447_v16 }
 0x7bf   :  { %2319 = vmatprep.subr.bf16.mxu0 %v2795_v12 }
 0x7c2   :  { %2320 = vmatpush3.bf16.msra.mxu0 %v2448_v7 }
 0x7c3   :  { %2321 = vmatprep.subr.bf16.mxu0 %v2795_v12 }
 0x7c6   :  { %2322 = vmatpush3.bf16.msra.mxu0 %v2449_v27 }
 0x7c7   :  { %2323 = vmatprep.subr.bf16.mxu0 %v2795_v12 }
 0x7ca   :  { %2324 = vmatpush3.bf16.msra.mxu0 %v2450_v35 }
 0x7cb   :  { %2325 = vmatprep.subr.bf16.mxu0 %v2795_v12 }
 0x7ce   :  { %2326 = vmatpush3.bf16.msra.mxu0 %v2451_v13 }
 0x7cf   :  { %2327 = vmatprep.subr.bf16.mxu0 %v2795_v12 }
 0x7d2   :  { %2328 = vmatpush3.bf16.msra.mxu0 %v2452_v61 }
 0x7d3   :  { %2329 = vmatprep.subr.bf16.mxu0 %v2795_v12 }
 0x7d6   :  { %2330 = vmatpush3.bf16.msra.mxu0 %v2453_v20 }
 0x88c   :  { %v1948_v24 = vpop.f32.mrb[60].mxu0  ;;  %v1991_v32 = vpop.f32.mrb[60].mxu1 }
 0x88d   :  { %v2000_v23 = vadd.f32 %v1948_v24, %v1905_v30  ;;  %v2002_v36 = vadd.f32 %v1991_v32, %v1907_v19  ;;  %v1950_v37 = vpop.f32.mrb[61].mxu0  ;;  %v1993_v38 = vpop.f32.mrb[61].mxu1 }
 0x88e   :  { %v2001_v41 = vadd.f32 %v1950_v37, %v1906_v25  ;;  %v2003_v42 = vadd.f32 %v1993_v38, %v1908_v11  ;;  %v1952_v44 = vpop.f32.mrb[62].mxu0  ;;  %v1995_v45 = vpop.f32.mrb[62].mxu1 }
 0x88f   :  { %v2291_v47 = vmul.f32 -1.442695, %v2000_v23  ;;  %v2004_v48 = vadd.f32 %v1952_v44, %v1909_v39  ;;  %v2006_v52 = vadd.f32 %v1995_v45, %v1911_v40  ;;  %v1954_v33 = vpop.f32.mrb[63].mxu0  ;;  %v1997_v14 = vpop.f32.mrb[63].mxu1 }
 0x890   :  { %v2293_v59 = vmul.f32 -1.442695, %v2001_v41  ;;  %v2005_v54 = vadd.f32 %v1954_v33, %v1910_v22  ;;  %v2007_v6 = vadd.f32 %v1997_v14, %v1912_v29  ;;  %v2295_v55 = vmul.f32 -1.442695, %v2003_v42 }
 0x891   :  { %2678 = vpow2.f32 %v2291_v47  ;;  %v2292_v60 = vmul.f32 -1.442695, %v2004_v48 }
 0x892   :  { %2680 = vpow2.f32 %v2293_v59  ;;  %v2294_v57 = vmul.f32 -1.442695, %v2005_v54  ;;  %v2296_v50 = vmul.f32 -1.442695, %v2007_v6 }
 0x893   :  { %2682 = vpow2.f32 %v2292_v60 }
 0x894   :  { %2684 = vpow2.f32 %v2294_v57 }
 0x895   :  { %2686 = vtanh.f32 %v2002_v36 }
 0x896   :  { %2688 = vpow2.f32 %v2295_v55 }
 0x897   :  { %2690 = vtanh.f32 %v2006_v52 }
 0x89b   :  { %v2679_v53 = vpop.eup %2678 }
 0x89c   :  { %v2681_v49 = vpop.eup %2680  ;;  %v2014_v62 = vadd.f32 1.0, %v2679_v53 }
 0x89d   :  { %v2026_v63 = vadd.f32 1.0, %v2681_v49  ;;  %v2683_v18 = vpop.eup %2682 }
 0x89e   :  { %2692 = vrcp.f32 %v2014_v62  ;;  %v2015_v2 = vadd.f32 1.0, %v2683_v18  ;;  %v2685_v3 = vpop.eup %2684 }
 0x89f   :  { %2694 = vrcp.f32 %v2026_v63  ;;  %v2027_v1 = vadd.f32 1.0, %v2685_v3  ;;  %v2687_v28 = vpop.eup %2686 }
 0x8a0   :  { %2696 = vpow2.f32 %v2296_v50  ;;  %v2689_v17 = vpop.eup %2688 }
 0x8a1   :  { %2698 = vrcp.f32 %v2015_v2  ;;  %v2691_v5 = vpop.eup %2690  ;;  %v2040_v4 = vadd.f32 1.0, %v2689_v17 }
 0x8a2   :  { %2700 = vrcp.f32 %v2027_v1 }
 0x8a3   :  { %2702 = vrcp.f32 %v2040_v4 }
 0x8a8   :  { %v2693_v46 = vpop.eup %2692 }
 0x8a9   :  { %v2695_v10 = vpop.eup %2694  ;;  %v2048_v21 = vmul.f32 %v2693_v46, %v2687_v28 }
 0x8aa   :  { %v2697_v58 = vpop.eup %2696  ;;  %v2046_v26 = vmul.f32 %v2695_v10, %v3828_v56  ;;  %v2297_v56 = vld [vmem:[#allocation5] ss:$0 sm:$0xff] }
 0x8ab   :  { %v2699_v43 = vpop.eup %2698  ;;  %v2041_v16 = vadd.f32 1.0, %v2697_v58 }
 0x8ac   :  { %v2050_v51 = vadd.f32 %v2048_v21, %v2046_v26  ;;  %v2049_v15 = vmul.f32 %v2699_v43, %v2691_v5  ;;  %v2701_v12 = vpop.eup %2700 }
 0x8ad   :  { %v2047_v7 = vmul.f32 %v2701_v12, %v3832_v8  ;;  %v2703_v35 = vpop.eup %2702 }
 0x8ae   :  { %2704 = vtanh.f32 %v2050_v51 }
 0x8af   :  { %v2051_v27 = vadd.f32 %v2049_v15, %v2047_v7  ;;  %2706 = vrcp.f32 %v2041_v16 }
 0x8b1   :  { %2708 = vtanh.f32 %v2051_v27 }
 0x8b8   :  { %v2705_v13 = vpop.eup %2704 }
 0x8b9   :  { %v2054_v61 = vmul.f32 %v2705_v13, %v2703_v35  ;;  %v2707_v20 = vpop.eup %2706 }
 0x8bb   :  { %v2709_v0 = vpop.eup %2708 }
 0x8bc   :  { %v2055_v30 = vmul.f32 %v2709_v0, %v2707_v20 }
 0x8be   :  { %v2056_v31 = vpack.c.bf16 %v2055_v30, %v2054_v61 }
 0x8c0   :  { %2332 = vmatmul.mubr.bf16.vlgmr.msra.gmra.mrb[64].mxu0 %v2056_v31 }
 0x993   :  { %v2162_v19 = vpop.f32.mrb[64].mxu0 }
 0x994   :  { %v2163_v24 = vadd.f32 %v2297_v56, %v2162_v19  ;;  %v2333_v32 = vpop.f32.mrb[65].mxu0 }
 0x995   :  { %v2165_v34 = vpop.f32.mrb[66].mxu0 }
 0x996   :  { %2169 = vst [vmem:[%s3857_s6] sm:$0xff] %v2163_v24  ;;  %v2166_v8 = vadd.f32 %v2297_v56, %v2165_v34  ;;  %v2334_v25 = vpop.f32.mrb[67].mxu0 }
 0x998   :  { %2170 = vst [vmem:[%s3857_s6 + $0x8] sm:$0xff] %v2166_v8 }
 0x999   :  { %2175 = vsyncpa [#allocation4], 1 }
 0x99a   :  { %2176 = vsyncpa [#allocation6], 1 }

// kernel: lstm_forward.2
= control target key start
LH: loop header
LB: loop body
LE: loop exit
PB: predicated region body
PF: predicated region fallthrough
CT: control target
= control target key end

     0   :  { %9 = vsyncpa [#allocation4], 0  ;;  %s5020_s0 = inlined_call_operand.vmem [shape: bf16[8,16,16], index: 0, kind: input, shape index: {}]   ;;  %s5021_s1 = inlined_call_operand.hbm [shape: bf16[16,512], index: 1, kind: input, shape index: {}]   ;;  %s5022_s2 = inlined_call_operand.hbm [shape: bf16[128,512], index: 2, kind: input, shape index: {}]   ;;  %s5023_s3 = inlined_call_operand.vmem [shape: f32[1,512], index: 3, kind: input, shape index: {}]   ;;  %s5024_s4 = inlined_call_operand.vmem [shape: bf16[8,16,128], index: 4, kind: output, shape index: {}]  }
   0x1   :  { %10 = vsyncpa [#allocation6], 0  ;;  %s4223_s15 = smov [#allocation3]   ;;  %s4175_s19 = scalar_lea.hbm %s5021_s1, 512 }
   0x2   :  { %s18_s16 = sshll.u32 %s4223_s15, 4  ;;  %p4176_p0 = scmp.ne.s32.totalorder %s5021_s1, %s4175_s19  ;;  %s19_s16 = int_to_ptr.vmem [resolvable:$true] %s18_s16 }
   0x3   :  { %p4179_p1 = scmp.lt.u32.totalorder %s4175_s19, %s5021_s1 }
   0x5   :  { %p4181_p2 = pnand %p4179_p1, %p4176_p0 }
   0x7   :  { %4184 = shalt.err (!%p4181_p2)
}
   0x8   :  { %s4185_s24 = scalar_lea.vmem %s19_s16, 512  ;;  %p4190_p4 = scmp.lt.s32.totalorder %s19_s16, %s19_s16 }
   0x9   :  { %p4186_p3 = scmp.ne.s32.totalorder %s19_s16, %s4185_s24  ;;  %p4191_p5 = scmp.lt.s32.totalorder %s4185_s24, %s4185_s24 }
   0xb   :  { %p4192_p6 = por %p4191_p5, %p4190_p4 }
   0xd   :  { %p4193_p7 = pnand %p4192_p6, %p4186_p3 }
   0xf   :  { %4196 = shalt.err (!%p4193_p7)
}
  0x10   :  { %s4224_s25 = smov 256   ;;  %s4225_s26 = smov 16  }
  0x11   :  { %24 = dma.hbm_to_vmem [thread:$0]  %s5021_s1, 512, %s19_s16, [#allocation4], %s4224_s25, %s4224_s25, %s4225_s26  }
  0x12   :  { %s4226_s29 = smov [#allocation5]   ;;  %s4197_s7 = scalar_lea.hbm %s5022_s2, 4096 }
  0x13   :  { %s30_s30 = sshll.u32 %s4226_s29, 4  ;;  %p4198_p8 = scmp.ne.s32.totalorder %s5022_s2, %s4197_s7  ;;  %s31_s30 = int_to_ptr.vmem [resolvable:$true] %s30_s30 }
  0x14   :  { %p4201_p9 = scmp.lt.u32.totalorder %s4197_s7, %s5022_s2 }
  0x16   :  { %p4203_p10 = pnand %p4201_p9, %p4198_p8 }
  0x18   :  { %4206 = shalt.err (!%p4203_p10)
}
  0x19   :  { %s4207_s12 = scalar_lea.vmem %s31_s30, 4096  ;;  %p4212_p12 = scmp.lt.s32.totalorder %s31_s30, %s31_s30 }
  0x1a   :  { %p4208_p11 = scmp.ne.s32.totalorder %s31_s30, %s4207_s12  ;;  %p4213_p13 = scmp.lt.s32.totalorder %s4207_s12, %s4207_s12 }
  0x1c   :  { %p4214_p0 = por %p4213_p13, %p4212_p12 }
  0x1e   :  { %p4215_p1 = pnand %p4214_p0, %p4208_p11 }
  0x20   :  { %4218 = shalt.err (!%p4215_p1)
}
  0x21   :  { %36 = dma.hbm_to_vmem [thread:$0]  %s5022_s2, 4096, %s31_s30, [#allocation6], %s4224_s25, %s4224_s25, %s4225_s26  }
  0x22   :  { %4219 = dma.done.wait [#allocation4], 512  }
  0x23   :  { %4220 = vsyncadd [#allocation4], 4294966784 }
  0x24   :  { %4221 = dma.done.wait [#allocation6], 4096  }
  0x25   :  { %4222 = vsyncadd [#allocation6], 4294963200  ;;  %v5025_v0 = vmov 0   ;;  %v3761_v1 = vld [vmem:[#allocation3 + $0x4] ss:$16 sps:$4 sm:$0xff]   ;;  %vm148_vm0 = vcmask 130048   ;;  %v68_v45 = vlaneseq }
  0x26   :  { %205 = vmatprep.mubr.bf16.mxu0 %v5025_v0  ;;  %318 = vmatprep.mubr.bf16.mxu1 %v5025_v0  ;;  %v3763_v2 = vld [vmem:[#allocation3 + $0xc] ss:$16 sps:$4 sm:$0xff]   ;;  %v3765_v3 = vld [vmem:[#allocation3] ss:$16 sps:$4 sm:$0xff]   ;;  %v3766_v4 = vld [vmem:[#allocation3 + $0x8] ss:$16 sps:$4 sm:$0xff]  }
  0x27   :  { %173 = vmatprep.subr.bf16.mxu0 %v3761_v1  ;;  %286 = vmatprep.subr.bf16.mxu1 %v3763_v2  ;;  %v3767_v5 = vld [vmem:[%s5020_s0] sm:$0xff]   ;;  %v4295_v10 = vld [vmem:[#allocation5 + $0x8] ss:$16 sps:$4 sm:$0xff]   ;;  %v4297_v11 = vld [vmem:[#allocation5 + $0xc] ss:$16 sps:$4 sm:$0xff]   ;;  %v69_v46 = vshrl.u32 %v68_v45, 7 }
  0x28   :  { %174 = vmatpush1.bf16.msra.mxu0 %v3765_v3  ;;  %287 = vmatpush1.bf16.msra.mxu1 %v3766_v4  ;;  %v4282_v6 = vld [vmem:[#allocation5] ss:$16 sps:$4 sm:$0xff]   ;;  %v4284_v7 = vld [vmem:[#allocation5 + $0x4] ss:$16 sps:$4 sm:$0xff]   ;;  %v3771_v12 = vld [vmem:[%s5020_s0 + $0x8] sm:$0xff]  }
  0x29   :  { %667 = vmatprep.subr.bf16.mxu0 %v4284_v7  ;;  %v4287_v8 = vld [vmem:[#allocation5 + $0x20] ss:$16 sps:$4 sm:$0xff]   ;;  %v4291_v9 = vld [vmem:[#allocation5 + $0x24] ss:$16 sps:$4 sm:$0xff]   ;;  %710 = vmatprep.subr.bf16.mxu1 %v4297_v11  ;;  %v4311_v15 = vld [vmem:[#allocation5 + $0x2c] ss:$16 sps:$4 sm:$0xff]  }
  0x2a   :  { %v4305_v13 = vld [vmem:[#allocation5 + $0x44] ss:$16 sps:$4 sm:$0xff]   ;;  %v4307_v14 = vld [vmem:[#allocation5 + $0x40] ss:$16 sps:$4 sm:$0xff]   ;;  %v4314_v16 = vld [vmem:[#allocation5 + $0x28] ss:$16 sps:$4 sm:$0xff]  }
  0x2b   :  { %3343 = vmatmul.mubr.msk.bf16.vlgmr.msra.gmra.mrb[0].mxu0 %vm148_vm0, %v3767_v5  ;;  %3351 = vmatmul.mubr.msk.bf16.vlgmr.msra.gmra.mrb[0].mxu1 %vm148_vm0, %v3767_v5  ;;  %v4317_v17 = vld [vmem:[#allocation5 + $0x64] ss:$16 sps:$4 sm:$0xff]   ;;  %v4321_v18 = vld [vmem:[#allocation5 + $0x4c] ss:$16 sps:$4 sm:$0xff]   ;;  %v4325_v19 = vld [vmem:[#allocation5 + $0x60] ss:$16 sps:$4 sm:$0xff]  }
  0x2c   :  { %668 = vmatpush1.bf16.msra.mxu0 %v4282_v6  ;;  %215 = vmatprep.mubr.bf16.mxu0 %v5025_v0  ;;  %v4329_v20 = vld [vmem:[#allocation5 + $0x48] ss:$16 sps:$4 sm:$0xff]   ;;  %v4333_v21 = vld [vmem:[#allocation5 + $0x84] ss:$16 sps:$4 sm:$0xff]   ;;  %v4338_v23 = vld [vmem:[#allocation5 + $0x6c] ss:$16 sps:$4 sm:$0xff]  }
  0x2d   :  { %328 = vmatprep.mubr.bf16.mxu1 %v5025_v0  ;;  %669 = vmatprep.subr.bf16.mxu0 %v4291_v9  ;;  %v3778_v22 = vld [vmem:[%s5020_s0 + $0x10] sm:$0xff]   ;;  %v4344_v25 = vld [vmem:[#allocation5 + $0x68] ss:$16 sps:$4 sm:$0xff]   ;;  %v4352_v27 = vld [vmem:[#allocation5 + $0x8c] ss:$16 sps:$4 sm:$0xff]   ;;  %v78_v47 = vsub.s32 2, %v69_v46 }
  0x2e   :  { %711 = vmatpush1.bf16.msra.mxu1 %v4295_v10  ;;  %v4341_v24 = vld [vmem:[#allocation5 + $0x80] ss:$16 sps:$4 sm:$0xff]   ;;  %v4348_v26 = vld [vmem:[#allocation5 + $0xa4] ss:$16 sps:$4 sm:$0xff]   ;;  %v4360_v29 = vld [vmem:[#allocation5 + $0x88] ss:$16 sps:$4 sm:$0xff]  }
  0x2f   :  { %712 = vmatprep.subr.bf16.mxu1 %v4311_v15  ;;  %v4357_v28 = vld [vmem:[#allocation5 + $0xa0] ss:$16 sps:$4 sm:$0xff]   ;;  %v4364_v30 = vld [vmem:[#allocation5 + $0xc4] ss:$16 sps:$4 sm:$0xff]   ;;  %v4366_v31 = vld [vmem:[#allocation5 + $0xac] ss:$16 sps:$4 sm:$0xff]  }
  0x30   :  { %670 = vmatpush1.bf16.msra.mxu0 %v4287_v8  ;;  %v3785_v32 = vld [vmem:[%s5020_s0 + $0x18] sm:$0xff]   ;;  %v4371_v33 = vld [vmem:[#allocation5 + $0xc0] ss:$16 sps:$4 sm:$0xff]   ;;  %v4379_v35 = vld [vmem:[#allocation5 + $0xe4] ss:$16 sps:$4 sm:$0xff]   ;;  %v82_v48 = vsub.s32 3, %v69_v46 }
  0x31   :  { %671 = vmatprep.subr.bf16.mxu0 %v4305_v13  ;;  %v4375_v34 = vld [vmem:[#allocation5 + $0xa8] ss:$16 sps:$4 sm:$0xff]   ;;  %v4381_v36 = vld [vmem:[#allocation5 + $0xcc] ss:$16 sps:$4 sm:$0xff]   ;;  %v4385_v37 = vld [vmem:[#allocation5 + $0xe0] ss:$16 sps:$4 sm:$0xff]  }
  0x32   :  { %713 = vmatpush1.bf16.msra.mxu1 %v4314_v16  ;;  %v4387_v38 = vld [vmem:[#allocation5 + $0xc8] ss:$16 sps:$4 sm:$0xff]   ;;  %v4391_v39 = vld [vmem:[#allocation5 + $0xec] ss:$16 sps:$4 sm:$0xff]   ;;  %v3792_v40 = vld [vmem:[%s5020_s0 + $0x20] sm:$0xff]   ;;  %v70_v49 = vsub.s32 0, %v69_v46 }
  0x33   :  { %3344 = vmatmul.mubr.msk.bf16.gmra.mrb[4].mxu0 %vm148_vm0, %v3771_v12  ;;  %3352 = vmatmul.mubr.msk.bf16.gmra.mrb[4].mxu1 %vm148_vm0, %v3771_v12  ;;  %v4400_v41 = vld [vmem:[#allocation5 + $0xe8] ss:$16 sps:$4 sm:$0xff]   ;;  %v3806_v43 = vld [vmem:[%s5020_s0 + $0x30] sm:$0xff]   ;;  %v66_v50 = vld [vmem:[%s5023_s3] sm:$0xf]  ;;  %v74_v51 = vsub.s32 1, %v69_v46 }
  0x34   :  { %225 = vmatprep.mubr.bf16.mxu0 %v5025_v0  ;;  %338 = vmatprep.mubr.bf16.mxu1 %v5025_v0  ;;  %v3799_v42 = vld [vmem:[%s5020_s0 + $0x28] sm:$0xff]   ;;  %v3813_v44 = vld [vmem:[%s5020_s0 + $0x38] sm:$0xff]   ;;  %v4470_v52 = vrot.slane %v66_v50, %v78_v47  ;;  %v4472_v53 = vrot.slane %v66_v50, %v82_v48  ;;  %v4474_v54 = vrot.slane %v66_v50, %v70_v49 }
  0x35   :  { %672 = vmatpush1.bf16.msra.mxu0 %v4307_v14  ;;  %714 = vmatprep.subr.bf16.mxu1 %v4321_v18  ;;  %v4476_v56 = vrot.slane %v66_v50, %v74_v51 }
  0x36   :  { %673 = vmatprep.subr.bf16.mxu0 %v4317_v17  ;;  %715 = vmatpush1.bf16.msra.mxu1 %v4329_v20 }
  0x37   :  { %716 = vmatprep.subr.bf16.mxu1 %v4338_v23 }
  0x39   :  { %674 = vmatpush1.bf16.msra.mxu0 %v4325_v19 }
  0x3a   :  { %675 = vmatprep.subr.bf16.mxu0 %v4333_v21  ;;  %717 = vmatpush1.bf16.msra.mxu1 %v4344_v25 }
  0x3b   :  { %3345 = vmatmul.mubr.msk.bf16.gmra.mrb[8].mxu0 %vm148_vm0, %v3778_v22  ;;  %3353 = vmatmul.mubr.msk.bf16.gmra.mrb[8].mxu1 %vm148_vm0, %v3778_v22 }
  0x3c   :  { %235 = vmatprep.mubr.bf16.mxu0 %v5025_v0  ;;  %348 = vmatprep.mubr.bf16.mxu1 %v5025_v0 }
  0x3d   :  { %676 = vmatpush1.bf16.msra.mxu0 %v4341_v24  ;;  %718 = vmatprep.subr.bf16.mxu1 %v4352_v27 }
  0x3e   :  { %677 = vmatprep.subr.bf16.mxu0 %v4348_v26  ;;  %719 = vmatpush1.bf16.msra.mxu1 %v4360_v29 }
  0x3f   :  { %720 = vmatprep.subr.bf16.mxu1 %v4366_v31 }
  0x41   :  { %678 = vmatpush1.bf16.msra.mxu0 %v4357_v28 }
  0x42   :  { %679 = vmatprep.subr.bf16.mxu0 %v4364_v30  ;;  %721 = vmatpush1.bf16.msra.mxu1 %v4375_v34 }
  0x43   :  { %3346 = vmatmul.mubr.msk.bf16.gmra.mrb[12].mxu0 %vm148_vm0, %v3785_v32  ;;  %3354 = vmatmul.mubr.msk.bf16.gmra.mrb[12].mxu1 %vm148_vm0, %v3785_v32 }
  0x44   :  { %245 = vmatprep.mubr.bf16.mxu0 %v5025_v0  ;;  %358 = vmatprep.mubr.bf16.mxu1 %v5025_v0 }
  0x45   :  { %680 = vmatpush1.bf16.msra.mxu0 %v4371_v33  ;;  %722 = vmatprep.subr.bf16.mxu1 %v4381_v36 }
  0x46   :  { %681 = vmatprep.subr.bf16.mxu0 %v4379_v35  ;;  %723 = vmatpush1.bf16.msra.mxu1 %v4387_v38 }
  0x47   :  { %724 = vmatprep.subr.bf16.mxu1 %v4391_v39 }
  0x49   :  { %682 = vmatpush1.bf16.msra.mxu0 %v4385_v37 }
  0x4a   :  { %1024 = vmatprep.subr.bf16.mxu0 %v4284_v7  ;;  %725 = vmatpush1.bf16.msra.mxu1 %v4400_v41 }
  0x4b   :  { %3347 = vmatmul.mubr.msk.bf16.gmra.mrb[16].mxu0 %vm148_vm0, %v3792_v40  ;;  %3355 = vmatmul.mubr.msk.bf16.gmra.mrb[16].mxu1 %vm148_vm0, %v3792_v40 }
  0x4c   :  { %255 = vmatprep.mubr.bf16.mxu0 %v5025_v0  ;;  %368 = vmatprep.mubr.bf16.mxu1 %v5025_v0 }
  0x4d   :  { %1067 = vmatprep.subr.bf16.mxu1 %v4297_v11 }
  0x53   :  { %3348 = vmatmul.mubr.msk.bf16.gmra.mrb[20].mxu0 %vm148_vm0, %v3799_v42  ;;  %3356 = vmatmul.mubr.msk.bf16.gmra.mrb[20].mxu1 %vm148_vm0, %v3799_v42 }
  0x54   :  { %265 = vmatprep.mubr.bf16.mxu0 %v5025_v0  ;;  %378 = vmatprep.mubr.bf16.mxu1 %v5025_v0 }
  0x5b   :  { %3349 = vmatmul.mubr.msk.bf16.gmra.mrb[24].mxu0 %vm148_vm0, %v3806_v43  ;;  %3357 = vmatmul.mubr.msk.bf16.gmra.mrb[24].mxu1 %vm148_vm0, %v3806_v43 }
  0x5c   :  { %275 = vmatprep.mubr.bf16.mxu0 %v5025_v0  ;;  %388 = vmatprep.mubr.bf16.mxu1 %v5025_v0 }
  0x63   :  { %3350 = vmatmul.mubr.msk.bf16.gmra.mrb[28].mxu0 %vm148_vm0, %v3813_v44  ;;  %3358 = vmatmul.mubr.msk.bf16.gmra.mrb[28].mxu1 %vm148_vm0, %v3813_v44 }
  0x64   :  { %699 = vmatprep.mubr.bf16.mxu0 %v5025_v0  ;;  %742 = vmatprep.mubr.bf16.mxu1 %v5025_v0 }
  0x6b   :  { %700 = vmatmul.mubr.bf16.vlgmr.msra.gmra.mrb[32].mxu0 %v5025_v0  ;;  %743 = vmatmul.mubr.bf16.vlgmr.msra.gmra.mrb[32].mxu1 %v5025_v0 }
  0x6c   :  { %1025 = vmatpush1.bf16.msra.mxu0 %v4282_v6  ;;  %1068 = vmatpush1.bf16.msra.mxu1 %v4295_v10 }
  0x6d   :  { %1026 = vmatprep.subr.bf16.mxu0 %v4291_v9  ;;  %1069 = vmatprep.subr.bf16.mxu1 %v4311_v15 }
  0x6e   :  { %1056 = vmatprep.mubr.bf16.mxu0 %v5025_v0  ;;  %1099 = vmatprep.mubr.bf16.mxu1 %v5025_v0 }
  0x70   :  { %1027 = vmatpush1.bf16.msra.mxu0 %v4287_v8  ;;  %1070 = vmatpush1.bf16.msra.mxu1 %v4314_v16 }
  0x71   :  { %1028 = vmatprep.subr.bf16.mxu0 %v4305_v13  ;;  %1071 = vmatprep.subr.bf16.mxu1 %v4321_v18 }
  0x74   :  { %1029 = vmatpush1.bf16.msra.mxu0 %v4307_v14  ;;  %1072 = vmatpush1.bf16.msra.mxu1 %v4329_v20 }
  0x75   :  { %1030 = vmatprep.subr.bf16.mxu0 %v4317_v17  ;;  %1073 = vmatprep.subr.bf16.mxu1 %v4338_v23 }
  0x78   :  { %1031 = vmatpush1.bf16.msra.mxu0 %v4325_v19  ;;  %1074 = vmatpush1.bf16.msra.mxu1 %v4344_v25 }
  0x79   :  { %1032 = vmatprep.subr.bf16.mxu0 %v4333_v21  ;;  %1075 = vmatprep.subr.bf16.mxu1 %v4352_v27 }
  0x7c   :  { %1033 = vmatpush1.bf16.msra.mxu0 %v4341_v24  ;;  %1076 = vmatpush1.bf16.msra.mxu1 %v4360_v29 }
  0x7d   :  { %1034 = vmatprep.subr.bf16.mxu0 %v4348_v26  ;;  %1077 = vmatprep.subr.bf16.mxu1 %v4366_v31 }
  0x80   :  { %1035 = vmatpush1.bf16.msra.mxu0 %v4357_v28  ;;  %1078 = vmatpush1.bf16.msra.mxu1 %v4375_v34 }
  0x81   :  { %1036 = vmatprep.subr.bf16.mxu0 %v4364_v30  ;;  %1079 = vmatprep.subr.bf16.mxu1 %v4381_v36 }
  0x84   :  { %1037 = vmatpush1.bf16.msra.mxu0 %v4371_v33  ;;  %1080 = vmatpush1.bf16.msra.mxu1 %v4387_v38 }
  0x85   :  { %1038 = vmatprep.subr.bf16.mxu0 %v4379_v35  ;;  %1081 = vmatprep.subr.bf16.mxu1 %v4391_v39 }
  0x88   :  { %1039 = vmatpush1.bf16.msra.mxu0 %v4385_v37  ;;  %1082 = vmatpush1.bf16.msra.mxu1 %v4400_v41 }
  0xfe   :  { %v207_v55 = vpop.f32.mrb[0].mxu0  ;;  %v320_v57 = vpop.f32.mrb[0].mxu1 }
  0xff   :  { %v209_v58 = vpop.f32.mrb[1].mxu0  ;;  %v321_v59 = vadd.f32 %v320_v57, %v4470_v52  ;;  %v322_v60 = vpop.f32.mrb[1].mxu1  ;;  %v208_v1 = vadd.f32 %v207_v55, %v4474_v54 }
 0x100   :  { %v211_v61 = vpop.f32.mrb[2].mxu0  ;;  %v323_v62 = vadd.f32 %v322_v60, %v4472_v53  ;;  %v324_v63 = vpop.f32.mrb[2].mxu1  ;;  %v210_v6 = vadd.f32 %v209_v58, %v4476_v56 }
 0x101   :  { %v212_v2 = vadd.f32 %v211_v61, %v4474_v54  ;;  %v213_v3 = vpop.f32.mrb[3].mxu0  ;;  %v325_v4 = vadd.f32 %v324_v63, %v4470_v52  ;;  %v326_v5 = vpop.f32.mrb[3].mxu1 }
 0x102   :  { %v214_v7 = vadd.f32 %v213_v3, %v4476_v56  ;;  %v327_v8 = vadd.f32 %v326_v5, %v4472_v53 }
 0x103   :  { %v4486_v9 = vpack.c.bf16 %v212_v2, %v208_v1  ;;  %v4488_v10 = vpack.c.bf16 %v325_v4, %v321_v59 }
 0x104   :  { %v4490_v11 = vpack.c.bf16 %v214_v7, %v210_v6  ;;  %v4492_v12 = vpack.c.bf16 %v327_v8, %v323_v62 }
 0x106   :  { %v217_v13 = vpop.f32.mrb[4].mxu0  ;;  %v330_v14 = vpop.f32.mrb[4].mxu1 }
 0x107   :  { %v218_v15 = vadd.f32 %v217_v13, %v4474_v54  ;;  %v219_v16 = vpop.f32.mrb[5].mxu0  ;;  %v331_v17 = vadd.f32 %v330_v14, %v4470_v52  ;;  %v332_v19 = vpop.f32.mrb[5].mxu1 }
 0x108   :  { %v220_v21 = vadd.f32 %v219_v16, %v4476_v56  ;;  %v221_v22 = vpop.f32.mrb[6].mxu0  ;;  %v333_v24 = vadd.f32 %v332_v19, %v4472_v53  ;;  %v334_v32 = vpop.f32.mrb[6].mxu1 }
 0x109   :  { %v222_v40 = vadd.f32 %v221_v22, %v4474_v54  ;;  %v223_v42 = vpop.f32.mrb[7].mxu0  ;;  %v335_v43 = vadd.f32 %v334_v32, %v4470_v52  ;;  %v336_v44 = vpop.f32.mrb[7].mxu1 }
 0x10a   :  { %v224_v45 = vadd.f32 %v223_v42, %v4476_v56  ;;  %v337_v46 = vadd.f32 %v336_v44, %v4472_v53 }
 0x10b   :  { %v4502_v47 = vpack.c.bf16 %v222_v40, %v218_v15  ;;  %v4504_v48 = vpack.c.bf16 %v335_v43, %v331_v17 }
 0x10c   :  { %v4506_v49 = vpack.c.bf16 %v224_v45, %v220_v21  ;;  %v4508_v50 = vpack.c.bf16 %v337_v46, %v333_v24 }
 0x10e   :  { %v227_v51 = vpop.f32.mrb[8].mxu0  ;;  %v340_v55 = vpop.f32.mrb[8].mxu1 }
 0x10f   :  { %v228_v57 = vadd.f32 %v227_v51, %v4474_v54  ;;  %v229_v58 = vpop.f32.mrb[9].mxu0  ;;  %v341_v59 = vadd.f32 %v340_v55, %v4470_v52  ;;  %v342_v60 = vpop.f32.mrb[9].mxu1 }
 0x110   :  { %v230_v61 = vadd.f32 %v229_v58, %v4476_v56  ;;  %v231_v62 = vpop.f32.mrb[10].mxu0  ;;  %v343_v63 = vadd.f32 %v342_v60, %v4472_v53  ;;  %v344_v1 = vpop.f32.mrb[10].mxu1 }
 0x111   :  { %v232_v2 = vadd.f32 %v231_v62, %v4474_v54  ;;  %v233_v3 = vpop.f32.mrb[11].mxu0  ;;  %v345_v4 = vadd.f32 %v344_v1, %v4470_v52  ;;  %v346_v5 = vpop.f32.mrb[11].mxu1 }
 0x112   :  { %v234_v6 = vadd.f32 %v233_v3, %v4476_v56  ;;  %v347_v7 = vadd.f32 %v346_v5, %v4472_v53 }
 0x113   :  { %v4518_v8 = vpack.c.bf16 %v232_v2, %v228_v57  ;;  %v4520_v13 = vpack.c.bf16 %v345_v4, %v341_v59 }
 0x114   :  { %v4522_v14 = vpack.c.bf16 %v234_v6, %v230_v61  ;;  %v4524_v15 = vpack.c.bf16 %v347_v7, %v343_v63 }
 0x116   :  { %v237_v16 = vpop.f32.mrb[12].mxu0  ;;  %v350_v17 = vpop.f32.mrb[12].mxu1 }
 0x117   :  { %v238_v19 = vadd.f32 %v237_v16, %v4474_v54  ;;  %v239_v21 = vpop.f32.mrb[13].mxu0  ;;  %v351_v22 = vadd.f32 %v350_v17, %v4470_v52  ;;  %v352_v24 = vpop.f32.mrb[13].mxu1 }
 0x118   :  { %v240_v32 = vadd.f32 %v239_v21, %v4476_v56  ;;  %v241_v40 = vpop.f32.mrb[14].mxu0  ;;  %v353_v42 = vadd.f32 %v352_v24, %v4472_v53  ;;  %v354_v43 = vpop.f32.mrb[14].mxu1 }
 0x119   :  { %v242_v44 = vadd.f32 %v241_v40, %v4474_v54  ;;  %v243_v45 = vpop.f32.mrb[15].mxu0  ;;  %v355_v46 = vadd.f32 %v354_v43, %v4470_v52  ;;  %v356_v51 = vpop.f32.mrb[15].mxu1 }
 0x11a   :  { %v244_v55 = vadd.f32 %v243_v45, %v4476_v56  ;;  %v357_v57 = vadd.f32 %v356_v51, %v4472_v53 }
 0x11b   :  { %v4534_v58 = vpack.c.bf16 %v242_v44, %v238_v19  ;;  %v4536_v59 = vpack.c.bf16 %v355_v46, %v351_v22 }
 0x11c   :  { %v4538_v60 = vpack.c.bf16 %v244_v55, %v240_v32  ;;  %v4540_v61 = vpack.c.bf16 %v357_v57, %v353_v42 }
 0x11e   :  { %5044 = vst [vmem:[#allocation9_spill] sm:$0xff] %v4540_v61  ;;  %v247_v62 = vpop.f32.mrb[16].mxu0  ;;  %v360_v63 = vpop.f32.mrb[16].mxu1 }
 0x11f   :  { %v248_v1 = vadd.f32 %v247_v62, %v4474_v54  ;;  %v249_v2 = vpop.f32.mrb[17].mxu0  ;;  %v361_v3 = vadd.f32 %v360_v63, %v4470_v52  ;;  %v362_v4 = vpop.f32.mrb[17].mxu1 }
 0x120   :  { %v250_v5 = vadd.f32 %v249_v2, %v4476_v56  ;;  %v251_v6 = vpop.f32.mrb[18].mxu0  ;;  %v363_v7 = vadd.f32 %v362_v4, %v4472_v53  ;;  %v364_v16 = vpop.f32.mrb[18].mxu1 }
 0x121   :  { %v252_v17 = vadd.f32 %v251_v6, %v4474_v54  ;;  %v253_v19 = vpop.f32.mrb[19].mxu0  ;;  %v365_v21 = vadd.f32 %v364_v16, %v4470_v52  ;;  %v366_v22 = vpop.f32.mrb[19].mxu1 }
 0x122   :  { %v254_v24 = vadd.f32 %v253_v19, %v4476_v56  ;;  %v367_v32 = vadd.f32 %v366_v22, %v4472_v53 }
 0x123   :  { %v4550_v40 = vpack.c.bf16 %v252_v17, %v248_v1  ;;  %v4552_v42 = vpack.c.bf16 %v365_v21, %v361_v3 }
 0x124   :  { %v4554_v43 = vpack.c.bf16 %v254_v24, %v250_v5  ;;  %v4556_v44 = vpack.c.bf16 %v367_v32, %v363_v7 }
 0x125   :  { %5045 = vst [vmem:[#allocation10_spill] sm:$0xff] %v4550_v40  ;;  %5046 = vst [vmem:[#allocation11_spill] sm:$0xff] %v4552_v42 }
 0x126   :  { %5047 = vst [vmem:[#allocation12_spill] sm:$0xff] %v4554_v43  ;;  %5048 = vst [vmem:[#allocation13_spill] sm:$0xff] %v4556_v44  ;;  %v257_v45 = vpop.f32.mrb[20].mxu0  ;;  %v370_v46 = vpop.f32.mrb[20].mxu1  ;;  %v1189_v44 = vunpack.c.h.bf16 %v4524_v15 }
 0x127   :  { %v258_v51 = vadd.f32 %v257_v45, %v4474_v54  ;;  %v259_v55 = vpop.f32.mrb[21].mxu0  ;;  %v371_v57 = vadd.f32 %v370_v46, %v4470_v52  ;;  %v372_v62 = vpop.f32.mrb[21].mxu1 }
 0x128   :  { %v260_v63 = vadd.f32 %v259_v55, %v4476_v56  ;;  %v261_v2 = vpop.f32.mrb[22].mxu0  ;;  %v373_v1 = vadd.f32 %v372_v62, %v4472_v53  ;;  %v374_v4 = vpop.f32.mrb[22].mxu1 }
 0x129   :  { %v262_v3 = vadd.f32 %v261_v2, %v4474_v54  ;;  %v263_v5 = vpop.f32.mrb[23].mxu0  ;;  %v375_v6 = vadd.f32 %v374_v4, %v4470_v52  ;;  %v376_v7 = vpop.f32.mrb[23].mxu1 }
 0x12a   :  { %v264_v16 = vadd.f32 %v263_v5, %v4476_v56  ;;  %v377_v17 = vadd.f32 %v376_v7, %v4472_v53 }
 0x12b   :  { %v4566_v19 = vpack.c.bf16 %v262_v3, %v258_v51  ;;  %v4568_v21 = vpack.c.bf16 %v375_v6, %v371_v57 }
 0x12c   :  { %v4570_v22 = vpack.c.bf16 %v264_v16, %v260_v63  ;;  %v4572_v24 = vpack.c.bf16 %v377_v17, %v373_v1 }
 0x12d   :  { %5049 = vst [vmem:[#allocation14_spill] sm:$0xff] %v4566_v19  ;;  %5050 = vst [vmem:[#allocation15_spill] sm:$0xff] %v4568_v21  ;;  %v1187_v19 = vunpack.c.h.bf16 %v4522_v14 }
 0x12e   :  { %5051 = vst [vmem:[#allocation16_spill] sm:$0xff] %v4570_v22  ;;  %5052 = vst [vmem:[#allocation17_spill] sm:$0xff] %v4572_v24  ;;  %v267_v32 = vpop.f32.mrb[24].mxu0  ;;  %v380_v45 = vpop.f32.mrb[24].mxu1 }
 0x12f   :  { %v268_v46 = vadd.f32 %v267_v32, %v4474_v54  ;;  %v269_v55 = vpop.f32.mrb[25].mxu0  ;;  %v381_v62 = vadd.f32 %v380_v45, %v4470_v52  ;;  %v382_v2 = vpop.f32.mrb[25].mxu1 }
 0x130   :  { %v270_v4 = vadd.f32 %v269_v55, %v4476_v56  ;;  %v271_v5 = vpop.f32.mrb[26].mxu0  ;;  %v383_v51 = vadd.f32 %v382_v2, %v4472_v53  ;;  %v384_v3 = vpop.f32.mrb[26].mxu1 }
 0x131   :  { %v272_v57 = vadd.f32 %v271_v5, %v4474_v54  ;;  %v273_v63 = vpop.f32.mrb[27].mxu0  ;;  %v385_v1 = vadd.f32 %v384_v3, %v4470_v52  ;;  %v386_v6 = vpop.f32.mrb[27].mxu1 }
 0x132   :  { %v274_v7 = vadd.f32 %v273_v63, %v4476_v56  ;;  %v387_v16 = vadd.f32 %v386_v6, %v4472_v53 }
 0x133   :  { %v4582_v17 = vpack.c.bf16 %v272_v57, %v268_v46  ;;  %v4584_v32 = vpack.c.bf16 %v385_v1, %v381_v62 }
 0x134   :  { %v4586_v45 = vpack.c.bf16 %v274_v7, %v270_v4  ;;  %v4588_v55 = vpack.c.bf16 %v387_v16, %v383_v51 }
 0x135   :  { %5053 = vst [vmem:[#allocation18_spill] sm:$0xff] %v4582_v17  ;;  %5054 = vst [vmem:[#allocation19_spill] sm:$0xff] %v4584_v32 }
 0x136   :  { %5055 = vst [vmem:[#allocation20_spill] sm:$0xff] %v4586_v45  ;;  %5056 = vst [vmem:[#allocation21_spill] sm:$0xff] %v4588_v55  ;;  %v277_v2 = vpop.f32.mrb[28].mxu0  ;;  %v390_v0 = vpop.f32.mrb[28].mxu1 }
 0x137   :  { %v278_v5 = vadd.f32 %v277_v2, %v4474_v54  ;;  %v279_v24 = vpop.f32.mrb[29].mxu0  ;;  %v391_v3 = vadd.f32 %v390_v0, %v4470_v52  ;;  %v392_v22 = vpop.f32.mrb[29].mxu1 }
 0x138   :  { %v280_v63 = vadd.f32 %v279_v24, %v4476_v56  ;;  %v281_v21 = vpop.f32.mrb[30].mxu0  ;;  %v393_v46 = vadd.f32 %v392_v22, %v4472_v53  ;;  %v394_v57 = vpop.f32.mrb[30].mxu1  ;;  %v467_v22 = vunpack.c.l.bf16 %v4486_v9 }
 0x139   :  { %v282_v62 = vadd.f32 %v281_v21, %v4474_v54  ;;  %v283_v4 = vpop.f32.mrb[31].mxu0  ;;  %v395_v51 = vadd.f32 %v394_v57, %v4470_v52  ;;  %v396_v1 = vpop.f32.mrb[31].mxu1  ;;  %v469_v54 = vunpack.c.l.bf16 %v4488_v10  ;;  %v468_v52 = vunpack.c.l.bf16 %v4490_v11 }
 0x13a   :  { %v284_v6 = vadd.f32 %v283_v4, %v4476_v56  ;;  %v397_v7 = vadd.f32 %v396_v1, %v4472_v53  ;;  %v470_v56 = vunpack.c.l.bf16 %v4492_v12 }
 0x13b   :  { %v4598_v16 = vpack.c.bf16 %v282_v62, %v278_v5  ;;  %v4600_v0 = vpack.c.bf16 %v395_v51, %v391_v3  ;;  %v471_v3 = vunpack.c.h.bf16 %v4486_v9 }
 0x13c   :  { %v4602_v2 = vpack.c.bf16 %v284_v6, %v280_v63  ;;  %v4604_v24 = vpack.c.bf16 %v397_v7, %v393_v46  ;;  %v473_v63 = vunpack.c.h.bf16 %v4488_v10  ;;  %v472_v6 = vunpack.c.h.bf16 %v4490_v11 }
 0x13d   :  { %5057 = vst [vmem:[#allocation22_spill] sm:$0xff] %v4598_v16  ;;  %5058 = vst [vmem:[#allocation23_spill] sm:$0xff] %v4600_v0  ;;  %v474_v7 = vunpack.c.h.bf16 %v4492_v12 }
 0x13e   :  { %5059 = vst [vmem:[#allocation24_spill] sm:$0xff] %v4602_v2  ;;  %5060 = vst [vmem:[#allocation25_spill] sm:$0xff] %v4604_v24  ;;  %v701_v21 = vpop.f32.mrb[32].mxu0  ;;  %v744_v55 = vpop.f32.mrb[32].mxu1 }
 0x13f   :  { %v753_v57 = vadd.f32 %v701_v21, %v467_v22  ;;  %v755_v53 = vadd.f32 %v744_v55, %v469_v54  ;;  %v703_v5 = vpop.f32.mrb[33].mxu0  ;;  %v746_v62 = vpop.f32.mrb[33].mxu1 }
 0x140   :  { %v754_v46 = vadd.f32 %v703_v5, %v468_v52  ;;  %v756_v4 = vadd.f32 %v746_v62, %v470_v56  ;;  %v705_v51 = vpop.f32.mrb[34].mxu0  ;;  %v748_v1 = vpop.f32.mrb[34].mxu1 }
 0x141   :  { %v3391_v24 = vmul.f32 -1.442695, %v753_v57  ;;  %v757_v2 = vadd.f32 %v705_v51, %v471_v3  ;;  %v759_v0 = vadd.f32 %v748_v1, %v473_v63  ;;  %v707_v16 = vpop.f32.mrb[35].mxu0  ;;  %v750_v22 = vpop.f32.mrb[35].mxu1 }
 0x142   :  { %v3393_v55 = vmul.f32 -1.442695, %v754_v46  ;;  %v758_v54 = vadd.f32 %v707_v16, %v472_v6  ;;  %v760_v21 = vadd.f32 %v750_v22, %v474_v7  ;;  %v3395_v52 = vmul.f32 -1.442695, %v756_v4 }
 0x143   :  { %3919 = vpow2.f32 %v3391_v24  ;;  %v3392_v9 = vmul.f32 -1.442695, %v757_v2 }
 0x144   :  { %3921 = vpow2.f32 %v3393_v55  ;;  %v3394_v10 = vmul.f32 -1.442695, %v758_v54  ;;  %v3396_v12 = vmul.f32 -1.442695, %v760_v21 }
 0x145   :  { %3923 = vpow2.f32 %v3392_v9 }
 0x146   :  { %3925 = vpow2.f32 %v3394_v10 }
 0x147   :  { %3927 = vtanh.f32 %v755_v53 }
 0x148   :  { %3929 = vpow2.f32 %v3395_v52 }
 0x149   :  { %3931 = vtanh.f32 %v759_v0 }
 0x14d   :  { %v3920_v56 = vpop.eup %3919 }
 0x14e   :  { %v3922_v11 = vpop.eup %3921  ;;  %v767_v5 = vadd.f32 1.0, %v3920_v56 }
 0x14f   :  { %v779_v57 = vadd.f32 1.0, %v3922_v11  ;;  %v3924_v62 = vpop.eup %3923 }
 0x150   :  { %3933 = vrcp.f32 %v767_v5  ;;  %v768_v16 = vadd.f32 1.0, %v3924_v62  ;;  %v3926_v3 = vpop.eup %3925 }
 0x151   :  { %3935 = vrcp.f32 %v779_v57  ;;  %v780_v2 = vadd.f32 1.0, %v3926_v3  ;;  %v3928_v24 = vpop.eup %3927  ;;  %v4625_v3 = vld [vmem:[#allocation5 + $0x4] ss:$16 sps:$4 sm:$0xff]  }
 0x152   :  { %3937 = vpow2.f32 %v3396_v12  ;;  %v3930_v63 = vpop.eup %3929  ;;  %1382 = vmatprep.subr.bf16.mxu0 %v4625_v3 }
 0x153   :  { %3939 = vrcp.f32 %v768_v16  ;;  %v3932_v46 = vpop.eup %3931  ;;  %v793_v22 = vadd.f32 1.0, %v3930_v63  ;;  %v5061_v16 = vmov 0   ;;  %v4631_v63 = vld [vmem:[#allocation5 + $0x8] ss:$16 sps:$4 sm:$0xff]  }
 0x154   :  { %3941 = vrcp.f32 %v780_v2  ;;  %v4627_v2 = vld [vmem:[#allocation5 + $0xc] ss:$16 sps:$4 sm:$0xff]  }
 0x155   :  { %3943 = vrcp.f32 %v793_v22  ;;  %1425 = vmatprep.subr.bf16.mxu1 %v4627_v2  ;;  %v4660_v22 = vld [vmem:[#allocation5 + $0x60] ss:$16 sps:$4 sm:$0xff]  }
 0x15a   :  { %v3934_v4 = vpop.eup %3933 }
 0x15b   :  { %v3936_v53 = vpop.eup %3935  ;;  %v801_v51 = vmul.f32 %v3934_v4, %v3928_v24  ;;  %v4629_v24 = vld [vmem:[#allocation5] ss:$16 sps:$4 sm:$0xff]   ;;  %v4639_v4 = vld [vmem:[#allocation5 + $0x2c] ss:$16 sps:$4 sm:$0xff]  }
 0x15c   :  { %v3938_v1 = vpop.eup %3937  ;;  %v799_v6 = vmul.f32 0.0, %v3936_v53  ;;  %v4641_v53 = vld [vmem:[#allocation5 + $0x20] ss:$16 sps:$4 sm:$0xff]  }
 0x15d   :  { %v3940_v7 = vpop.eup %3939  ;;  %v794_v21 = vadd.f32 1.0, %v3938_v1  ;;  %v4649_v1 = vld [vmem:[#allocation5 + $0x44] ss:$16 sps:$4 sm:$0xff]  }
 0x15e   :  { %v4614_v0 = vadd.f32 %v801_v51, %v799_v6  ;;  %v802_v55 = vmul.f32 %v3940_v7, %v3932_v46  ;;  %v3942_v54 = vpop.eup %3941  ;;  %v4637_v46 = vld [vmem:[#allocation5 + $0x24] ss:$16 sps:$4 sm:$0xff]   ;;  %v4643_v51 = vld [vmem:[#allocation5 + $0x28] ss:$16 sps:$4 sm:$0xff]   ;;  %v4652_v6 = vld [vmem:[#allocation5 + $0x40] ss:$16 sps:$4 sm:$0xff]  }
 0x15f   :  { %v800_v9 = vmul.f32 0.0, %v3942_v54  ;;  %v3944_v52 = vpop.eup %3943  ;;  %v4657_v7 = vld [vmem:[#allocation5 + $0x64] ss:$16 sps:$4 sm:$0xff]   ;;  %v831_v54 = vunpack.c.h.bf16 %v4508_v50 }
 0x160   :  { %3945 = vtanh.f32 %v4614_v0 }
 0x161   :  { %v4617_v10 = vadd.f32 %v802_v55, %v800_v9  ;;  %3947 = vrcp.f32 %v794_v21  ;;  %v4668_v55 = vld [vmem:[#allocation5 + $0x80] ss:$16 sps:$4 sm:$0xff]  }
 0x163   :  { %3949 = vtanh.f32 %v4617_v10 }
 0x16a   :  { %v3946_v56 = vpop.eup %3945 }
 0x16b   :  { %v3948_v11 = vpop.eup %3947  ;;  %v807_v12 = vmul.f32 %v3946_v56, %v3944_v52 }
 0x16d   :  { %v3950_v5 = vpop.eup %3949 }
 0x16e   :  { %v808_v57 = vmul.f32 %v3950_v5, %v3948_v11 }
 0x170   :  { %v809_v62 = vpack.c.bf16 %v808_v57, %v807_v12 }
 0x172   :  { %3713 = vst [vmem:[%s5024_s4] sm:$0xff] %v809_v62   ;;  %1057 = vmatmul.mubr.bf16.vlgmr.msra.gmra.mrb[36].mxu0 %v809_v62  ;;  %1100 = vmatmul.mubr.bf16.vlgmr.msra.gmra.mrb[36].mxu1 %v809_v62 }
 0x173   :  { %1414 = vmatprep.mubr.bf16.mxu0 %v5061_v16  ;;  %1457 = vmatprep.mubr.bf16.mxu1 %v5061_v16 }
 0x174   :  { %1383 = vmatpush1.bf16.msra.mxu0 %v4629_v24  ;;  %1426 = vmatpush1.bf16.msra.mxu1 %v4631_v63 }
 0x175   :  { %1384 = vmatprep.subr.bf16.mxu0 %v4637_v46  ;;  %1427 = vmatprep.subr.bf16.mxu1 %v4639_v4 }
 0x178   :  { %1385 = vmatpush1.bf16.msra.mxu0 %v4641_v53  ;;  %1428 = vmatpush1.bf16.msra.mxu1 %v4643_v51 }
 0x179   :  { %1429 = vmatprep.subr.bf16.mxu1 %v4321_v18  ;;  %1386 = vmatprep.subr.bf16.mxu0 %v4649_v1  ;;  %v4665_v18 = vld [vmem:[#allocation5 + $0x84] ss:$16 sps:$4 sm:$0xff]  }
 0x17c   :  { %1387 = vmatpush1.bf16.msra.mxu0 %v4652_v6  ;;  %1430 = vmatpush1.bf16.msra.mxu1 %v4329_v20  ;;  %v824_v20 = vunpack.c.l.bf16 %v4502_v47 }
 0x17d   :  { %1431 = vmatprep.subr.bf16.mxu1 %v4338_v23  ;;  %1388 = vmatprep.subr.bf16.mxu0 %v4657_v7  ;;  %v826_v23 = vunpack.c.l.bf16 %v4504_v48 }
 0x180   :  { %1389 = vmatpush1.bf16.msra.mxu0 %v4660_v22  ;;  %1432 = vmatpush1.bf16.msra.mxu1 %v4344_v25 }
 0x181   :  { %1433 = vmatprep.subr.bf16.mxu1 %v4352_v27  ;;  %1390 = vmatprep.subr.bf16.mxu0 %v4665_v18  ;;  %v825_v27 = vunpack.c.l.bf16 %v4506_v49 }
 0x184   :  { %1391 = vmatpush1.bf16.msra.mxu0 %v4668_v55  ;;  %1434 = vmatpush1.bf16.msra.mxu1 %v4360_v29 }
 0x185   :  { %1392 = vmatprep.subr.bf16.mxu0 %v4348_v26  ;;  %1435 = vmatprep.subr.bf16.mxu1 %v4366_v31 }
 0x188   :  { %1393 = vmatpush1.bf16.msra.mxu0 %v4357_v28  ;;  %1436 = vmatpush1.bf16.msra.mxu1 %v4375_v34  ;;  %v827_v28 = vunpack.c.l.bf16 %v4508_v50  ;;  %v828_v34 = vunpack.c.h.bf16 %v4502_v47 }
 0x189   :  { %1394 = vmatprep.subr.bf16.mxu0 %v4364_v30  ;;  %1437 = vmatprep.subr.bf16.mxu1 %v4381_v36 }
 0x18c   :  { %1395 = vmatpush1.bf16.msra.mxu0 %v4371_v33  ;;  %1438 = vmatpush1.bf16.msra.mxu1 %v4387_v38 }
 0x18d   :  { %1396 = vmatprep.subr.bf16.mxu0 %v4379_v35  ;;  %1439 = vmatprep.subr.bf16.mxu1 %v4391_v39  ;;  %v830_v35 = vunpack.c.h.bf16 %v4504_v48 }
 0x190   :  { %1397 = vmatpush1.bf16.msra.mxu0 %v4385_v37  ;;  %1440 = vmatpush1.bf16.msra.mxu1 %v4400_v41  ;;  %v829_v41 = vunpack.c.h.bf16 %v4506_v49 }
 0x191   :  { %1740 = vmatprep.subr.bf16.mxu0 %v4625_v3  ;;  %1783 = vmatprep.subr.bf16.mxu1 %v4627_v2 }
 0x245   :  { %v1058_v25 = vpop.f32.mrb[36].mxu0  ;;  %v1101_v26 = vpop.f32.mrb[36].mxu1 }
 0x246   :  { %v1110_v29 = vadd.f32 %v1058_v25, %v824_v20  ;;  %v1112_v30 = vadd.f32 %v1101_v26, %v826_v23  ;;  %v1060_v31 = vpop.f32.mrb[37].mxu0  ;;  %v1103_v33 = vpop.f32.mrb[37].mxu1 }
 0x247   :  { %v1111_v36 = vadd.f32 %v1060_v31, %v825_v27  ;;  %v1113_v37 = vadd.f32 %v1103_v33, %v827_v28  ;;  %v1062_v38 = vpop.f32.mrb[38].mxu0  ;;  %v1105_v39 = vpop.f32.mrb[38].mxu1 }
 0x248   :  { %v3431_v21 = vmul.f32 -1.442695, %v1110_v29  ;;  %v1114_v9 = vadd.f32 %v1062_v38, %v828_v34  ;;  %v1116_v52 = vadd.f32 %v1105_v39, %v830_v35  ;;  %v1064_v56 = vpop.f32.mrb[39].mxu0  ;;  %v1107_v11 = vpop.f32.mrb[39].mxu1 }
 0x249   :  { %v3433_v5 = vmul.f32 -1.442695, %v1111_v36  ;;  %v1115_v12 = vadd.f32 %v1064_v56, %v829_v41  ;;  %v1117_v57 = vadd.f32 %v1107_v11, %v831_v54  ;;  %v3435_v62 = vmul.f32 -1.442695, %v1113_v37 }
 0x24a   :  { %3951 = vpow2.f32 %v3431_v21  ;;  %v3432_v47 = vmul.f32 -1.442695, %v1114_v9 }
 0x24b   :  { %3953 = vpow2.f32 %v3433_v5  ;;  %v3434_v48 = vmul.f32 -1.442695, %v1115_v12  ;;  %v3436_v50 = vmul.f32 -1.442695, %v1117_v57 }
 0x24c   :  { %3955 = vpow2.f32 %v3432_v47 }
 0x24d   :  { %3957 = vpow2.f32 %v3434_v48 }
 0x24e   :  { %3959 = vtanh.f32 %v1112_v30 }
 0x24f   :  { %3961 = vpow2.f32 %v3435_v62 }
 0x250   :  { %3963 = vtanh.f32 %v1116_v52 }
 0x254   :  { %v3952_v20 = vpop.eup %3951 }
 0x255   :  { %v3954_v49 = vpop.eup %3953  ;;  %v1124_v23 = vadd.f32 1.0, %v3952_v20  ;;  %v4722_v20 = vld [vmem:[#allocation5 + $0x48] ss:$16 sps:$4 sm:$0xff]  }
 0x256   :  { %v1136_v25 = vadd.f32 1.0, %v3954_v49  ;;  %v3956_v26 = vpop.eup %3955  ;;  %v4726_v49 = vld [vmem:[#allocation5 + $0x6c] ss:$16 sps:$4 sm:$0xff]  }
 0x257   :  { %3965 = vrcp.f32 %v1124_v23  ;;  %v1125_v27 = vadd.f32 1.0, %v3956_v26  ;;  %v3958_v28 = vpop.eup %3957  ;;  %v4728_v23 = vld [vmem:[#allocation5 + $0x68] ss:$16 sps:$4 sm:$0xff]   ;;  %v4736_v26 = vld [vmem:[#allocation5 + $0xa0] ss:$16 sps:$4 sm:$0xff]  }
 0x258   :  { %3967 = vrcp.f32 %v1136_v25  ;;  %v1137_v29 = vadd.f32 1.0, %v3958_v28  ;;  %v3960_v31 = vpop.eup %3959  ;;  %v4734_v25 = vld [vmem:[#allocation5 + $0x88] ss:$16 sps:$4 sm:$0xff]   ;;  %v4741_v28 = vld [vmem:[#allocation5 + $0xac] ss:$16 sps:$4 sm:$0xff]  }
 0x259   :  { %3969 = vpow2.f32 %v3436_v50  ;;  %v3962_v33 = vpop.eup %3961  ;;  %v4732_v50 = vld [vmem:[#allocation5 + $0x8c] ss:$16 sps:$4 sm:$0xff]  }
 0x25a   :  { %3971 = vrcp.f32 %v1125_v27  ;;  %v3964_v34 = vpop.eup %3963  ;;  %v1150_v41 = vadd.f32 1.0, %v3962_v33  ;;  %v4738_v27 = vld [vmem:[#allocation5 + $0xa4] ss:$16 sps:$4 sm:$0xff]   ;;  %v4751_v33 = vld [vmem:[#allocation5 + $0xc0] ss:$16 sps:$4 sm:$0xff]  }
 0x25b   :  { %3973 = vrcp.f32 %v1137_v29  ;;  %v4745_v29 = vld [vmem:[#allocation5 + $0xa8] ss:$16 sps:$4 sm:$0xff]  }
 0x25c   :  { %3975 = vrcp.f32 %v1150_v41  ;;  %v1184_v41 = vunpack.c.l.bf16 %v4520_v13 }
 0x261   :  { %v3966_v35 = vpop.eup %3965 }
 0x262   :  { %v3968_v30 = vpop.eup %3967  ;;  %v1158_v36 = vmul.f32 %v3966_v35, %v3960_v31  ;;  %v4747_v31 = vld [vmem:[#allocation5 + $0xc4] ss:$16 sps:$4 sm:$0xff]  }
 0x263   :  { %v3970_v37 = vpop.eup %3969  ;;  %v1156_v38 = vmul.f32 %v3968_v30, %v4614_v0  ;;  %v4756_v35 = vld [vmem:[#allocation5 + $0xe4] ss:$16 sps:$4 sm:$0xff]   ;;  %v4759_v30 = vld [vmem:[#allocation5 + $0xc8] ss:$16 sps:$4 sm:$0xff]  }
 0x264   :  { %v3972_v39 = vpop.eup %3971  ;;  %v1151_v52 = vadd.f32 1.0, %v3970_v37  ;;  %v4765_v37 = vld [vmem:[#allocation5 + $0xec] ss:$16 sps:$4 sm:$0xff]  }
 0x265   :  { %v4696_v54 = vadd.f32 %v1158_v36, %v1156_v38  ;;  %v1159_v21 = vmul.f32 %v3972_v39, %v3964_v34  ;;  %v3974_v9 = vpop.eup %3973  ;;  %v4753_v34 = vld [vmem:[#allocation5 + $0xcc] ss:$16 sps:$4 sm:$0xff]   ;;  %v4763_v36 = vld [vmem:[#allocation5 + $0xe0] ss:$16 sps:$4 sm:$0xff]   ;;  %v4769_v38 = vld [vmem:[#allocation5 + $0xe8] ss:$16 sps:$4 sm:$0xff]   ;;  %v1182_v39 = vunpack.c.l.bf16 %v4518_v8 }
 0x266   :  { %v1157_v56 = vmul.f32 %v3974_v9, %v4617_v10  ;;  %v3976_v5 = vpop.eup %3975  ;;  %v4720_v10 = vld [vmem:[#allocation5 + $0x4c] ss:$16 sps:$4 sm:$0xff]  }
 0x267   :  { %3977 = vtanh.f32 %v4696_v54 }
 0x268   :  { %v4700_v11 = vadd.f32 %v1159_v21, %v1157_v56  ;;  %3979 = vrcp.f32 %v1151_v52  ;;  %v1183_v52 = vunpack.c.l.bf16 %v4522_v14  ;;  %v1185_v56 = vunpack.c.l.bf16 %v4524_v15 }
 0x26a   :  { %3981 = vtanh.f32 %v4700_v11 }
 0x271   :  { %v3978_v12 = vpop.eup %3977 }
 0x272   :  { %v3980_v0 = vpop.eup %3979  ;;  %v1164_v47 = vmul.f32 %v3978_v12, %v3976_v5 }
 0x274   :  { %v3982_v57 = vpop.eup %3981 }
 0x275   :  { %v1165_v48 = vmul.f32 %v3982_v57, %v3980_v0 }
 0x277   :  { %v1166_v62 = vpack.c.bf16 %v1165_v48, %v1164_v47  ;;  %v1186_v47 = vunpack.c.h.bf16 %v4518_v8  ;;  %v1188_v48 = vunpack.c.h.bf16 %v4520_v13 }
 0x279   :  { %3749 = vst [vmem:[%s5024_s4 + $0x8] sm:$0xff] %v1166_v62   ;;  %1415 = vmatmul.mubr.bf16.vlgmr.msra.gmra.mrb[40].mxu0 %v1166_v62  ;;  %1458 = vmatmul.mubr.bf16.vlgmr.msra.gmra.mrb[40].mxu1 %v1166_v62 }
 0x27a   :  { %1741 = vmatpush1.bf16.msra.mxu0 %v4629_v24  ;;  %1784 = vmatpush1.bf16.msra.mxu1 %v4631_v63 }
 0x27b   :  { %1742 = vmatprep.subr.bf16.mxu0 %v4637_v46  ;;  %1785 = vmatprep.subr.bf16.mxu1 %v4639_v4 }
 0x27c   :  { %1772 = vmatprep.mubr.bf16.mxu0 %v5061_v16  ;;  %1815 = vmatprep.mubr.bf16.mxu1 %v5061_v16 }
 0x27e   :  { %1743 = vmatpush1.bf16.msra.mxu0 %v4641_v53  ;;  %1786 = vmatpush1.bf16.msra.mxu1 %v4643_v51 }
 0x27f   :  { %1744 = vmatprep.subr.bf16.mxu0 %v4649_v1  ;;  %1787 = vmatprep.subr.bf16.mxu1 %v4720_v10 }
 0x282   :  { %1745 = vmatpush1.bf16.msra.mxu0 %v4652_v6  ;;  %1788 = vmatpush1.bf16.msra.mxu1 %v4722_v20 }
 0x283   :  { %1746 = vmatprep.subr.bf16.mxu0 %v4657_v7  ;;  %1789 = vmatprep.subr.bf16.mxu1 %v4726_v49 }
 0x286   :  { %1747 = vmatpush1.bf16.msra.mxu0 %v4660_v22  ;;  %1790 = vmatpush1.bf16.msra.mxu1 %v4728_v23 }
 0x287   :  { %1748 = vmatprep.subr.bf16.mxu0 %v4665_v18  ;;  %1791 = vmatprep.subr.bf16.mxu1 %v4732_v50 }
 0x28a   :  { %1749 = vmatpush1.bf16.msra.mxu0 %v4668_v55  ;;  %1792 = vmatpush1.bf16.msra.mxu1 %v4734_v25 }
 0x28b   :  { %1750 = vmatprep.subr.bf16.mxu0 %v4738_v27  ;;  %1793 = vmatprep.subr.bf16.mxu1 %v4741_v28 }
 0x28e   :  { %1751 = vmatpush1.bf16.msra.mxu0 %v4736_v26  ;;  %1794 = vmatpush1.bf16.msra.mxu1 %v4745_v29 }
 0x28f   :  { %1752 = vmatprep.subr.bf16.mxu0 %v4747_v31  ;;  %1795 = vmatprep.subr.bf16.mxu1 %v4753_v34 }
 0x292   :  { %1753 = vmatpush1.bf16.msra.mxu0 %v4751_v33  ;;  %1796 = vmatpush1.bf16.msra.mxu1 %v4759_v30 }
 0x293   :  { %1754 = vmatprep.subr.bf16.mxu0 %v4756_v35  ;;  %1797 = vmatprep.subr.bf16.mxu1 %v4765_v37 }
 0x296   :  { %1755 = vmatpush1.bf16.msra.mxu0 %v4763_v36  ;;  %1798 = vmatpush1.bf16.msra.mxu1 %v4769_v38 }
 0x297   :  { %2098 = vmatprep.subr.bf16.mxu0 %v4625_v3  ;;  %2141 = vmatprep.subr.bf16.mxu1 %v4627_v2 }
 0x34c   :  { %v1416_v21 = vpop.f32.mrb[40].mxu0  ;;  %v1459_v9 = vpop.f32.mrb[40].mxu1 }
 0x34d   :  { %v1468_v5 = vadd.f32 %v1416_v21, %v1182_v39  ;;  %v1470_v12 = vadd.f32 %v1459_v9, %v1184_v41  ;;  %v1418_v0 = vpop.f32.mrb[41].mxu0  ;;  %v1461_v57 = vpop.f32.mrb[41].mxu1 }
 0x34e   :  { %v1469_v62 = vadd.f32 %v1418_v0, %v1183_v52  ;;  %v1471_v45 = vadd.f32 %v1461_v57, %v1185_v56  ;;  %v1420_v32 = vpop.f32.mrb[42].mxu0  ;;  %v1463_v17 = vpop.f32.mrb[42].mxu1 }
 0x34f   :  { %v3473_v43 = vmul.f32 -1.442695, %v1468_v5  ;;  %v1472_v42 = vadd.f32 %v1420_v32, %v1186_v47  ;;  %v1474_v40 = vadd.f32 %v1463_v17, %v1188_v48  ;;  %v1422_v61 = vpop.f32.mrb[43].mxu0  ;;  %v1465_v39 = vpop.f32.mrb[43].mxu1 }
 0x350   :  { %v3475_v41 = vmul.f32 -1.442695, %v1469_v62  ;;  %v1473_v21 = vadd.f32 %v1422_v61, %v1187_v19  ;;  %v1475_v9 = vadd.f32 %v1465_v39, %v1189_v44  ;;  %v3477_v52 = vmul.f32 -1.442695, %v1471_v45 }
 0x351   :  { %3983 = vpow2.f32 %v3473_v43  ;;  %v3474_v8 = vmul.f32 -1.442695, %v1472_v42 }
 0x352   :  { %3985 = vpow2.f32 %v3475_v41  ;;  %v3476_v13 = vmul.f32 -1.442695, %v1473_v21  ;;  %v3478_v15 = vmul.f32 -1.442695, %v1475_v9 }
 0x353   :  { %3987 = vpow2.f32 %v3474_v8 }
 0x354   :  { %3989 = vpow2.f32 %v3476_v13 }
 0x355   :  { %3991 = vtanh.f32 %v1470_v12 }
 0x356   :  { %3993 = vpow2.f32 %v3477_v52 }
 0x357   :  { %3995 = vtanh.f32 %v1474_v40 }
 0x35b   :  { %v3984_v56 = vpop.eup %3983 }
 0x35c   :  { %v3986_v14 = vpop.eup %3985  ;;  %v1482_v0 = vadd.f32 1.0, %v3984_v56 }
 0x35d   :  { %v1494_v32 = vadd.f32 1.0, %v3986_v14  ;;  %v3988_v17 = vpop.eup %3987 }
 0x35e   :  { %3997 = vrcp.f32 %v1482_v0  ;;  %v1483_v61 = vadd.f32 1.0, %v3988_v17  ;;  %v3990_v44 = vpop.eup %3989  ;;  %v1542_v17 = vunpack.c.l.bf16 %v4536_v59 }
 0x35f   :  { %3999 = vrcp.f32 %v1494_v32  ;;  %v1495_v42 = vadd.f32 1.0, %v3990_v44  ;;  %v3992_v43 = vpop.eup %3991 }
 0x360   :  { %4001 = vpow2.f32 %v3478_v15  ;;  %v3994_v19 = vpop.eup %3993 }
 0x361   :  { %4003 = vrcp.f32 %v1483_v61  ;;  %v3996_v45 = vpop.eup %3995  ;;  %v1508_v40 = vadd.f32 1.0, %v3994_v19 }
 0x362   :  { %4005 = vrcp.f32 %v1495_v42  ;;  %v1541_v42 = vunpack.c.l.bf16 %v4538_v60 }
 0x363   :  { %4007 = vrcp.f32 %v1508_v40 }
 0x368   :  { %v3998_v5 = vpop.eup %3997 }
 0x369   :  { %v4000_v12 = vpop.eup %3999  ;;  %v1516_v57 = vmul.f32 %v3998_v5, %v3992_v43  ;;  %v5062_v43 = vld [vmem:[#allocation9_spill] sm:$0xff] }
 0x36a   :  { %v4002_v47 = vpop.eup %4001  ;;  %v1514_v48 = vmul.f32 %v4000_v12, %v4696_v54  ;;  %v1543_v19 = vunpack.c.l.bf16 %v5062_v43 }
 0x36b   :  { %v4004_v62 = vpop.eup %4003  ;;  %v1509_v9 = vadd.f32 1.0, %v4002_v47  ;;  %v1544_v47 = vunpack.c.h.bf16 %v4534_v58 }
 0x36c   :  { %v4785_v39 = vadd.f32 %v1516_v57, %v1514_v48  ;;  %v1517_v41 = vmul.f32 %v4004_v62, %v3996_v45  ;;  %v4006_v21 = vpop.eup %4005 }
 0x36d   :  { %v1515_v8 = vmul.f32 %v4006_v21, %v4700_v11  ;;  %v4008_v52 = vpop.eup %4007  ;;  %v1540_v11 = vunpack.c.l.bf16 %v4534_v58  ;;  %v1547_v21 = vunpack.c.h.bf16 %v5062_v43 }
 0x36e   :  { %4009 = vtanh.f32 %v4785_v39 }
 0x36f   :  { %v4789_v13 = vadd.f32 %v1517_v41, %v1515_v8  ;;  %4011 = vrcp.f32 %v1509_v9  ;;  %v1545_v41 = vunpack.c.h.bf16 %v4538_v60 }
 0x371   :  { %4013 = vtanh.f32 %v4789_v13 }
 0x378   :  { %v4010_v56 = vpop.eup %4009 }
 0x379   :  { %v4012_v54 = vpop.eup %4011  ;;  %v1522_v0 = vmul.f32 %v4010_v56, %v4008_v52 }
 0x37b   :  { %v4014_v14 = vpop.eup %4013 }
 0x37c   :  { %v1523_v15 = vmul.f32 %v4014_v14, %v4012_v54 }
 0x37e   :  { %v1524_v32 = vpack.c.bf16 %v1523_v15, %v1522_v0 }
 0x380   :  { %3750 = vst [vmem:[%s5024_s4 + $0x10] sm:$0xff] %v1524_v32   ;;  %1773 = vmatmul.mubr.bf16.vlgmr.msra.gmra.mrb[44].mxu0 %v1524_v32  ;;  %1816 = vmatmul.mubr.bf16.vlgmr.msra.gmra.mrb[44].mxu1 %v1524_v32 }
 0x381   :  { %2099 = vmatpush1.bf16.msra.mxu0 %v4629_v24  ;;  %2142 = vmatpush1.bf16.msra.mxu1 %v4631_v63 }
 0x382   :  { %2100 = vmatprep.subr.bf16.mxu0 %v4637_v46  ;;  %2143 = vmatprep.subr.bf16.mxu1 %v4639_v4 }
 0x383   :  { %2130 = vmatprep.mubr.bf16.mxu0 %v5061_v16  ;;  %2173 = vmatprep.mubr.bf16.mxu1 %v5061_v16 }
 0x385   :  { %2101 = vmatpush1.bf16.msra.mxu0 %v4641_v53  ;;  %2144 = vmatpush1.bf16.msra.mxu1 %v4643_v51 }
 0x386   :  { %2102 = vmatprep.subr.bf16.mxu0 %v4649_v1  ;;  %2145 = vmatprep.subr.bf16.mxu1 %v4720_v10 }
 0x389   :  { %2103 = vmatpush1.bf16.msra.mxu0 %v4652_v6  ;;  %2146 = vmatpush1.bf16.msra.mxu1 %v4722_v20 }
 0x38a   :  { %2104 = vmatprep.subr.bf16.mxu0 %v4657_v7  ;;  %2147 = vmatprep.subr.bf16.mxu1 %v4726_v49 }
 0x38d   :  { %2105 = vmatpush1.bf16.msra.mxu0 %v4660_v22  ;;  %2148 = vmatpush1.bf16.msra.mxu1 %v4728_v23 }
 0x38e   :  { %2106 = vmatprep.subr.bf16.mxu0 %v4665_v18  ;;  %2149 = vmatprep.subr.bf16.mxu1 %v4732_v50 }
 0x391   :  { %2107 = vmatpush1.bf16.msra.mxu0 %v4668_v55  ;;  %2150 = vmatpush1.bf16.msra.mxu1 %v4734_v25 }
 0x392   :  { %2108 = vmatprep.subr.bf16.mxu0 %v4738_v27  ;;  %2151 = vmatprep.subr.bf16.mxu1 %v4741_v28 }
 0x395   :  { %2109 = vmatpush1.bf16.msra.mxu0 %v4736_v26  ;;  %2152 = vmatpush1.bf16.msra.mxu1 %v4745_v29 }
 0x396   :  { %2110 = vmatprep.subr.bf16.mxu0 %v4747_v31  ;;  %2153 = vmatprep.subr.bf16.mxu1 %v4753_v34 }
 0x399   :  { %2111 = vmatpush1.bf16.msra.mxu0 %v4751_v33  ;;  %2154 = vmatpush1.bf16.msra.mxu1 %v4759_v30 }
 0x39a   :  { %2112 = vmatprep.subr.bf16.mxu0 %v4756_v35  ;;  %2155 = vmatprep.subr.bf16.mxu1 %v4765_v37 }
 0x39d   :  { %2113 = vmatpush1.bf16.msra.mxu0 %v4763_v36  ;;  %2156 = vmatpush1.bf16.msra.mxu1 %v4769_v38 }
 0x39e   :  { %2456 = vmatprep.subr.bf16.mxu0 %v4625_v3  ;;  %2499 = vmatprep.subr.bf16.mxu1 %v4627_v2  ;;  %v1546_v3 = vunpack.c.h.bf16 %v4536_v59 }
 0x453   :  { %v1774_v61 = vpop.f32.mrb[44].mxu0  ;;  %v1817_v44 = vpop.f32.mrb[44].mxu1 }
 0x454   :  { %v1826_v45 = vadd.f32 %v1774_v61, %v1540_v11  ;;  %v1828_v5 = vadd.f32 %v1817_v44, %v1542_v17  ;;  %v1776_v12 = vpop.f32.mrb[45].mxu0  ;;  %v1819_v57 = vpop.f32.mrb[45].mxu1 }
 0x455   :  { %v1827_v48 = vadd.f32 %v1776_v12, %v1541_v42  ;;  %v1829_v2 = vadd.f32 %v1819_v57, %v1543_v19  ;;  %v1778_v62 = vpop.f32.mrb[46].mxu0  ;;  %v1821_v40 = vpop.f32.mrb[46].mxu1 }
 0x456   :  { %v3515_v9 = vmul.f32 -1.442695, %v1826_v45  ;;  %v1830_v8 = vadd.f32 %v1778_v62, %v1544_v47  ;;  %v1832_v52 = vadd.f32 %v1821_v40, %v1546_v3  ;;  %v1780_v56 = vpop.f32.mrb[47].mxu0  ;;  %v1823_v54 = vpop.f32.mrb[47].mxu1 }
 0x457   :  { %v3517_v14 = vmul.f32 -1.442695, %v1827_v48  ;;  %v1831_v0 = vadd.f32 %v1780_v56, %v1545_v41  ;;  %v1833_v15 = vadd.f32 %v1823_v54, %v1547_v21  ;;  %v3519_v32 = vmul.f32 -1.442695, %v1829_v2 }
 0x458   :  { %4015 = vpow2.f32 %v3515_v9  ;;  %v3516_v58 = vmul.f32 -1.442695, %v1830_v8 }
 0x459   :  { %4017 = vpow2.f32 %v3517_v14  ;;  %v3518_v59 = vmul.f32 -1.442695, %v1831_v0  ;;  %v3520_v61 = vmul.f32 -1.442695, %v1833_v15 }
 0x45a   :  { %4019 = vpow2.f32 %v3516_v58 }
 0x45b   :  { %4021 = vpow2.f32 %v3518_v59 }
 0x45c   :  { %4023 = vtanh.f32 %v1828_v5 }
 0x45d   :  { %4025 = vpow2.f32 %v3519_v32 }
 0x45e   :  { %4027 = vtanh.f32 %v1832_v52 }
 0x462   :  { %v4016_v11 = vpop.eup %4015 }
 0x463   :  { %v4018_v60 = vpop.eup %4017  ;;  %v1840_v17 = vadd.f32 1.0, %v4016_v11 }
 0x464   :  { %v1852_v44 = vadd.f32 1.0, %v4018_v60  ;;  %v4020_v42 = vpop.eup %4019 }
 0x465   :  { %4029 = vrcp.f32 %v1840_v17  ;;  %v1841_v43 = vadd.f32 1.0, %v4020_v42  ;;  %v4022_v19 = vpop.eup %4021 }
 0x466   :  { %4031 = vrcp.f32 %v1852_v44  ;;  %v1853_v45 = vadd.f32 1.0, %v4022_v19  ;;  %v4024_v12 = vpop.eup %4023 }
 0x467   :  { %4033 = vpow2.f32 %v3520_v61  ;;  %v4026_v57 = vpop.eup %4025 }
 0x468   :  { %4035 = vrcp.f32 %v1841_v43  ;;  %v4028_v47 = vpop.eup %4027  ;;  %v1866_v41 = vadd.f32 1.0, %v4026_v57 }
 0x469   :  { %4037 = vrcp.f32 %v1853_v45 }
 0x46a   :  { %4039 = vrcp.f32 %v1866_v41 }
 0x46f   :  { %v4030_v3 = vpop.eup %4029 }
 0x470   :  { %v4032_v5 = vpop.eup %4031  ;;  %v1874_v48 = vmul.f32 %v4030_v3, %v4024_v12 }
 0x471   :  { %v4034_v2 = vpop.eup %4033  ;;  %v1872_v62 = vmul.f32 %v4032_v5, %v4785_v39 }
 0x472   :  { %v4036_v40 = vpop.eup %4035  ;;  %v1867_v52 = vadd.f32 1.0, %v4034_v2 }
 0x473   :  { %v4838_v21 = vadd.f32 %v1874_v48, %v1872_v62  ;;  %v1875_v9 = vmul.f32 %v4036_v40, %v4028_v47  ;;  %v4038_v8 = vpop.eup %4037 }
 0x474   :  { %v1873_v56 = vmul.f32 %v4038_v8, %v4789_v13  ;;  %v4040_v14 = vpop.eup %4039 }
 0x475   :  { %4041 = vtanh.f32 %v4838_v21 }
 0x476   :  { %v4842_v54 = vadd.f32 %v1875_v9, %v1873_v56  ;;  %4043 = vrcp.f32 %v1867_v52 }
 0x478   :  { %4045 = vtanh.f32 %v4842_v54 }
 0x47f   :  { %v4042_v0 = vpop.eup %4041 }
 0x480   :  { %v4044_v39 = vpop.eup %4043  ;;  %v1880_v58 = vmul.f32 %v4042_v0, %v4040_v14 }
 0x482   :  { %v4046_v15 = vpop.eup %4045 }
 0x483   :  { %v1881_v59 = vmul.f32 %v4046_v15, %v4044_v39 }
 0x485   :  { %v1882_v32 = vpack.c.bf16 %v1881_v59, %v1880_v58 }
 0x487   :  { %3751 = vst [vmem:[%s5024_s4 + $0x18] sm:$0xff] %v1882_v32   ;;  %2131 = vmatmul.mubr.bf16.vlgmr.msra.gmra.mrb[48].mxu0 %v1882_v32  ;;  %2174 = vmatmul.mubr.bf16.vlgmr.msra.gmra.mrb[48].mxu1 %v1882_v32 }
 0x488   :  { %2457 = vmatpush1.bf16.msra.mxu0 %v4629_v24  ;;  %2500 = vmatpush1.bf16.msra.mxu1 %v4631_v63  ;;  %v5063_v24 = vld [vmem:[#allocation10_spill] sm:$0xff] }
 0x489   :  { %2458 = vmatprep.subr.bf16.mxu0 %v4637_v46  ;;  %2501 = vmatprep.subr.bf16.mxu1 %v4639_v4  ;;  %v1898_v63 = vunpack.c.l.bf16 %v5063_v24  ;;  %v5064_v46 = vld [vmem:[#allocation11_spill] sm:$0xff]  ;;  %v1902_v60 = vunpack.c.h.bf16 %v5063_v24 }
 0x48a   :  { %2488 = vmatprep.mubr.bf16.mxu0 %v5061_v16  ;;  %2531 = vmatprep.mubr.bf16.mxu1 %v5061_v16  ;;  %v1900_v4 = vunpack.c.l.bf16 %v5064_v46  ;;  %v1904_v17 = vunpack.c.h.bf16 %v5064_v46 }
 0x48c   :  { %2459 = vmatpush1.bf16.msra.mxu0 %v4641_v53  ;;  %2502 = vmatpush1.bf16.msra.mxu1 %v4643_v51 }
 0x48d   :  { %2460 = vmatprep.subr.bf16.mxu0 %v4649_v1  ;;  %2503 = vmatprep.subr.bf16.mxu1 %v4720_v10  ;;  %v5065_v1 = vld [vmem:[#allocation12_spill] sm:$0xff] }
 0x48e   :  { %v1903_v19 = vunpack.c.h.bf16 %v5065_v1 }
 0x490   :  { %2461 = vmatpush1.bf16.msra.mxu0 %v4652_v6  ;;  %2504 = vmatpush1.bf16.msra.mxu1 %v4722_v20  ;;  %v1899_v6 = vunpack.c.l.bf16 %v5065_v1 }
 0x491   :  { %2462 = vmatprep.subr.bf16.mxu0 %v4657_v7  ;;  %2505 = vmatprep.subr.bf16.mxu1 %v4726_v49  ;;  %v5066_v7 = vld [vmem:[#allocation13_spill] sm:$0xff] }
 0x492   :  { %v1905_v45 = vunpack.c.h.bf16 %v5066_v7 }
 0x494   :  { %2463 = vmatpush1.bf16.msra.mxu0 %v4660_v22  ;;  %2506 = vmatpush1.bf16.msra.mxu1 %v4728_v23  ;;  %v1901_v22 = vunpack.c.l.bf16 %v5066_v7 }
 0x495   :  { %2464 = vmatprep.subr.bf16.mxu0 %v4665_v18  ;;  %2507 = vmatprep.subr.bf16.mxu1 %v4732_v50 }
 0x498   :  { %2465 = vmatpush1.bf16.msra.mxu0 %v4668_v55  ;;  %2508 = vmatpush1.bf16.msra.mxu1 %v4734_v25 }
 0x499   :  { %2466 = vmatprep.subr.bf16.mxu0 %v4738_v27  ;;  %2509 = vmatprep.subr.bf16.mxu1 %v4741_v28 }
 0x49c   :  { %2467 = vmatpush1.bf16.msra.mxu0 %v4736_v26  ;;  %2510 = vmatpush1.bf16.msra.mxu1 %v4745_v29 }
 0x49d   :  { %2468 = vmatprep.subr.bf16.mxu0 %v4747_v31  ;;  %2511 = vmatprep.subr.bf16.mxu1 %v4753_v34 }
 0x4a0   :  { %2469 = vmatpush1.bf16.msra.mxu0 %v4751_v33  ;;  %2512 = vmatpush1.bf16.msra.mxu1 %v4759_v30 }
 0x4a1   :  { %2470 = vmatprep.subr.bf16.mxu0 %v4756_v35  ;;  %2513 = vmatprep.subr.bf16.mxu1 %v4765_v37 }
 0x4a4   :  { %2471 = vmatpush1.bf16.msra.mxu0 %v4763_v36  ;;  %2514 = vmatpush1.bf16.msra.mxu1 %v4769_v38 }
 0x55a   :  { %v2132_v53 = vpop.f32.mrb[48].mxu0  ;;  %v2175_v51 = vpop.f32.mrb[48].mxu1 }
 0x55b   :  { %v2184_v18 = vadd.f32 %v2132_v53, %v1898_v63  ;;  %v2186_v55 = vadd.f32 %v2175_v51, %v1900_v4  ;;  %v2134_v13 = vpop.f32.mrb[49].mxu0  ;;  %v2177_v11 = vpop.f32.mrb[49].mxu1 }
 0x55c   :  { %v2185_v61 = vadd.f32 %v2134_v13, %v1899_v6  ;;  %v2187_v44 = vadd.f32 %v2177_v11, %v1901_v22  ;;  %v2136_v42 = vpop.f32.mrb[50].mxu0  ;;  %v2179_v43 = vpop.f32.mrb[50].mxu1 }
 0x55d   :  { %v3557_v12 = vmul.f32 -1.442695, %v2184_v18  ;;  %v2188_v57 = vadd.f32 %v2136_v42, %v1902_v60  ;;  %v2190_v47 = vadd.f32 %v2179_v43, %v1904_v17  ;;  %v2138_v3 = vpop.f32.mrb[51].mxu0  ;;  %v2181_v5 = vpop.f32.mrb[51].mxu1 }
 0x55e   :  { %v3559_v48 = vmul.f32 -1.442695, %v2185_v61  ;;  %v2189_v2 = vadd.f32 %v2138_v3, %v1903_v19  ;;  %v2191_v62 = vadd.f32 %v2181_v5, %v1905_v45  ;;  %v3561_v9 = vmul.f32 -1.442695, %v2187_v44  ;;  %v3876_v45 = vld [vmem:[#allocation5 + $0xc] ss:$16 sps:$4 sm:$0xff]  }
 0x55f   :  { %4047 = vpow2.f32 %v3557_v12  ;;  %v3558_v40 = vmul.f32 -1.442695, %v2188_v57  ;;  %v4901_v12 = vld [vmem:[#allocation5] ss:$16 sps:$4 sm:$0xff]   ;;  %v4903_v57 = vld [vmem:[#allocation5 + $0x8] ss:$16 sps:$4 sm:$0xff]   ;;  %2857 = vmatprep.subr.bf16.mxu1 %v3876_v45 }
 0x560   :  { %4049 = vpow2.f32 %v3559_v48  ;;  %v3560_v41 = vmul.f32 -1.442695, %v2189_v2  ;;  %v3562_v14 = vmul.f32 -1.442695, %v2191_v62  ;;  %v4909_v3 = vld [vmem:[#allocation5 + $0x2c] ss:$16 sps:$4 sm:$0xff]  }
 0x561   :  { %4051 = vpow2.f32 %v3558_v40  ;;  %v4911_v5 = vld [vmem:[#allocation5 + $0x20] ss:$16 sps:$4 sm:$0xff]   ;;  %v4913_v48 = vld [vmem:[#allocation5 + $0x28] ss:$16 sps:$4 sm:$0xff]   ;;  %v4919_v2 = vld [vmem:[#allocation5 + $0x44] ss:$16 sps:$4 sm:$0xff]  }
 0x562   :  { %4053 = vpow2.f32 %v3560_v41  ;;  %v4922_v62 = vld [vmem:[#allocation5 + $0x40] ss:$16 sps:$4 sm:$0xff]   ;;  %v4927_v40 = vld [vmem:[#allocation5 + $0x64] ss:$16 sps:$4 sm:$0xff]  }
 0x563   :  { %4055 = vtanh.f32 %v2186_v55  ;;  %v4930_v41 = vld [vmem:[#allocation5 + $0x60] ss:$16 sps:$4 sm:$0xff]  }
 0x564   :  { %4057 = vpow2.f32 %v3561_v9  ;;  %v4938_v9 = vld [vmem:[#allocation5 + $0x80] ss:$16 sps:$4 sm:$0xff]  }
 0x565   :  { %4059 = vtanh.f32 %v2190_v47  ;;  %v4907_v47 = vld [vmem:[#allocation5 + $0x24] ss:$16 sps:$4 sm:$0xff]  }
 0x569   :  { %v4048_v8 = vpop.eup %4047 }
 0x56a   :  { %v4050_v52 = vpop.eup %4049  ;;  %v2198_v56 = vadd.f32 1.0, %v4048_v8 }
 0x56b   :  { %v2210_v0 = vadd.f32 1.0, %v4050_v52  ;;  %v4052_v39 = vpop.eup %4051 }
 0x56c   :  { %4061 = vrcp.f32 %v2198_v56  ;;  %v2199_v15 = vadd.f32 1.0, %v4052_v39  ;;  %v4054_v58 = vpop.eup %4053 }
 0x56d   :  { %4063 = vrcp.f32 %v2210_v0  ;;  %v2211_v59 = vadd.f32 1.0, %v4054_v58  ;;  %v4056_v32 = vpop.eup %4055 }
 0x56e   :  { %4065 = vpow2.f32 %v3562_v14  ;;  %v4058_v24 = vpop.eup %4057 }
 0x56f   :  { %4067 = vrcp.f32 %v2199_v15  ;;  %v4060_v63 = vpop.eup %4059  ;;  %v2224_v7 = vadd.f32 1.0, %v4058_v24 }
 0x570   :  { %4069 = vrcp.f32 %v2211_v59 }
 0x571   :  { %4071 = vrcp.f32 %v2224_v7 }
 0x576   :  { %v4062_v46 = vpop.eup %4061 }
 0x577   :  { %v4064_v4 = vpop.eup %4063  ;;  %v2232_v53 = vmul.f32 %v4062_v46, %v4056_v32 }
 0x578   :  { %v4066_v51 = vpop.eup %4065  ;;  %v2230_v1 = vmul.f32 %v4064_v4, %v4838_v21 }
 0x579   :  { %v4068_v6 = vpop.eup %4067  ;;  %v2225_v13 = vadd.f32 1.0, %v4066_v51 }
 0x57a   :  { %v4889_v22 = vadd.f32 %v2232_v53, %v2230_v1  ;;  %v2233_v18 = vmul.f32 %v4068_v6, %v4060_v63  ;;  %v4070_v55 = vpop.eup %4069 }
 0x57b   :  { %v2231_v11 = vmul.f32 %v4070_v55, %v4842_v54  ;;  %v4072_v17 = vpop.eup %4071  ;;  %v3873_v54 = vld [vmem:[#allocation5 + $0x4] ss:$16 sps:$4 sm:$0xff]  }
 0x57c   :  { %4073 = vtanh.f32 %v4889_v22  ;;  %2814 = vmatprep.subr.bf16.mxu0 %v3873_v54 }
 0x57d   :  { %v4893_v60 = vadd.f32 %v2233_v18, %v2231_v11  ;;  %4075 = vrcp.f32 %v2225_v13 }
 0x57f   :  { %4077 = vtanh.f32 %v4893_v60 }
 0x586   :  { %v4074_v61 = vpop.eup %4073 }
 0x587   :  { %v4076_v21 = vpop.eup %4075  ;;  %v2238_v42 = vmul.f32 %v4074_v61, %v4072_v17 }
 0x589   :  { %v4078_v44 = vpop.eup %4077 }
 0x58a   :  { %v2239_v43 = vmul.f32 %v4078_v44, %v4076_v21 }
 0x58c   :  { %v2240_v19 = vpack.c.bf16 %v2239_v43, %v2238_v42 }
 0x58e   :  { %3752 = vst [vmem:[%s5024_s4 + $0x20] sm:$0xff] %v2240_v19   ;;  %2489 = vmatmul.mubr.bf16.vlgmr.msra.gmra.mrb[52].mxu0 %v2240_v19  ;;  %2532 = vmatmul.mubr.bf16.vlgmr.msra.gmra.mrb[52].mxu1 %v2240_v19 }
 0x58f   :  { %2846 = vmatprep.mubr.bf16.mxu0 %v5061_v16  ;;  %2889 = vmatprep.mubr.bf16.mxu1 %v5061_v16 }
 0x590   :  { %2815 = vmatpush1.bf16.msra.mxu0 %v4901_v12  ;;  %2858 = vmatpush1.bf16.msra.mxu1 %v4903_v57 }
 0x591   :  { %2816 = vmatprep.subr.bf16.mxu0 %v4907_v47  ;;  %2859 = vmatprep.subr.bf16.mxu1 %v4909_v3 }
 0x594   :  { %2817 = vmatpush1.bf16.msra.mxu0 %v4911_v5  ;;  %2860 = vmatpush1.bf16.msra.mxu1 %v4913_v48 }
 0x595   :  { %2861 = vmatprep.subr.bf16.mxu1 %v4720_v10  ;;  %2818 = vmatprep.subr.bf16.mxu0 %v4919_v2  ;;  %v4935_v10 = vld [vmem:[#allocation5 + $0x84] ss:$16 sps:$4 sm:$0xff]  }
 0x598   :  { %2819 = vmatpush1.bf16.msra.mxu0 %v4922_v62  ;;  %2862 = vmatpush1.bf16.msra.mxu1 %v4722_v20  ;;  %v5067_v20 = vld [vmem:[#allocation14_spill] sm:$0xff] }
 0x599   :  { %2863 = vmatprep.subr.bf16.mxu1 %v4726_v49  ;;  %2820 = vmatprep.subr.bf16.mxu0 %v4927_v40  ;;  %v2256_v49 = vunpack.c.l.bf16 %v5067_v20 }
 0x59c   :  { %2821 = vmatpush1.bf16.msra.mxu0 %v4930_v41  ;;  %2864 = vmatpush1.bf16.msra.mxu1 %v4728_v23  ;;  %v5068_v23 = vld [vmem:[#allocation15_spill] sm:$0xff] }
 0x59d   :  { %2865 = vmatprep.subr.bf16.mxu1 %v4732_v50  ;;  %2822 = vmatprep.subr.bf16.mxu0 %v4935_v10  ;;  %v2258_v50 = vunpack.c.l.bf16 %v5068_v23 }
 0x5a0   :  { %2823 = vmatpush1.bf16.msra.mxu0 %v4938_v9  ;;  %2866 = vmatpush1.bf16.msra.mxu1 %v4734_v25 }
 0x5a1   :  { %2824 = vmatprep.subr.bf16.mxu0 %v4738_v27  ;;  %2867 = vmatprep.subr.bf16.mxu1 %v4741_v28  ;;  %v5069_v27 = vld [vmem:[#allocation16_spill] sm:$0xff] }
 0x5a2   :  { %v2257_v28 = vunpack.c.l.bf16 %v5069_v27  ;;  %v2261_v14 = vunpack.c.h.bf16 %v5069_v27 }
 0x5a4   :  { %2825 = vmatpush1.bf16.msra.mxu0 %v4736_v26  ;;  %2868 = vmatpush1.bf16.msra.mxu1 %v4745_v29  ;;  %v5070_v29 = vld [vmem:[#allocation17_spill] sm:$0xff] }
 0x5a5   :  { %2826 = vmatprep.subr.bf16.mxu0 %v4747_v31  ;;  %2869 = vmatprep.subr.bf16.mxu1 %v4753_v34  ;;  %v2259_v31 = vunpack.c.l.bf16 %v5070_v29  ;;  %v2263_v0 = vunpack.c.h.bf16 %v5070_v29 }
 0x5a8   :  { %2827 = vmatpush1.bf16.msra.mxu0 %v4751_v33  ;;  %2870 = vmatpush1.bf16.msra.mxu1 %v4759_v30 }
 0x5a9   :  { %2828 = vmatprep.subr.bf16.mxu0 %v4756_v35  ;;  %2871 = vmatprep.subr.bf16.mxu1 %v4765_v37  ;;  %v2262_v37 = vunpack.c.h.bf16 %v5068_v23 }
 0x5ac   :  { %2829 = vmatpush1.bf16.msra.mxu0 %v4763_v36  ;;  %2872 = vmatpush1.bf16.msra.mxu1 %v4769_v38  ;;  %v2260_v36 = vunpack.c.h.bf16 %v5067_v20 }
 0x5ad   :  { %3172 = vmatprep.subr.bf16.mxu0 %v3873_v54  ;;  %3215 = vmatprep.subr.bf16.mxu1 %v3876_v45 }
 0x661   :  { %v2490_v25 = vpop.f32.mrb[52].mxu0  ;;  %v2533_v26 = vpop.f32.mrb[52].mxu1 }
 0x662   :  { %v2542_v33 = vadd.f32 %v2490_v25, %v2256_v49  ;;  %v2544_v34 = vadd.f32 %v2533_v26, %v2258_v50  ;;  %v2492_v35 = vpop.f32.mrb[53].mxu0  ;;  %v2535_v30 = vpop.f32.mrb[53].mxu1 }
 0x663   :  { %v2543_v38 = vadd.f32 %v2492_v35, %v2257_v28  ;;  %v2545_v8 = vadd.f32 %v2535_v30, %v2259_v31  ;;  %v2494_v52 = vpop.f32.mrb[54].mxu0  ;;  %v2537_v56 = vpop.f32.mrb[54].mxu1 }
 0x664   :  { %v3599_v39 = vmul.f32 -1.442695, %v2542_v33  ;;  %v2546_v15 = vadd.f32 %v2494_v52, %v2260_v36  ;;  %v2548_v58 = vadd.f32 %v2537_v56, %v2262_v37  ;;  %v2496_v59 = vpop.f32.mrb[55].mxu0  ;;  %v2539_v32 = vpop.f32.mrb[55].mxu1  ;;  %v3910_v37 = vld [vmem:[#allocation5 + $0xc8] ss:$16 sps:$4 sm:$0xff]  }
 0x665   :  { %v3601_v24 = vmul.f32 -1.442695, %v2543_v38  ;;  %v2547_v63 = vadd.f32 %v2496_v59, %v2261_v14  ;;  %v2549_v46 = vadd.f32 %v2539_v32, %v2263_v0  ;;  %v3603_v51 = vmul.f32 -1.442695, %v2545_v8  ;;  %v3913_v38 = vld [vmem:[#allocation5 + $0xe0] ss:$16 sps:$4 sm:$0xff]  }
 0x666   :  { %4079 = vpow2.f32 %v3599_v39  ;;  %v3600_v4 = vmul.f32 -1.442695, %v2546_v15  ;;  %v3918_v8 = vld [vmem:[#allocation5 + $0xec] ss:$16 sps:$4 sm:$0xff]   ;;  %v3916_v52 = vld [vmem:[#allocation5 + $0xe8] ss:$16 sps:$4 sm:$0xff]  }
 0x667   :  { %4081 = vpow2.f32 %v3601_v24  ;;  %v3602_v53 = vmul.f32 -1.442695, %v2547_v63  ;;  %v3604_v18 = vmul.f32 -1.442695, %v2549_v46  ;;  %v5071_v56 = vld [vmem:[#allocation18_spill] sm:$0xff]  ;;  %v5072_v0 = vld [vmem:[#allocation19_spill] sm:$0xff] }
 0x668   :  { %4083 = vpow2.f32 %v3600_v4  ;;  %v2614_v14 = vunpack.c.l.bf16 %v5071_v56  ;;  %v2616_v39 = vunpack.c.l.bf16 %v5072_v0  ;;  %v5073_v59 = vld [vmem:[#allocation20_spill] sm:$0xff]  ;;  %v5074_v24 = vld [vmem:[#allocation21_spill] sm:$0xff] }
 0x669   :  { %4085 = vpow2.f32 %v3602_v53  ;;  %v2615_v32 = vunpack.c.l.bf16 %v5073_v59  ;;  %v2617_v63 = vunpack.c.l.bf16 %v5074_v24 }
 0x66a   :  { %4087 = vtanh.f32 %v2544_v34 }
 0x66b   :  { %4089 = vpow2.f32 %v3603_v51 }
 0x66c   :  { %4091 = vtanh.f32 %v2548_v58 }
 0x670   :  { %v4080_v1 = vpop.eup %4079 }
 0x671   :  { %v4082_v6 = vpop.eup %4081  ;;  %v2556_v7 = vadd.f32 1.0, %v4080_v1  ;;  %v2618_v1 = vunpack.c.h.bf16 %v5071_v56 }
 0x672   :  { %v2568_v55 = vadd.f32 1.0, %v4082_v6  ;;  %v4084_v13 = vpop.eup %4083  ;;  %v2620_v6 = vunpack.c.h.bf16 %v5072_v0 }
 0x673   :  { %4093 = vrcp.f32 %v2556_v7  ;;  %v2557_v11 = vadd.f32 1.0, %v4084_v13  ;;  %v4086_v17 = vpop.eup %4085 }
 0x674   :  { %4095 = vrcp.f32 %v2568_v55  ;;  %v2569_v61 = vadd.f32 1.0, %v4086_v17  ;;  %v4088_v21 = vpop.eup %4087  ;;  %v2621_v17 = vunpack.c.h.bf16 %v5074_v24 }
 0x675   :  { %4097 = vpow2.f32 %v3604_v18  ;;  %v4090_v44 = vpop.eup %4089 }
 0x676   :  { %4099 = vrcp.f32 %v2557_v11  ;;  %v4092_v42 = vpop.eup %4091  ;;  %v2582_v23 = vadd.f32 1.0, %v4090_v44  ;;  %v2619_v11 = vunpack.c.h.bf16 %v5073_v59 }
 0x677   :  { %4101 = vrcp.f32 %v2569_v61 }
 0x678   :  { %4103 = vrcp.f32 %v2582_v23 }
 0x67d   :  { %v4094_v43 = vpop.eup %4093 }
 0x67e   :  { %v4096_v19 = vpop.eup %4095  ;;  %v2590_v54 = vmul.f32 %v4094_v43, %v4088_v21 }
 0x67f   :  { %v4098_v45 = vpop.eup %4097  ;;  %v2588_v20 = vmul.f32 %v4096_v19, %v4889_v22 }
 0x680   :  { %v4100_v49 = vpop.eup %4099  ;;  %v2583_v27 = vadd.f32 1.0, %v4098_v45 }
 0x681   :  { %v4964_v50 = vadd.f32 %v2590_v54, %v2588_v20  ;;  %v2591_v25 = vmul.f32 %v4100_v49, %v4092_v42  ;;  %v4102_v26 = vpop.eup %4101 }
 0x682   :  { %v2589_v28 = vmul.f32 %v4102_v26, %v4893_v60  ;;  %v4104_v31 = vpop.eup %4103  ;;  %v3894_v60 = vld [vmem:[#allocation5 + $0x4c] ss:$16 sps:$4 sm:$0xff]  }
 0x683   :  { %4105 = vtanh.f32 %v4964_v50 }
 0x684   :  { %v4968_v29 = vadd.f32 %v2591_v25, %v2589_v28  ;;  %4107 = vrcp.f32 %v2583_v27 }
 0x686   :  { %4109 = vtanh.f32 %v4968_v29 }
 0x68d   :  { %v4106_v33 = vpop.eup %4105 }
 0x68e   :  { %v4108_v22 = vpop.eup %4107  ;;  %v2596_v35 = vmul.f32 %v4106_v33, %v4104_v31 }
 0x690   :  { %v4110_v34 = vpop.eup %4109 }
 0x691   :  { %v2597_v30 = vmul.f32 %v4110_v34, %v4108_v22 }
 0x693   :  { %v2598_v36 = vpack.c.bf16 %v2597_v30, %v2596_v35 }
 0x695   :  { %3753 = vst [vmem:[%s5024_s4 + $0x28] sm:$0xff] %v2598_v36   ;;  %2847 = vmatmul.mubr.bf16.vlgmr.msra.gmra.mrb[56].mxu0 %v2598_v36  ;;  %2890 = vmatmul.mubr.bf16.vlgmr.msra.gmra.mrb[56].mxu1 %v2598_v36 }
 0x696   :  { %3173 = vmatpush1.bf16.msra.mxu0 %v4901_v12  ;;  %3216 = vmatpush1.bf16.msra.mxu1 %v4903_v57  ;;  %v3892_v12 = vld [vmem:[#allocation5 + $0x48] ss:$16 sps:$4 sm:$0xff]  }
 0x697   :  { %3174 = vmatprep.subr.bf16.mxu0 %v4907_v47  ;;  %3217 = vmatprep.subr.bf16.mxu1 %v4909_v3  ;;  %v3895_v57 = vld [vmem:[#allocation5 + $0x68] ss:$16 sps:$4 sm:$0xff]   ;;  %v3900_v47 = vld [vmem:[#allocation5 + $0x8c] ss:$16 sps:$4 sm:$0xff]  }
 0x698   :  { %3204 = vmatprep.mubr.bf16.mxu0 %v5061_v16  ;;  %3247 = vmatprep.mubr.bf16.mxu1 %v5061_v16  ;;  %v3897_v16 = vld [vmem:[#allocation5 + $0x6c] ss:$16 sps:$4 sm:$0xff]   ;;  %v3898_v3 = vld [vmem:[#allocation5 + $0x88] ss:$16 sps:$4 sm:$0xff]  }
 0x69a   :  { %3175 = vmatpush1.bf16.msra.mxu0 %v4911_v5  ;;  %3218 = vmatpush1.bf16.msra.mxu1 %v4913_v48  ;;  %v3901_v5 = vld [vmem:[#allocation5 + $0xa0] ss:$16 sps:$4 sm:$0xff]   ;;  %v3903_v48 = vld [vmem:[#allocation5 + $0xa4] ss:$16 sps:$4 sm:$0xff]  }
 0x69b   :  { %3176 = vmatprep.subr.bf16.mxu0 %v4919_v2  ;;  %3219 = vmatprep.subr.bf16.mxu1 %v3894_v60  ;;  %v3906_v2 = vld [vmem:[#allocation5 + $0xac] ss:$16 sps:$4 sm:$0xff]  }
 0x69e   :  { %3177 = vmatpush1.bf16.msra.mxu0 %v4922_v62  ;;  %3220 = vmatpush1.bf16.msra.mxu1 %v3892_v12  ;;  %v3904_v62 = vld [vmem:[#allocation5 + $0xa8] ss:$16 sps:$4 sm:$0xff]  }
 0x69f   :  { %3178 = vmatprep.subr.bf16.mxu0 %v4927_v40  ;;  %3221 = vmatprep.subr.bf16.mxu1 %v3897_v16  ;;  %v3909_v40 = vld [vmem:[#allocation5 + $0xc4] ss:$16 sps:$4 sm:$0xff]  }
 0x6a2   :  { %3179 = vmatpush1.bf16.msra.mxu0 %v4930_v41  ;;  %3222 = vmatpush1.bf16.msra.mxu1 %v3895_v57  ;;  %v3907_v41 = vld [vmem:[#allocation5 + $0xc0] ss:$16 sps:$4 sm:$0xff]  }
 0x6a3   :  { %3180 = vmatprep.subr.bf16.mxu0 %v4935_v10  ;;  %3223 = vmatprep.subr.bf16.mxu1 %v3900_v47  ;;  %v3912_v10 = vld [vmem:[#allocation5 + $0xcc] ss:$16 sps:$4 sm:$0xff]  }
 0x6a6   :  { %3181 = vmatpush1.bf16.msra.mxu0 %v4938_v9  ;;  %3224 = vmatpush1.bf16.msra.mxu1 %v3898_v3  ;;  %v3915_v9 = vld [vmem:[#allocation5 + $0xe4] ss:$16 sps:$4 sm:$0xff]  }
 0x6a7   :  { %3182 = vmatprep.subr.bf16.mxu0 %v3903_v48  ;;  %3225 = vmatprep.subr.bf16.mxu1 %v3906_v2 }
 0x6aa   :  { %3183 = vmatpush1.bf16.msra.mxu0 %v3901_v5  ;;  %3226 = vmatpush1.bf16.msra.mxu1 %v3904_v62 }
 0x6ab   :  { %3184 = vmatprep.subr.bf16.mxu0 %v3909_v40  ;;  %3227 = vmatprep.subr.bf16.mxu1 %v3912_v10 }
 0x6ae   :  { %3185 = vmatpush1.bf16.msra.mxu0 %v3907_v41  ;;  %3228 = vmatpush1.bf16.msra.mxu1 %v3910_v37 }
 0x6af   :  { %3186 = vmatprep.subr.bf16.mxu0 %v3915_v9  ;;  %3229 = vmatprep.subr.bf16.mxu1 %v3918_v8 }
 0x6b2   :  { %3187 = vmatpush1.bf16.msra.mxu0 %v3913_v38  ;;  %3230 = vmatpush1.bf16.msra.mxu1 %v3916_v52 }
 0x768   :  { %v2848_v15 = vpop.f32.mrb[56].mxu0  ;;  %v2891_v58 = vpop.f32.mrb[56].mxu1 }
 0x769   :  { %v2900_v46 = vadd.f32 %v2848_v15, %v2614_v14  ;;  %v2902_v4 = vadd.f32 %v2891_v58, %v2616_v39  ;;  %v2850_v53 = vpop.f32.mrb[57].mxu0  ;;  %v2893_v51 = vpop.f32.mrb[57].mxu1  ;;  %v5076_v39 = vld [vmem:[#allocation23_spill] sm:$0xff] }
 0x76a   :  { %v2901_v7 = vadd.f32 %v2850_v53, %v2615_v32  ;;  %v2903_v18 = vadd.f32 %v2893_v51, %v2617_v63  ;;  %v2852_v55 = vpop.f32.mrb[58].mxu0  ;;  %v2895_v13 = vpop.f32.mrb[58].mxu1  ;;  %v2974_v15 = vunpack.c.l.bf16 %v5076_v39  ;;  %v5077_v32 = vld [vmem:[#allocation24_spill] sm:$0xff]  ;;  %v5078_v63 = vld [vmem:[#allocation25_spill] sm:$0xff] }
 0x76b   :  { %v3641_v61 = vmul.f32 -1.442695, %v2900_v46  ;;  %v2904_v21 = vadd.f32 %v2852_v55, %v2618_v1  ;;  %v2906_v44 = vadd.f32 %v2895_v13, %v2620_v6  ;;  %v2854_v42 = vpop.f32.mrb[59].mxu0  ;;  %v2897_v43 = vpop.f32.mrb[59].mxu1  ;;  %v2973_v24 = vunpack.c.l.bf16 %v5077_v32 }
 0x76c   :  { %v3643_v19 = vmul.f32 -1.442695, %v2901_v7  ;;  %v2905_v54 = vadd.f32 %v2854_v42, %v2619_v11  ;;  %v2907_v45 = vadd.f32 %v2897_v43, %v2621_v17  ;;  %v3645_v23 = vmul.f32 -1.442695, %v2903_v18 }
 0x76d   :  { %4111 = vpow2.f32 %v3641_v61  ;;  %v3642_v20 = vmul.f32 -1.442695, %v2904_v21  ;;  %v2975_v46 = vunpack.c.l.bf16 %v5078_v63  ;;  %v2978_v7 = vunpack.c.h.bf16 %v5076_v39 }
 0x76e   :  { %4113 = vpow2.f32 %v3643_v19  ;;  %v3644_v49 = vmul.f32 -1.442695, %v2905_v54  ;;  %v3646_v28 = vmul.f32 -1.442695, %v2907_v45  ;;  %v2977_v17 = vunpack.c.h.bf16 %v5077_v32 }
 0x76f   :  { %4115 = vpow2.f32 %v3642_v20  ;;  %v2979_v61 = vunpack.c.h.bf16 %v5078_v63 }
 0x770   :  { %4117 = vpow2.f32 %v3644_v49 }
 0x771   :  { %4119 = vtanh.f32 %v2902_v4 }
 0x772   :  { %4121 = vpow2.f32 %v3645_v23 }
 0x773   :  { %4123 = vtanh.f32 %v2906_v44 }
 0x777   :  { %v4112_v25 = vpop.eup %4111 }
 0x778   :  { %v4114_v26 = vpop.eup %4113  ;;  %v2914_v27 = vadd.f32 1.0, %v4112_v25 }
 0x779   :  { %v2926_v31 = vadd.f32 1.0, %v4114_v26  ;;  %v4116_v33 = vpop.eup %4115 }
 0x77a   :  { %4125 = vrcp.f32 %v2914_v27  ;;  %v2915_v22 = vadd.f32 1.0, %v4116_v33  ;;  %v4118_v34 = vpop.eup %4117 }
 0x77b   :  { %4127 = vrcp.f32 %v2926_v31  ;;  %v2927_v35 = vadd.f32 1.0, %v4118_v34  ;;  %v4120_v30 = vpop.eup %4119 }
 0x77c   :  { %4129 = vpow2.f32 %v3646_v28  ;;  %v4122_v36 = vpop.eup %4121 }
 0x77d   :  { %4131 = vrcp.f32 %v2915_v22  ;;  %v4124_v60 = vpop.eup %4123  ;;  %v2940_v48 = vadd.f32 1.0, %v4122_v36 }
 0x77e   :  { %4133 = vrcp.f32 %v2927_v35 }
 0x77f   :  { %4135 = vrcp.f32 %v2940_v48 }
 0x784   :  { %v4126_v12 = vpop.eup %4125 }
 0x785   :  { %v4128_v16 = vpop.eup %4127  ;;  %v2948_v57 = vmul.f32 %v4126_v12, %v4120_v30 }
 0x786   :  { %v4130_v47 = vpop.eup %4129  ;;  %v2946_v3 = vmul.f32 %v4128_v16, %v4964_v50 }
 0x787   :  { %v4132_v5 = vpop.eup %4131  ;;  %v2941_v41 = vadd.f32 1.0, %v4130_v47 }
 0x788   :  { %v4997_v2 = vadd.f32 %v2948_v57, %v2946_v3  ;;  %v2949_v62 = vmul.f32 %v4132_v5, %v4124_v60  ;;  %v4134_v40 = vpop.eup %4133 }
 0x789   :  { %v2947_v10 = vmul.f32 %v4134_v40, %v4968_v29  ;;  %v4136_v37 = vpop.eup %4135  ;;  %v5075_v29 = vld [vmem:[#allocation22_spill] sm:$0xff] }
 0x78a   :  { %4137 = vtanh.f32 %v4997_v2  ;;  %v2972_v0 = vunpack.c.l.bf16 %v5075_v29  ;;  %v2976_v6 = vunpack.c.h.bf16 %v5075_v29 }
 0x78b   :  { %v5001_v9 = vadd.f32 %v2949_v62, %v2947_v10  ;;  %4139 = vrcp.f32 %v2941_v41 }
 0x78d   :  { %4141 = vtanh.f32 %v5001_v9 }
 0x794   :  { %v4138_v38 = vpop.eup %4137 }
 0x795   :  { %v4140_v50 = vpop.eup %4139  ;;  %v2954_v52 = vmul.f32 %v4138_v38, %v4136_v37 }
 0x797   :  { %v4142_v8 = vpop.eup %4141 }
 0x798   :  { %v2955_v56 = vmul.f32 %v4142_v8, %v4140_v50 }
 0x79a   :  { %v2956_v14 = vpack.c.bf16 %v2955_v56, %v2954_v52 }
 0x79c   :  { %3754 = vst [vmem:[%s5024_s4 + $0x30] sm:$0xff] %v2956_v14   ;;  %3205 = vmatmul.mubr.bf16.vlgmr.msra.gmra.mrb[60].mxu0 %v2956_v14  ;;  %3248 = vmatmul.mubr.bf16.vlgmr.msra.gmra.mrb[60].mxu1 %v2956_v14 }
 0x86f   :  { %v3206_v58 = vpop.f32.mrb[60].mxu0  ;;  %v3249_v59 = vpop.f32.mrb[60].mxu1 }
 0x870   :  { %v3258_v4 = vadd.f32 %v3206_v58, %v2972_v0  ;;  %v3260_v53 = vadd.f32 %v3249_v59, %v2974_v15  ;;  %v3208_v51 = vpop.f32.mrb[61].mxu0  ;;  %v3251_v1 = vpop.f32.mrb[61].mxu1 }
 0x871   :  { %v3259_v18 = vadd.f32 %v3208_v51, %v2973_v24  ;;  %v3261_v55 = vadd.f32 %v3251_v1, %v2975_v46  ;;  %v3210_v13 = vpop.f32.mrb[62].mxu0  ;;  %v3253_v11 = vpop.f32.mrb[62].mxu1 }
 0x872   :  { %v3683_v21 = vmul.f32 -1.442695, %v3258_v4  ;;  %v3262_v44 = vadd.f32 %v3210_v13, %v2976_v6  ;;  %v3264_v42 = vadd.f32 %v3253_v11, %v2978_v7  ;;  %v3212_v43 = vpop.f32.mrb[63].mxu0  ;;  %v3255_v19 = vpop.f32.mrb[63].mxu1 }
 0x873   :  { %v3685_v54 = vmul.f32 -1.442695, %v3259_v18  ;;  %v3263_v45 = vadd.f32 %v3212_v43, %v2977_v17  ;;  %v3265_v20 = vadd.f32 %v3255_v19, %v2979_v61  ;;  %v3687_v25 = vmul.f32 -1.442695, %v3261_v55 }
 0x874   :  { %4143 = vpow2.f32 %v3683_v21  ;;  %v3684_v49 = vmul.f32 -1.442695, %v3262_v44 }
 0x875   :  { %4145 = vpow2.f32 %v3685_v54  ;;  %v3686_v23 = vmul.f32 -1.442695, %v3263_v45  ;;  %v3688_v31 = vmul.f32 -1.442695, %v3265_v20 }
 0x876   :  { %4147 = vpow2.f32 %v3684_v49 }
 0x877   :  { %4149 = vpow2.f32 %v3686_v23 }
 0x878   :  { %4151 = vtanh.f32 %v3260_v53 }
 0x879   :  { %4153 = vpow2.f32 %v3687_v25 }
 0x87a   :  { %4155 = vtanh.f32 %v3264_v42 }
 0x87e   :  { %v4144_v26 = vpop.eup %4143 }
 0x87f   :  { %v4146_v27 = vpop.eup %4145  ;;  %v3272_v28 = vadd.f32 1.0, %v4144_v26 }
 0x880   :  { %v3284_v33 = vadd.f32 1.0, %v4146_v27  ;;  %v4148_v22 = vpop.eup %4147 }
 0x881   :  { %4157 = vrcp.f32 %v3272_v28  ;;  %v3273_v34 = vadd.f32 1.0, %v4148_v22  ;;  %v4150_v35 = vpop.eup %4149 }
 0x882   :  { %4159 = vrcp.f32 %v3284_v33  ;;  %v3285_v30 = vadd.f32 1.0, %v4150_v35  ;;  %v4152_v36 = vpop.eup %4151 }
 0x883   :  { %4161 = vpow2.f32 %v3688_v31  ;;  %v4154_v60 = vpop.eup %4153 }
 0x884   :  { %4163 = vrcp.f32 %v3273_v34  ;;  %v4156_v12 = vpop.eup %4155  ;;  %v3298_v3 = vadd.f32 1.0, %v4154_v60 }
 0x885   :  { %4165 = vrcp.f32 %v3285_v30 }
 0x886   :  { %4167 = vrcp.f32 %v3298_v3 }
 0x88b   :  { %v4158_v16 = vpop.eup %4157 }
 0x88c   :  { %v4160_v57 = vpop.eup %4159  ;;  %v3306_v47 = vmul.f32 %v4158_v16, %v4152_v36 }
 0x88d   :  { %v4162_v5 = vpop.eup %4161  ;;  %v3304_v48 = vmul.f32 %v4160_v57, %v4997_v2 }
 0x88e   :  { %v4164_v62 = vpop.eup %4163  ;;  %v3299_v37 = vadd.f32 1.0, %v4162_v5 }
 0x88f   :  { %v3308_v40 = vadd.f32 %v3306_v47, %v3304_v48  ;;  %v3307_v41 = vmul.f32 %v4164_v62, %v4156_v12  ;;  %v4166_v10 = vpop.eup %4165 }
 0x890   :  { %v3305_v38 = vmul.f32 %v4166_v10, %v5001_v9  ;;  %v4168_v8 = vpop.eup %4167 }
 0x891   :  { %4169 = vtanh.f32 %v3308_v40 }
 0x892   :  { %v3309_v50 = vadd.f32 %v3307_v41, %v3305_v38  ;;  %4171 = vrcp.f32 %v3299_v37 }
 0x894   :  { %4173 = vtanh.f32 %v3309_v50 }
 0x89b   :  { %v4170_v52 = vpop.eup %4169 }
 0x89c   :  { %v3312_v56 = vmul.f32 %v4170_v52, %v4168_v8  ;;  %v4172_v14 = vpop.eup %4171 }
 0x89e   :  { %v4174_v29 = vpop.eup %4173 }
 0x89f   :  { %v3313_v0 = vmul.f32 %v4174_v29, %v4172_v14 }
 0x8a1   :  { %v3747_v39 = vpack.c.bf16 %v3313_v0, %v3312_v56 }
 0x8a3   :  { %3755 = vst [vmem:[%s5024_s4 + $0x38] sm:$0xff] %v3747_v39  }
 0x8a4   :  { %3329 = vsyncpa [#allocation4], 1 }
 0x8a5   :  { %3330 = vsyncpa [#allocation6], 1 }

</bundles_post_ra>
